<compile_context>
chip_gen: v5e
topology: v5e:2x2
jax: 0.10.0
libtpu: 0.0.40
codegen_flags: <defaults>
</compile_context>

<pallas_src>
import jax
import jax.numpy as jnp
from jax.experimental import pallas as pl
from jax.experimental.pallas import tpu as pltpu


# ------------------------------ Pallas kernel ------------------------------

def _bottleneck_fused_kernel(x_ref, w1_ref, s1_ref, b1_ref,
                             w2_ref, s2_ref, b2_ref,
                             w3_ref, s3_ref, b3_ref,
                             o_ref, slab_ref):
    # x_ref    : (1, H, W, Cp)    bf16  channel-zero-padded input (one image)
    # w1_ref   : (Cp, Pp)         bf16
    # w2_ref   : (3, 3*Pp, Pp)    bf16  [kh, kw*Pp + cin, cout]
    # w3_ref   : (Pp, Ep)         bf16
    # s*/b*    : (1, C)           f32   folded BatchNorm scale / bias
    # o_ref    : (1, H, W, Ep)    bf16
    # slab_ref : (H+2, W, 3*Pp)   bf16  kw-pre-shifted im2col slab, H-halo only
    _, h, w, cp = x_ref.shape
    pp = w1_ref.shape[1]
    ep = w3_ref.shape[1]
    hw = h * w
    bf16 = jnp.bfloat16
    f32 = jnp.float32

    # ---- conv1 (1x1) + bn1 + relu   (MXU: (H*W, Cp) x (Cp, Pp)) ------------
    x2d = x_ref[...].reshape(hw, cp)                          # bf16
    y1 = jnp.dot(x2d, w1_ref[...], preferred_element_type=f32)
    y1 = jnp.maximum(y1 * s1_ref[...] + b1_ref[...], 0.0)     # f32 (H*W, Pp)

    # ---- stage conv2's input: kw-pre-shifted, channel-blocked bf16 slab -----
    # Zero only the two H-halo rows (not the whole buffer); done every grid
    # step so it stays correct under megacore 'parallel' sharding.
    zero_row = jnp.zeros((1, w, 3 * pp), bf16)
    slab_ref[pl.ds(0, 1)] = zero_row
    slab_ref[pl.ds(h + 1, 1)] = zero_row

    # kw shifts done once, in flat (H*W) row space, on the f32 conv1 output:
    # sublane roll (XLU) + iota mask kills both the W image edge and the
    # row-to-row wrap of the flattened shift.
    wpos = jax.lax.broadcasted_iota(jnp.int32, (hw, 1), 0) % w
    left = jnp.where(wpos > 0, pltpu.roll(y1, 1, 0), 0.0)            # y1[h, w-1]
    right = jnp.where(wpos < w - 1, pltpu.roll(y1, hw - 1, 0), 0.0)  # y1[h, w+1]

    rows = pl.ds(1, h)
    slab_ref[rows, :, pl.ds(0 * pp, pp)] = left.reshape(h, w, pp).astype(bf16)
    slab_ref[rows, :, pl.ds(1 * pp, pp)] = y1.reshape(h, w, pp).astype(bf16)
    slab_ref[rows, :, pl.ds(2 * pp, pp)] = right.reshape(h, w, pp).astype(bf16)

    # ---- conv2 (3x3, stride 1, pad 1) + bn2 + relu --------------------------
    # Three K-fused matmuls (K = 3*Pp), one per kh; the kh row slices are
    # leading-dim slices of the slab, fully lane/sublane aligned.
    acc = jnp.dot(slab_ref[pl.ds(0, h)].reshape(hw, 3 * pp), w2_ref[0],
                  preferred_element_type=f32)
    for kh in (1, 2):
        acc = acc + jnp.dot(slab_ref[pl.ds(kh, h)].reshape(hw, 3 * pp),
                            w2_ref[kh], preferred_element_type=f32)
    y2 = jnp.maximum(acc * s2_ref[...] + b2_ref[...], 0.0)

    # ---- conv3 (1x1) + bn3 + residual add (f32) + relu ----------------------
    y3 = jnp.dot(y2.astype(bf16), w3_ref[...], preferred_element_type=f32)
    y3 = y3 * s3_ref[...] + b3_ref[...]
    y3 = jnp.maximum(y3 + x2d.astype(f32), 0.0)               # Cp == Ep here
    o_ref[...] = y3.reshape(1, h, w, ep).astype(o_ref.dtype)


# -------------------------------- Wrapper ----------------------------------

def _round_up(x, m=128):
    return ((x + m - 1) // m) * m


def _pad_axis(a, axis, target):
    pads = [(0, 0)] * a.ndim
    pads[axis] = (0, target - a.shape[axis])
    return jnp.pad(a, pads)


def bottleneck_forward(x_nchw, params, *, stride=1, output_layout="nchw"):
    """Bottleneck forward (downsample=None).

    NCHW f32 in.  output_layout="nchw" -> NCHW f32 (drop-in for the PyTorch
    module); "nhwc" -> kernel-native NHWC bf16 (skips the slice/transpose HBM
    pass, preferred when stacking blocks).
    """
    n, cin, h, w = x_nchw.shape
    planes = params["w1"].shape[1]
    expansion_c = params["w3"].shape[1]
    assert stride == 1 and cin == expansion_c, (
        "downsample=None requires stride=1 and inplanes == planes*4")

    cp = _round_up(cin)          # lane-dense (multiple of 128) channel padding
    pp = _round_up(planes)
    ep = _round_up(expansion_c)
    assert cp == ep              # identity residual in padded channel space

    bf16, f32 = jnp.bfloat16, jnp.float32

    # NHWC, bf16, channel zero-padded input.
    x = jnp.transpose(x_nchw, (0, 2, 3, 1)).astype(bf16)
    x = _pad_axis(x, 3, cp)

    # Zero-pad weights / folded-BN params to the padded channel widths.
    w1 = _pad_axis(_pad_axis(params["w1"].astype(bf16), 0, cp), 1, pp)
    w2 = _pad_axis(_pad_axis(params["w2"].astype(bf16), 2, pp), 3, pp)
    w2 = w2.reshape(3, 3 * pp, pp)            # [kh, kw*Pp + cin, cout]
    w3 = _pad_axis(_pad_axis(params["w3"].astype(bf16), 0, pp), 1, ep)
    s1 = _pad_axis(params["scale1"].astype(f32), 1, pp)
    b1 = _pad_axis(params["bias1"].astype(f32), 1, pp)
    s2 = _pad_axis(params["scale2"].astype(f32), 1, pp)
    b2 = _pad_axis(params["bias2"].astype(f32), 1, pp)
    s3 = _pad_axis(params["scale3"].astype(f32), 1, ep)
    b3 = _pad_axis(params["bias3"].astype(f32), 1, ep)

    # Weights / BN params: whole-array resident in VMEM, no double-buffering.
    vmem_resident = pl.BlockSpec(memory_space=pltpu.MemorySpace.VMEM)

    out = pl.pallas_call(
        _bottleneck_fused_kernel,
        out_shape=jax.ShapeDtypeStruct((n, h, w, ep), bf16),
        grid=(n,),
        in_specs=[
            pl.BlockSpec((1, h, w, cp), lambda b: (b, 0, 0, 0)),
            vmem_resident, vmem_resident, vmem_resident,    # w1, s1, b1
            vmem_resident, vmem_resident, vmem_resident,    # w2, s2, b2
            vmem_resident, vmem_resident, vmem_resident,    # w3, s3, b3
        ],
        out_specs=pl.BlockSpec((1, h, w, ep), lambda b: (b, 0, 0, 0)),
        scratch_shapes=[pltpu.VMEM((h + 2, w, 3 * pp), bf16)],
        compiler_params=pltpu.CompilerParams(
            dimension_semantics=("parallel",),
            vmem_limit_bytes=48 * 1024 * 1024),
    )(x, w1, s1, b1, w2, s2, b2, w3, s3, b3)

    out = out[..., :expansion_c]                 # drop the padded channels
    if output_layout == "nhwc":
        return out                               # bf16, NHWC (block-stacking)
    return jnp.transpose(out, (0, 3, 1, 2)).astype(f32)   # NCHW, f32


# ------------------------------- Reference ---------------------------------

def bottleneck_reference(x_nchw, p, *, stride=1, quantize=True):
    """Pure-JAX reference.  quantize=True matches the kernel's bf16 points;
    quantize=False is the full-f32 PyTorch-equivalent path (non-circular)."""
    f32, bf16 = jnp.float32, jnp.bfloat16
    if quantize:
        q = lambda a: a.astype(bf16).astype(f32)
    else:
        q = lambda a: a.astype(f32)
    x = q(jnp.transpose(x_nchw, (0, 2, 3, 1)))

    def bn(y, s, b):
        return y * s.reshape(1, 1, 1, -1) + b.reshape(1, 1, 1, -1)

    y = jnp.einsum("nhwc,cd->nhwd", x, q(p["w1"]))
    y = q(jax.nn.relu(bn(y, p["scale1"], p["bias1"])))
    y = jax.lax.conv_general_dilated(
        y, q(p["w2"]), (stride, stride), "SAME",
        dimension_numbers=("NHWC", "HWIO", "NHWC"))
    y = q(jax.nn.relu(bn(y, p["scale2"], p["bias2"])))
    y = jnp.einsum("nhwc,cd->nhwd", y, q(p["w3"]))
    y = q(jax.nn.relu(bn(y, p["scale3"], p["bias3"]) + x))
    return jnp.transpose(y, (0, 3, 1, 2))


# ------------------------------ Param init ----------------------------------

def init_params(key, inplanes, planes):
    ks = jax.random.split(key, 6)

    def bn_fold(k, c):
        k1, k2, k3, k4 = jax.random.split(k, 4)
        gamma = 1.0 + 0.1 * jax.random.normal(k1, (c,), jnp.float32)
        beta = 0.1 * jax.random.normal(k2, (c,), jnp.float32)
        mean = 0.1 * jax.random.normal(k3, (c,), jnp.float32)
        var = 1.0 + 0.1 * jnp.abs(jax.random.normal(k4, (c,), jnp.float32))
        scale = gamma * jax.lax.rsqrt(var + 1e-5)
        bias = beta - mean * scale
        return scale.reshape(1, c), bias.reshape(1, c)

    exp_c = planes * 4
    p = {
        # conv1: torch (planes, inplanes, 1, 1) -> (inplanes, planes) matmul
        "w1": 0.1 * jax.random.normal(ks[0], (inplanes, planes), jnp.float32),
        # conv2: torch OIHW (planes, planes, 3, 3) -> HWIO (3, 3, planes, planes)
        "w2": 0.1 * jax.random.normal(ks[1], (3, 3, planes, planes),
                                      jnp.float32),
        # conv3: torch (planes*4, planes, 1, 1) -> (planes, planes*4)
        "w3": 0.1 * jax.random.normal(ks[2], (planes, exp_c), jnp.float32),
    }
    p["scale1"], p["bias1"] = bn_fold(ks[3], planes)
    p["scale2"], p["bias2"] = bn_fold(ks[4], planes)
    p["scale3"], p["bias3"] = bn_fold(ks[5], exp_c)
    return p


# ---------------------------------- Main -------------------------------------

if __name__ == "__main__":
    key = jax.random.PRNGKey(0)
    k_param, k_x = jax.random.split(key)

    inplanes, planes = 16, 4        # identity residual requires inplanes == planes*4
    N, H, W = 2, 16, 16
    params = init_params(k_param, inplanes, planes)
    x = jax.random.normal(k_x, (N, inplanes, H, W), jnp.float32)   # NCHW like PyTorch

    out = jax.block_until_ready(bottleneck_forward(x, params, stride=1))
    assert out.shape == (N, planes * 4, H, W), out.shape

    # Tight check vs a reference with the same bf16 quantization points
    # (isolates kernel math errors from bf16 rounding).
    ref_q = bottleneck_reference(x, params, stride=1, quantize=True)
    err_q = float(jnp.max(jnp.abs(out - ref_q)))
    assert err_q < 5e-3, f"mismatch vs bf16-matched reference: {err_q}"

    # Coarse, non-circular check vs the full-f32 PyTorch-equivalent reference;
    # the bound is the bf16 activation/IO rounding budget at these magnitudes.
    ref_f = bottleneck_reference(x, params, stride=1, quantize=False)
    err_f = float(jnp.max(jnp.abs(out - ref_f)))
    assert err_f < 1e-1, f"mismatch vs f32 reference: {err_f}"

    print("KERNEL_OK")
</pallas_src>

<mosaic_0001>
module attributes {stable_mosaic.version = 11 : i64} {
  func.func @_bottleneck_fused_kernel(%arg0: i32, %arg1: memref<1x16x16x128xbf16, #tpu.memory_space<vmem>>, %arg2: memref<128x128xbf16, #tpu.memory_space<vmem>>, %arg3: memref<1x128xf32, #tpu.memory_space<vmem>>, %arg4: memref<1x128xf32, #tpu.memory_space<vmem>>, %arg5: memref<3x384x128xbf16, #tpu.memory_space<vmem>>, %arg6: memref<1x128xf32, #tpu.memory_space<vmem>>, %arg7: memref<1x128xf32, #tpu.memory_space<vmem>>, %arg8: memref<128x128xbf16, #tpu.memory_space<vmem>>, %arg9: memref<1x128xf32, #tpu.memory_space<vmem>>, %arg10: memref<1x128xf32, #tpu.memory_space<vmem>>, %arg11: memref<1x16x16x128xbf16, #tpu.memory_space<vmem>>, %arg12: memref<18x16x384xbf16, #tpu.memory_space<vmem>>) attributes {dimension_semantics = [#tpu.dimension_semantics<parallel>], iteration_bounds = array<i64: 2>, scalar_prefetch = 0 : i64, scratch_operands = 1 : i64, tpu.core_type = #tpu.core_type<tc>, window_params = [{transform_indices = @transform_0, window_bounds = array<i64: 1, 16, 16, 128>}, {pipeline_mode = #tpu.pipeline_mode<synchronous>, transform_indices = @transform_1, window_bounds = array<i64: 128, 128>}, {pipeline_mode = #tpu.pipeline_mode<synchronous>, transform_indices = @transform_2, window_bounds = array<i64: 1, 128>}, {pipeline_mode = #tpu.pipeline_mode<synchronous>, transform_indices = @transform_3, window_bounds = array<i64: 1, 128>}, {pipeline_mode = #tpu.pipeline_mode<synchronous>, transform_indices = @transform_4, window_bounds = array<i64: 3, 384, 128>}, {pipeline_mode = #tpu.pipeline_mode<synchronous>, transform_indices = @transform_5, window_bounds = array<i64: 1, 128>}, {pipeline_mode = #tpu.pipeline_mode<synchronous>, transform_indices = @transform_6, window_bounds = array<i64: 1, 128>}, {pipeline_mode = #tpu.pipeline_mode<synchronous>, transform_indices = @transform_7, window_bounds = array<i64: 128, 128>}, {pipeline_mode = #tpu.pipeline_mode<synchronous>, transform_indices = @transform_8, window_bounds = array<i64: 1, 128>}, {pipeline_mode = #tpu.pipeline_mode<synchronous>, transform_indices = @transform_9, window_bounds = array<i64: 1, 128>}, {transform_indices = @transform_10, window_bounds = array<i64: 1, 16, 16, 128>}]} {
    %c0 = arith.constant 0 : index
    %c0_0 = arith.constant 0 : index
    %c0_1 = arith.constant 0 : index
    %c0_2 = arith.constant 0 : index
    %0 = vector.load %arg1[%c0, %c0_0, %c0_1, %c0_2] : memref<1x16x16x128xbf16, #tpu.memory_space<vmem>>, vector<1x16x16x128xbf16>
    %1 = vector.shape_cast %0 : vector<1x16x16x128xbf16> to vector<256x128xbf16>
    %c0_3 = arith.constant 0 : index
    %c0_4 = arith.constant 0 : index
    %2 = vector.load %arg2[%c0_3, %c0_4] : memref<128x128xbf16, #tpu.memory_space<vmem>>, vector<128x128xbf16>
    %cst = arith.constant dense<0.000000e+00> : vector<256x128xf32>
    %3 = tpu.matmul %1, %2, %cst {dimension_numbers = #tpu.dot_dimension_numbers<[1], [0], [0], [1], [0, 0, 1, 1], [], []>} : vector<256x128xbf16>, vector<128x128xbf16>, vector<256x128xf32> -> vector<256x128xf32>
    %c0_5 = arith.constant 0 : index
    %c0_6 = arith.constant 0 : index
    %4 = vector.load %arg3[%c0_5, %c0_6] : memref<1x128xf32, #tpu.memory_space<vmem>>, vector<1x128xf32>
    %5 = vector.broadcast %4 : vector<1x128xf32> to vector<256x128xf32>
    %6 = arith.mulf %3, %5 : vector<256x128xf32>
    %c0_7 = arith.constant 0 : index
    %c0_8 = arith.constant 0 : index
    %7 = vector.load %arg4[%c0_7, %c0_8] : memref<1x128xf32, #tpu.memory_space<vmem>>, vector<1x128xf32>
    %8 = vector.broadcast %7 : vector<1x128xf32> to vector<256x128xf32>
    %9 = arith.addf %6, %8 : vector<256x128xf32>
    %cst_9 = arith.constant 0.000000e+00 : f32
    %10 = vector.broadcast %cst_9 : f32 to vector<256x128xf32>
    %11 = arith.maximumf %9, %10 : vector<256x128xf32>
    %cst_10 = arith.constant 0.000000e+00 : bf16
    %12 = vector.broadcast %cst_10 : bf16 to vector<1x16x384xbf16>
    %c0_11 = arith.constant 0 : index
    %c0_12 = arith.constant 0 : index
    %c0_13 = arith.constant 0 : index
    %13 = vector.load %arg12[%c0_11, %c0_12, %c0_13] : memref<18x16x384xbf16, #tpu.memory_space<vmem>>, vector<1x16x384xbf16>
    tpu.vector_store %arg12[%c0_11, %c0_12, %c0_13], %12 {strides = array<i32>} : memref<18x16x384xbf16, #tpu.memory_space<vmem>>, vector<1x16x384xbf16>,
    %c17 = arith.constant 17 : index
    %c0_14 = arith.constant 0 : index
    %c0_15 = arith.constant 0 : index
    %14 = vector.load %arg12[%c17, %c0_14, %c0_15] : memref<18x16x384xbf16, #tpu.memory_space<vmem>>, vector<1x16x384xbf16>
    tpu.vector_store %arg12[%c17, %c0_14, %c0_15], %12 {strides = array<i32>} : memref<18x16x384xbf16, #tpu.memory_space<vmem>>, vector<1x16x384xbf16>,
    %15 = tpu.iota {dimensions = array<i32: 0>} : vector<256x1xi32>
    %c16_i32 = arith.constant 16 : i32
    %c0_i32 = arith.constant 0 : i32
    %16 = arith.cmpi eq, %c16_i32, %c0_i32 : i32
    %c1_i32 = arith.constant 1 : i32
    %17 = arith.select %16, %c1_i32, %c16_i32 : i32
    %18 = vector.broadcast %17 : i32 to vector<256x1xi32>
    %19 = arith.remsi %15, %18 : vector<256x1xi32>
    %c0_i32_16 = arith.constant 0 : i32
    %20 = vector.broadcast %c0_i32_16 : i32 to vector<256x1xi32>
    %21 = arith.cmpi ne, %19, %20 : vector<256x1xi32>
    %c0_i32_17 = arith.constant 0 : i32
    %22 = vector.broadcast %c0_i32_17 : i32 to vector<256x1xi32>
    %23 = arith.cmpi slt, %19, %22 : vector<256x1xi32>
    %c0_i32_18 = arith.constant 0 : i32
    %24 = arith.cmpi slt, %17, %c0_i32_18 : i32
    %25 = vector.broadcast %24 : i1 to vector<256x1xi1>
    %26 = vector.broadcast %25 : vector<256x1xi1> to vector<256x1xi1>
    %27 = arith.xori %23, %26 : vector<256x1xi1>
    %28 = arith.andi %27, %21 : vector<256x1xi1>
    %29 = vector.broadcast %17 : i32 to vector<256x1xi32>
    %30 = arith.addi %19, %29 : vector<256x1xi32>
    %31 = arith.select %28, %30, %19 : vector<256x1xi1>, vector<256x1xi32>
    %c0_i32_19 = arith.constant 0 : i32
    %32 = vector.broadcast %c0_i32_19 : i32 to vector<256x1xi32>
    %33 = arith.cmpi sgt, %31, %32 : vector<256x1xi32>
    %c1_i32_20 = arith.constant 1 : i32
    %34 = tpu.dynamic_rotate %11 by %c1_i32_20 dim 0 : vector<256x128xf32>, i32 -> vector<256x128xf32>
    %cst_21 = arith.constant 0.000000e+00 : f32
    %35 = vector.shape_cast %33 : vector<256x1xi1> to vector<256x1xi1>
    %36 = vector.broadcast %35 : vector<256x1xi1> to vector<256x128xi1>
    %37 = vector.broadcast %cst_21 : f32 to vector<256x128xf32>
    %38 = arith.select %36, %34, %37 : vector<256x128xi1>, vector<256x128xf32>
    %c15_i32 = arith.constant 15 : i32
    %39 = vector.broadcast %c15_i32 : i32 to vector<256x1xi32>
    %40 = arith.cmpi slt, %31, %39 : vector<256x1xi32>
    %c255_i32 = arith.constant 255 : i32
    %41 = tpu.dynamic_rotate %11 by %c255_i32 dim 0 : vector<256x128xf32>, i32 -> vector<256x128xf32>
    %cst_22 = arith.constant 0.000000e+00 : f32
    %42 = vector.shape_cast %40 : vector<256x1xi1> to vector<256x1xi1>
    %43 = vector.broadcast %42 : vector<256x1xi1> to vector<256x128xi1>
    %44 = vector.broadcast %cst_22 : f32 to vector<256x128xf32>
    %45 = arith.select %43, %41, %44 : vector<256x128xi1>, vector<256x128xf32>
    %46 = vector.shape_cast %38 : vector<256x128xf32> to vector<16x16x128xf32>
    %47 = arith.truncf %46 : vector<16x16x128xf32> to vector<16x16x128xbf16>
    %c1 = arith.constant 1 : index
    %c0_23 = arith.constant 0 : index
    %c0_24 = arith.constant 0 : index
    %48 = vector.load %arg12[%c1, %c0_23, %c0_24] : memref<18x16x384xbf16, #tpu.memory_space<vmem>>, vector<16x16x128xbf16>
    tpu.vector_store %arg12[%c1, %c0_23, %c0_24], %47 {strides = array<i32>} : memref<18x16x384xbf16, #tpu.memory_space<vmem>>, vector<16x16x128xbf16>,
    %49 = vector.shape_cast %11 : vector<256x128xf32> to vector<16x16x128xf32>
    %50 = arith.truncf %49 : vector<16x16x128xf32> to vector<16x16x128xbf16>
    %c1_25 = arith.constant 1 : index
    %c0_26 = arith.constant 0 : index
    %c128 = arith.constant 128 : index
    %51 = vector.load %arg12[%c1_25, %c0_26, %c128] : memref<18x16x384xbf16, #tpu.memory_space<vmem>>, vector<16x16x128xbf16>
    tpu.vector_store %arg12[%c1_25, %c0_26, %c128], %50 {strides = array<i32>} : memref<18x16x384xbf16, #tpu.memory_space<vmem>>, vector<16x16x128xbf16>,
    %52 = vector.shape_cast %45 : vector<256x128xf32> to vector<16x16x128xf32>
    %53 = arith.truncf %52 : vector<16x16x128xf32> to vector<16x16x128xbf16>
    %c1_27 = arith.constant 1 : index
    %c0_28 = arith.constant 0 : index
    %c256 = arith.constant 256 : index
    %54 = vector.load %arg12[%c1_27, %c0_28, %c256] : memref<18x16x384xbf16, #tpu.memory_space<vmem>>, vector<16x16x128xbf16>
    tpu.vector_store %arg12[%c1_27, %c0_28, %c256], %53 {strides = array<i32>} : memref<18x16x384xbf16, #tpu.memory_space<vmem>>, vector<16x16x128xbf16>,
    %c0_29 = arith.constant 0 : index
    %c0_30 = arith.constant 0 : index
    %c0_31 = arith.constant 0 : index
    %55 = vector.load %arg12[%c0_29, %c0_30, %c0_31] : memref<18x16x384xbf16, #tpu.memory_space<vmem>>, vector<16x16x384xbf16>
    %56 = vector.shape_cast %55 : vector<16x16x384xbf16> to vector<256x384xbf16>
    %c0_32 = arith.constant 0 : index
    %c0_33 = arith.constant 0 : index
    %c0_34 = arith.constant 0 : index
    %57 = vector.load %arg5[%c0_32, %c0_33, %c0_34] : memref<3x384x128xbf16, #tpu.memory_space<vmem>>, vector<1x384x128xbf16>
    %58 = vector.shape_cast %57 : vector<1x384x128xbf16> to vector<384x128xbf16>
    %cst_35 = arith.constant dense<0.000000e+00> : vector<256x128xf32>
    %59 = tpu.matmul %56, %58, %cst_35 {dimension_numbers = #tpu.dot_dimension_numbers<[1], [0], [0], [1], [0, 0, 1, 1], [], []>} : vector<256x384xbf16>, vector<384x128xbf16>, vector<256x128xf32> -> vector<256x128xf32>
    %c1_36 = arith.constant 1 : index
    %c0_37 = arith.constant 0 : index
    %c0_38 = arith.constant 0 : index
    %60 = vector.load %arg12[%c1_36, %c0_37, %c0_38] : memref<18x16x384xbf16, #tpu.memory_space<vmem>>, vector<16x16x384xbf16>
    %61 = vector.shape_cast %60 : vector<16x16x384xbf16> to vector<256x384xbf16>
    %c1_39 = arith.constant 1 : index
    %c0_40 = arith.constant 0 : index
    %c0_41 = arith.constant 0 : index
    %62 = vector.load %arg5[%c1_39, %c0_40, %c0_41] : memref<3x384x128xbf16, #tpu.memory_space<vmem>>, vector<1x384x128xbf16>
    %63 = vector.shape_cast %62 : vector<1x384x128xbf16> to vector<384x128xbf16>
    %cst_42 = arith.constant dense<0.000000e+00> : vector<256x128xf32>
    %64 = tpu.matmul %61, %63, %cst_42 {dimension_numbers = #tpu.dot_dimension_numbers<[1], [0], [0], [1], [0, 0, 1, 1], [], []>} : vector<256x384xbf16>, vector<384x128xbf16>, vector<256x128xf32> -> vector<256x128xf32>
    %65 = arith.addf %59, %64 : vector<256x128xf32>
    %c2 = arith.constant 2 : index
    %c0_43 = arith.constant 0 : index
    %c0_44 = arith.constant 0 : index
    %66 = vector.load %arg12[%c2, %c0_43, %c0_44] : memref<18x16x384xbf16, #tpu.memory_space<vmem>>, vector<16x16x384xbf16>
    %67 = vector.shape_cast %66 : vector<16x16x384xbf16> to vector<256x384xbf16>
    %c2_45 = arith.constant 2 : index
    %c0_46 = arith.constant 0 : index
    %c0_47 = arith.constant 0 : index
    %68 = vector.load %arg5[%c2_45, %c0_46, %c0_47] : memref<3x384x128xbf16, #tpu.memory_space<vmem>>, vector<1x384x128xbf16>
    %69 = vector.shape_cast %68 : vector<1x384x128xbf16> to vector<384x128xbf16>
    %cst_48 = arith.constant dense<0.000000e+00> : vector<256x128xf32>
    %70 = tpu.matmul %67, %69, %cst_48 {dimension_numbers = #tpu.dot_dimension_numbers<[1], [0], [0], [1], [0, 0, 1, 1], [], []>} : vector<256x384xbf16>, vector<384x128xbf16>, vector<256x128xf32> -> vector<256x128xf32>
    %71 = arith.addf %65, %70 : vector<256x128xf32>
    %c0_49 = arith.constant 0 : index
    %c0_50 = arith.constant 0 : index
    %72 = vector.load %arg6[%c0_49, %c0_50] : memref<1x128xf32, #tpu.memory_space<vmem>>, vector<1x128xf32>
    %73 = vector.broadcast %72 : vector<1x128xf32> to vector<256x128xf32>
    %74 = arith.mulf %71, %73 : vector<256x128xf32>
    %c0_51 = arith.constant 0 : index
    %c0_52 = arith.constant 0 : index
    %75 = vector.load %arg7[%c0_51, %c0_52] : memref<1x128xf32, #tpu.memory_space<vmem>>, vector<1x128xf32>
    %76 = vector.broadcast %75 : vector<1x128xf32> to vector<256x128xf32>
    %77 = arith.addf %74, %76 : vector<256x128xf32>
    %cst_53 = arith.constant 0.000000e+00 : f32
    %78 = vector.broadcast %cst_53 : f32 to vector<256x128xf32>
    %79 = arith.maximumf %77, %78 : vector<256x128xf32>
    %80 = arith.truncf %79 : vector<256x128xf32> to vector<256x128xbf16>
    %c0_54 = arith.constant 0 : index
    %c0_55 = arith.constant 0 : index
    %81 = vector.load %arg8[%c0_54, %c0_55] : memref<128x128xbf16, #tpu.memory_space<vmem>>, vector<128x128xbf16>
    %cst_56 = arith.constant dense<0.000000e+00> : vector<256x128xf32>
    %82 = tpu.matmul %80, %81, %cst_56 {dimension_numbers = #tpu.dot_dimension_numbers<[1], [0], [0], [1], [0, 0, 1, 1], [], []>} : vector<256x128xbf16>, vector<128x128xbf16>, vector<256x128xf32> -> vector<256x128xf32>
    %c0_57 = arith.constant 0 : index
    %c0_58 = arith.constant 0 : index
    %83 = vector.load %arg9[%c0_57, %c0_58] : memref<1x128xf32, #tpu.memory_space<vmem>>, vector<1x128xf32>
    %84 = vector.broadcast %83 : vector<1x128xf32> to vector<256x128xf32>
    %85 = arith.mulf %82, %84 : vector<256x128xf32>
    %c0_59 = arith.constant 0 : index
    %c0_60 = arith.constant 0 : index
    %86 = vector.load %arg10[%c0_59, %c0_60] : memref<1x128xf32, #tpu.memory_space<vmem>>, vector<1x128xf32>
    %87 = vector.broadcast %86 : vector<1x128xf32> to vector<256x128xf32>
    %88 = arith.addf %85, %87 : vector<256x128xf32>
    %89 = arith.extf %1 : vector<256x128xbf16> to vector<256x128xf32>
    %90 = arith.addf %88, %89 : vector<256x128xf32>
    %cst_61 = arith.constant 0.000000e+00 : f32
    %91 = vector.broadcast %cst_61 : f32 to vector<256x128xf32>
    %92 = arith.maximumf %90, %91 : vector<256x128xf32>
    %93 = vector.shape_cast %92 : vector<256x128xf32> to vector<1x16x16x128xf32>
    %94 = arith.truncf %93 : vector<1x16x16x128xf32> to vector<1x16x16x128xbf16>
    %c0_62 = arith.constant 0 : index
    %c0_63 = arith.constant 0 : index
    %c0_64 = arith.constant 0 : index
    %c0_65 = arith.constant 0 : index
    %95 = vector.load %arg11[%c0_62, %c0_63, %c0_64, %c0_65] : memref<1x16x16x128xbf16, #tpu.memory_space<vmem>>, vector<1x16x16x128xbf16>
    tpu.vector_store %arg11[%c0_62, %c0_63, %c0_64, %c0_65], %94 {strides = array<i32>} : memref<1x16x16x128xbf16, #tpu.memory_space<vmem>>, vector<1x16x16x128xbf16>,
    return
  }
  func.func @transform_0(%arg0: i32) -> (i32, i32, i32, i32) {
    %c0_i32 = arith.constant 0 : i32
    %c0_i32_0 = arith.constant 0 : i32
    %c0_i32_1 = arith.constant 0 : i32
    %c0_i32_2 = arith.constant 0 : i32
    return %arg0, %c0_i32, %c0_i32_0, %c0_i32_1 : i32, i32, i32, i32
  }
  func.func @transform_1(%arg0: i32) -> (i32, i32) {
    %c0_i32 = arith.constant 0 : i32
    %c0_i32_0 = arith.constant 0 : i32
    %c0_i32_1 = arith.constant 0 : i32
    return %c0_i32, %c0_i32_0 : i32, i32
  }
  func.func @transform_2(%arg0: i32) -> (i32, i32) {
    %c0_i32 = arith.constant 0 : i32
    %c0_i32_0 = arith.constant 0 : i32
    %c0_i32_1 = arith.constant 0 : i32
    return %c0_i32, %c0_i32_0 : i32, i32
  }
  func.func @transform_3(%arg0: i32) -> (i32, i32) {
    %c0_i32 = arith.constant 0 : i32
    %c0_i32_0 = arith.constant 0 : i32
    %c0_i32_1 = arith.constant 0 : i32
    return %c0_i32, %c0_i32_0 : i32, i32
  }
  func.func @transform_4(%arg0: i32) -> (i32, i32, i32) {
    %c0_i32 = arith.constant 0 : i32
    %c0_i32_0 = arith.constant 0 : i32
    %c0_i32_1 = arith.constant 0 : i32
    %c0_i32_2 = arith.constant 0 : i32
    return %c0_i32, %c0_i32_0, %c0_i32_1 : i32, i32, i32
  }
  func.func @transform_5(%arg0: i32) -> (i32, i32) {
    %c0_i32 = arith.constant 0 : i32
    %c0_i32_0 = arith.constant 0 : i32
    %c0_i32_1 = arith.constant 0 : i32
    return %c0_i32, %c0_i32_0 : i32, i32
  }
  func.func @transform_6(%arg0: i32) -> (i32, i32) {
    %c0_i32 = arith.constant 0 : i32
    %c0_i32_0 = arith.constant 0 : i32
    %c0_i32_1 = arith.constant 0 : i32
    return %c0_i32, %c0_i32_0 : i32, i32
  }
  func.func @transform_7(%arg0: i32) -> (i32, i32) {
    %c0_i32 = arith.constant 0 : i32
    %c0_i32_0 = arith.constant 0 : i32
    %c0_i32_1 = arith.constant 0 : i32
    return %c0_i32, %c0_i32_0 : i32, i32
  }
  func.func @transform_8(%arg0: i32) -> (i32, i32) {
    %c0_i32 = arith.constant 0 : i32
    %c0_i32_0 = arith.constant 0 : i32
    %c0_i32_1 = arith.constant 0 : i32
    return %c0_i32, %c0_i32_0 : i32, i32
  }
  func.func @transform_9(%arg0: i32) -> (i32, i32) {
    %c0_i32 = arith.constant 0 : i32
    %c0_i32_0 = arith.constant 0 : i32
    %c0_i32_1 = arith.constant 0 : i32
    return %c0_i32, %c0_i32_0 : i32, i32
  }
  func.func @transform_10(%arg0: i32) -> (i32, i32, i32, i32) {
    %c0_i32 = arith.constant 0 : i32
    %c0_i32_0 = arith.constant 0 : i32
    %c0_i32_1 = arith.constant 0 : i32
    %c0_i32_2 = arith.constant 0 : i32
    return %arg0, %c0_i32, %c0_i32_0, %c0_i32_1 : i32, i32, i32, i32
  }
}

</mosaic_0001>

<bundles_post_ra>
// kernel: tpu_custom_call.1
= control target key start
LH: loop header
LB: loop body
LE: loop exit
PB: predicated region body
PF: predicated region fallthrough
CT: control target
= control target key end

     0   :  { %s8071_s0 = inlined_call_operand.hbm [shape: bf16[2,16,16,128], index: 0, kind: input, shape index: {}]   ;;  %s8072_s1 = inlined_call_operand.hbm [shape: bf16[128,128], index: 1, kind: input, shape index: {}]   ;;  %s8073_s2 = inlined_call_operand.vmem [shape: f32[1,128], index: 2, kind: input, shape index: {}]   ;;  %s8074_s3 = inlined_call_operand.vmem [shape: f32[1,128], index: 3, kind: input, shape index: {}]   ;;  %s8075_s4 = inlined_call_operand.hbm [shape: bf16[3,384,128], index: 4, kind: input, shape index: {}]   ;;  %s8076_s5 = inlined_call_operand.vmem [shape: f32[1,128], index: 5, kind: input, shape index: {}]   ;;  %s8077_s6 = inlined_call_operand.vmem [shape: f32[1,128], index: 6, kind: input, shape index: {}]   ;;  %s8078_s7 = inlined_call_operand.hbm [shape: bf16[128,128], index: 7, kind: input, shape index: {}]   ;;  %s8079_s8 = inlined_call_operand.vmem [shape: f32[1,128], index: 8, kind: input, shape index: {}]   ;;  %s8080_s9 = inlined_call_operand.vmem [shape: f32[1,128], index: 9, kind: input, shape index: {}]   ;;  %s8081_s10 = inlined_call_operand.hbm [shape: bf16[2,16,16,128], index: 10, kind: output, shape index: {}]  }
   0x1   :  { %8084 = sst [smem:[#allocation48_spill]] %s8072_s1 }
   0x2   :  { %8085 = sst [smem:[#allocation49_spill]] %s8075_s4 }
   0x3   :  { %8086 = sst [smem:[#allocation50_spill]] %s8078_s7 }
   0x4   :  { %15 = vsyncpa [#allocation4], 0 }
   0x5   :  { %17 = vsyncpa [#allocation4 + $0x1], 0 }
   0x6   :  { %18 = vsyncpa [#allocation7], 0 }
   0x7   :  { %19 = vsyncpa [#allocation10], 0 }
   0x8   :  { %20 = vsyncpa [#allocation5], 0 }
   0x9   :  { %22 = vsyncpa [#allocation5 + $0x1], 0  ;;  %s6546_s13 = smov 0   ;;  %s6548_s14 = smov 0  }
   0xa   :  { %s6550_s15 = smov 0   ;;  %s6552_s16 = smov 0  }
   0xb LB: > { %s6567_s17 = sadd.s32 4294967295, %s6481_s16   ;;  %s4816_s18 = sadd.s32 4294967294, %s6481_s16   ;;  %s6481_s16 = sphi %s6552_s16, %s8218_s16   ;;  %s6477_s15 = sphi %s6550_s15, %s8217_s15   ;;  %s6473_s14 = sphi %s6548_s14, %s8216_s14   ;;  %s6469_s13 = sphi %s6546_s13, %s8215_s13  }
   0xc   : > { %p48_p0 = scmp.ne.s32.totalorder %s6473_s14, %s6469_s13  ;;  %p49_p1 = scmp.eq.s32.totalorder %s6567_s17, 0 }
   0xd   : > { %p261_p2 = scmp.eq.s32.totalorder %s6567_s17, 1  ;;  %p267_p3 = scmp.eq.s32.totalorder %s4816_s18, 1 }
   0xe   : > { %p6576_p4 = por %p49_p1, %p48_p0  ;;  %p4817_p5 = scmp.ge.s32.totalorder %s6481_s16, 1 }
   0xf   : > { %p6581_p6 = por %p267_p3, %p48_p0  ;;  %p274_p7 = scmp.lt.s32.totalorder %s6481_s16, 3 }
  0x10   : > { %s8089_s1 = sld [smem:[#allocation48_spill]]  ;;  %s6483_s25 = smov [#allocation6]  }
  0x11   : > { %p6589_p8 = pnand %p4817_p5, %p274_p7  ;;  %s287_s26 = sshll.u32 %s6483_s25, 4  ;;  %s288_s26 = int_to_ptr.vmem [resolvable:$true] %s287_s26 }
  0x12   : > { %s8092_s4 = sld [smem:[#allocation49_spill]]  ;;  %s8082_s11 = smov 64  }
  0x13   : > { %p6213_p9 = pneg %p6589_p8  ;;  %s8083_s12 = smov 4  }
  0x14   : > { %s6486_s18 = smov [#allocation8]   ;;  %s8093_s7 = sld [smem:[#allocation50_spill]] }
  0x15   : > { %p6597_p10 = pnand %p6213_p9, %p49_p1  ;;  %s307_s21 = sshll.u32 %s6486_s18, 4  ;;  %s308_s21 = int_to_ptr.vmem [resolvable:$true] %s307_s21 }
  0x16   : > { %s285_s23 = sshll.u32 %s8089_s1, 4  ;;  %s6619_s29 = sadd.s32 1, %s6481_s16   ;;  %s286_s23 = int_to_ptr.hbm [resolvable:$true] %s285_s23 }
  0x17   : > { %6216 = dma.hbm_to_vmem [thread:$0]  (!%p6597_p10), %s286_s23, 1024, %s288_s26, [#allocation7], %s8082_s11, %s8082_s11, %s8083_s12  }
  0x18   : > { %s305_s30 = sshll.u32 %s8092_s4, 4  ;;  %s6487_s23 = smov [#allocation9]   ;;  %s306_s30 = int_to_ptr.hbm [resolvable:$true] %s305_s30 }
  0x19   : > { %6219 = dma.hbm_to_vmem [thread:$0]  (!%p6597_p10), %s306_s30, 9216, %s308_s21, [#allocation7], %s8082_s11, %s8082_s11, %s8083_s12  }
  0x1a   : > { %s325_s28 = sshll.u32 %s8093_s7, 4  ;;  %s327_s26 = sshll.u32 %s6487_s23, 4  ;;  %s326_s28 = int_to_ptr.hbm [resolvable:$true] %s325_s28  ;;  %s328_s26 = int_to_ptr.vmem [resolvable:$true] %s327_s26 }
  0x1b   : > { %6222 = dma.hbm_to_vmem [thread:$0]  (!%p6597_p10), %s326_s28, 1024, %s328_s26, [#allocation10], %s8082_s11, %s8082_s11, %s8083_s12  }
  0x1c   : > { %s32_s18 = ssub.s32 %s6481_s16, %s6619_s29  ;;  %s35_s22 = sadd.s32 1, %s6477_s15 }
  0x1d   : > { %p33_p12 = scmp.eq.s32.totalorder %s32_s18, 0  ;;  %p42_p13 = scmp.ne.s32.totalorder %s6477_s15, %s6473_s14 }
  0x1e   : > { %p43_p0 = scmp.eq.s32.totalorder %s6481_s16, 0  ;;  %p6234_p5 = scmp.lt.s32.totalorder %s6481_s16, 2 }
  0x1f   : > { %s6633_s25 = scalar_select %p33_p12, %s6477_s15, %s35_s22  }
  0x20   : > { %p6637_p3 = por %p261_p2, %p42_p13  ;;  %s347_s21 = sand.u32 1, %s6477_s15  }
  0x21   : > { %8094 = sst [smem:[#allocation16_spill]] %s6633_s25  ;;  %s5828_s27 = sshll.u32 %s6481_s16, 7 }
  0x22   : > { %p44_p7 = por %p43_p0, %p42_p13  ;;  %s4822_s23 = sshll.u32 %s347_s21, 7 }
  0x23   : > { %s356_s28 = scalar_lea.hbm %s8071_s0, %s5828_s27  ;;  %s351_s18 = scalar_lea.vmem [#allocation3], %s4822_s23 }
  0x24   : > { %s357_s26 = sshll.u32 %s356_s28, 4  ;;  %s359_s11 = sshll.u32 %s351_s18, 4  ;;  %s358_s26 = int_to_ptr.hbm [resolvable:$true] %s357_s26  ;;  %s360_s11 = int_to_ptr.vmem [resolvable:$true] %s359_s11 }
  0x25   : > { %p6647_p9 = pnand %p6234_p5, %p44_p7  ;;  %s348_s12 = scalar_lea.sflag [#allocation4], %s347_s21 }
  0x26   : > { %s6377_s7 = sshra.s32 %s358_s26, 4  ;;  %s6384_s27 = scalar_lea.hbm %s8071_s0, 256  ;;  %s6378_s7 = int_to_ptr.hbm [resolvable:$true] %s6377_s7 }
  0x27   : > { %s6379_s25 = scalar_lea.hbm %s6378_s7, 128  ;;  %p6381_p10 = pneg %p6647_p9 }
  0x28   : > { %p6380_p2 = scmp.ne.s32.totalorder %s6378_s7, %s6379_s25  ;;  %p6385_p0 = scmp.lt.s32.totalorder %s6378_s7, %s8071_s0 }
  0x29   : > { %p6386_p5 = scmp.lt.s32.totalorder %s6384_s27, %s6379_s25 }
  0x2a   : > { %p6382_p12 = pnand %p6381_p10, %p6380_p2 }
  0x2b   : > { %p6387_p7 = por %p6386_p5, %p6385_p0 }
  0x2c   : > { %p6383_p13 = pneg %p6382_p12 }
  0x2e   : > { %p6388_p11 = pnand %p6387_p7, %p6383_p13 }
  0x30   : > { %6391 = shalt.err (!%p6388_p11)
}
  0x31   : > { %s8097_s21 = smov 4   ;;  %s8098_s18 = smov 64  }
  0x32   : > { %6226 = dma.hbm_to_vmem [thread:$0]  (!%p6647_p9), %s358_s26, 2048, %s360_s11, %s348_s12, %s8098_s18, %s8098_s18, %s8097_s21  }
  0x33   : > { %371 = sbr.rel (%p6589_p8) target bundleno = 1360 (0x550), region = 60 }
  0x38   : > { %s6667_s1 = sand.u32 1, %s6473_s14  }
  0x39   : > { %s4826_s7 = sshll.u32 %s6667_s1, 7  ;;  %s374_s25 = scalar_lea.sflag [#allocation4], %s6667_s1 }
  0x3a   : > { %s6673_s4 = scalar_lea.vmem [#allocation3], %s4826_s7 }
  0x3b   : > { %6452 = dma.done.wait (%p6576_p4), %s374_s25, 2048  }
  0x3c   : > { %6454 = vsyncadd (%p6576_p4), %s374_s25, 4294965248 }
  0x3d   : > { %6456 = dma.done.wait (%p49_p1), [#allocation7], 10240  }
  0x3e   : > { %6458 = vsyncadd (%p49_p1), [#allocation7], 4294957056 }
  0x3f   : > { %6460 = dma.done.wait (%p49_p1), [#allocation10], 1024  }
  0x40   : > { %6462 = vsyncadd (%p49_p1), [#allocation10], 4294966272  ;;  %v5852_v0 = vld [vmem:[#allocation6 + $0x38] sm:$0xff]  ;;  %v5851_v1 = vld [vmem:[#allocation6 + $0x30] sm:$0xff]  ;;  %v825_v36 = vlaneseq  ;;  %s7901_s26 = scalar_lea.vmem [#allocation11], %s4826_s7  ;;  %s6077_s7 = sshll.u32 %s6567_s17, 7 }
  0x41   : > { %623 = vmatpush.bf16.msra.mxu0 %v5852_v0  ;;  %6173 = vmatpush.bf16.msra.mxu3 %v5852_v0  ;;  %v5850_v2 = vld [vmem:[#allocation6 + $0x28] sm:$0xff]  ;;  %v5849_v3 = vld [vmem:[#allocation6 + $0x20] sm:$0xff]  ;;  %v5848_v4 = vld [vmem:[#allocation6 + $0x18] sm:$0xff]  ;;  %s4710_s23 = scalar_lea.hbm %s8081_s10, %s6077_s7  ;;  %s4699_s17 = scalar_lea.sflag [#allocation5], %s6667_s1 }
  0x42   : > { %v5847_v5 = vld [vmem:[#allocation6 + $0x10] sm:$0xff]  ;;  %v5846_v6 = vld [vmem:[#allocation6 + $0x8] sm:$0xff]  ;;  %v5845_v7 = vld [vmem:[#allocation6] sm:$0xff]  ;;  %v6743_v43 = vshrl.u32 %v825_v36, 7  ;;  %s4713_s28 = sshll.u32 %s4710_s23, 4  ;;  %s6427_s24 = scalar_lea.hbm %s8081_s10, 256  ;;  %s4714_s28 = int_to_ptr.hbm [resolvable:$true] %s4713_s28 }
  0x43   : > { %v5829_v8 = vld [vmem:[%s6673_s4] sm:$0xff]  ;;  %v5830_v10 = vld [vmem:[%s6673_s4 + $0x8] sm:$0xff]  ;;  %v5831_v12 = vld [vmem:[%s6673_s4 + $0x10] sm:$0xff]  ;;  %s6421_s21 = sshra.s32 %s4714_s28, 4  ;;  %s6422_s21 = int_to_ptr.hbm [resolvable:$true] %s6421_s21 }
  0x44   : > { %v5841_v9 = vld [vmem:[%s6673_s4 + $0x60] sm:$0xff]  ;;  %v5842_v11 = vld [vmem:[%s6673_s4 + $0x68] sm:$0xff]  ;;  %v5843_v13 = vld [vmem:[%s6673_s4 + $0x70] sm:$0xff]  ;;  %v827_v46 = vadd.s32 8, %v6743_v43  ;;  %v828_v47 = vadd.s32 16, %v6743_v43  ;;  %vm1306_vm0 = vcmp.lt.s32.totalorder %v6743_v43, 1  ;;  %p6428_p11 = scmp.lt.s32.totalorder %s6422_s21, %s8081_s10 }
  0x45   : > { %624 = vmatpush.bf16.msra.mxu0 %v5851_v1  ;;  %6174 = vmatpush.bf16.msra.mxu3 %v5851_v1  ;;  %v5832_v14 = vld [vmem:[%s6673_s4 + $0x18] sm:$0xff]  ;;  %v5833_v16 = vld [vmem:[%s6673_s4 + $0x20] sm:$0xff]  ;;  %v5834_v17 = vld [vmem:[%s6673_s4 + $0x28] sm:$0xff]  ;;  %vm1499_vm1 = vcmp.lt.s32.totalorder %v6743_v43, 7  ;;  %s6423_s18 = scalar_lea.hbm %s6422_s21, 128 }
  0x46   : > { %v5844_v15 = vld [vmem:[%s6673_s4 + $0x78] sm:$0xff]  ;;  %v6700_v19 = vld [vmem:[#allocation8 + $0x130] sm:$0xff]  ;;  %v6704_v21 = vld [vmem:[#allocation8 + $0x128] sm:$0xff]  ;;  %v869_v60 = vand.u32 15, %v827_v46  ;;  %v876_v61 = vand.u32 15, %v828_v47  ;;  %p6424_p1 = scmp.ne.s32.totalorder %s6422_s21, %s6423_s18  ;;  %p6429_p9 = scmp.lt.s32.totalorder %s6427_s24, %s6423_s18 }
  0x47   : > { %v6697_v18 = vld [vmem:[#allocation8 + $0x138] sm:$0xff]  ;;  %v5835_v20 = vld [vmem:[%s6673_s4 + $0x30] sm:$0xff]  ;;  %v6707_v22 = vld [vmem:[#allocation8 + $0x120] sm:$0xff] }
  0x48   : > { %2535 = vmatpush.bf16.msra.mxu2 %v6697_v18  ;;  %v6710_v23 = vld [vmem:[#allocation8 + $0x118] sm:$0xff]  ;;  %v6714_v25 = vld [vmem:[#allocation8 + $0x110] sm:$0xff]  ;;  %v6717_v26 = vld [vmem:[#allocation8 + $0x108] sm:$0xff]  ;;  %vm6781_vm2 = vcmp.gt.s32.totalorder %v876_v61, 0  ;;  %vm6785_vm3 = vcmp.lt.s32.totalorder %v869_v60, 15  ;;  %v829_v60 = vadd.s32 24, %v6743_v43  ;;  %p6425_p4 = pnand %p6424_p1, %p6637_p3  ;;  %p6430_p2 = por %p6429_p9, %p6428_p11 }
  0x49   : > { %625 = vmatpush.bf16.msra.mxu0 %v5850_v2  ;;  %6175 = vmatpush.bf16.msra.mxu3 %v5850_v2  ;;  %v5836_v24 = vld [vmem:[%s6673_s4 + $0x38] sm:$0xff]  ;;  %v6720_v27 = vld [vmem:[#allocation8 + $0x100] sm:$0xff]  ;;  %v6726_v28 = vld [vmem:[%s8073_s2] ss:$0 sm:$0xff] }
  0x4a   : > { %v6731_v29 = vld [vmem:[%s8074_s3] ss:$0 sm:$0xff]  ;;  %v5837_v30 = vld [vmem:[%s6673_s4 + $0x40] sm:$0xff]  ;;  %v5908_v42 = vld [vmem:[#allocation8 + $0x38] sm:$0xff]  ;;  %p6426_p8 = pneg %p6425_p4 }
  0x4b   : > { %v5907_v53 = vld [vmem:[#allocation8 + $0x30] sm:$0xff]  ;;  %v5838_v58 = vld [vmem:[%s6673_s4 + $0x48] sm:$0xff] }
  0x4c   : > { %2536 = vmatpush.bf16.msra.mxu2 %v6700_v19  ;;  %p6431_p10 = pnand %p6430_p2, %p6426_p8 }
  0x4d   : > { %626 = vmatpush.bf16.msra.mxu0 %v5849_v3  ;;  %6176 = vmatpush.bf16.msra.mxu3 %v5849_v3 }
  0x50   : > { %2537 = vmatpush.bf16.msra.mxu2 %v6704_v21 }
  0x51   : > { %627 = vmatpush.bf16.msra.mxu0 %v5848_v4  ;;  %6177 = vmatpush.bf16.msra.mxu3 %v5848_v4  ;;  %v851_v4 = vadd.s32 200, %v6743_v43 }
  0x54   : > { %2538 = vmatpush.bf16.msra.mxu2 %v6707_v22 }
  0x55   : > { %628 = vmatpush.bf16.msra.mxu0 %v5847_v5  ;;  %6178 = vmatpush.bf16.msra.mxu3 %v5847_v5  ;;  %v852_v5 = vadd.s32 208, %v6743_v43 }
  0x58   : > { %2539 = vmatpush.bf16.msra.mxu2 %v6710_v23 }
  0x59   : > { %629 = vmatpush.bf16.msra.mxu0 %v5846_v6  ;;  %6179 = vmatpush.bf16.msra.mxu3 %v5846_v6  ;;  %v5906_v6 = vld [vmem:[#allocation8 + $0x28] sm:$0xff] }
  0x5c   : > { %2540 = vmatpush.bf16.msra.mxu2 %v6714_v25 }
  0x5d   : > { %630 = vmatpush.bf16.msra.mxu0 %v5845_v7  ;;  %6180 = vmatpush.bf16.msra.mxu3 %v5845_v7 }
  0x60   : > { %631 = vmatmul.bf16.vlgmr.msra.gmra.mxu0 %v5829_v8  ;;  %691 = vmatmul.bf16.vlgmr.msra.gmra.mxu3 %v5841_v9 }
  0x61   : > { %2541 = vmatpush.bf16.msra.mxu2 %v6717_v26  ;;  %3113 = vmatpush.bf16.msrb.mxu0 %v5908_v42 }
  0x65   : > { %2542 = vmatpush.bf16.msra.mxu2 %v6720_v27  ;;  %3114 = vmatpush.bf16.msrb.mxu0 %v5907_v53 }
  0x69   : > { %3115 = vmatpush.bf16.msrb.mxu0 %v5906_v6 }
  0x70   : > { %636 = vmatmul.bf16.gmra.mxu0 %v5830_v10  ;;  %696 = vmatmul.bf16.gmra.mxu3 %v5842_v11 }
  0x80   : > { %641 = vmatmul.bf16.gmra.mxu0 %v5831_v12  ;;  %701 = vmatmul.bf16.gmra.mxu3 %v5843_v13 }
  0x90   : > { %646 = vmatmul.bf16.gmra.mxu0 %v5832_v14  ;;  %706 = vmatmul.bf16.gmra.mxu3 %v5844_v15  ;;  %v5903_v15 = vld [vmem:[#allocation8 + $0x10] sm:$0xff] }
  0xa0   : > { %651 = vmatmul.bf16.gmra.mxu0 %v5833_v16 }
  0xb0   : > { %656 = vmatmul.bf16.gmra.mxu0 %v5834_v17 }
  0xc0   : > { %661 = vmatmul.bf16.gmra.mxu0 %v5835_v20  ;;  %v1037_v20 = vand.u32 15, %v851_v4  ;;  %v830_v4 = vadd.s32 32, %v6743_v43 }
  0xc2   : > { %vm6820_vm5 = vcmp.lt.s32.totalorder %v1037_v20, 15 }
  0xd0   : > { %666 = vmatmul.bf16.gmra.mxu0 %v5836_v24  ;;  %v1044_v24 = vand.u32 15, %v852_v5  ;;  %v5979_v5 = vld [vmem:[#allocation8 + $0xf0] sm:$0xff] }
  0xd2   : > { %vm6816_vm4 = vcmp.gt.s32.totalorder %v1044_v24, 0  ;;  %v883_v24 = vand.u32 15, %v829_v60 }
  0xd4   : > { %vm6868_vm7 = vcmp.lt.s32.totalorder %v883_v24, 15 }
  0xdd   : > { %v632_v31 = vpop.f32.mrf.mxu0 }
  0xde   : > { %v716_v32 = vmul.f32 %v6726_v28, %v632_v31 }
  0xe0   : > { %v752_v33 = vadd.f32 %v6731_v29, %v716_v32  ;;  %671 = vmatmul.bf16.gmra.mxu0 %v5837_v30  ;;  %v5905_v30 = vld [vmem:[#allocation8 + $0x20] sm:$0xff] }
  0xe1   : > { %3116 = vmatpush.bf16.msrb.mxu0 %v5905_v30 }
  0xe2   : > { %v6736_v34 = vmax.f32 %v752_v33, 0.0 }
  0xe3   : > { %v692_v35 = vpop.f32.mrf.mxu3 }
  0xe4   : > { %v1693_v37 = vpack.c.bf16 %v6736_v34, %v6736_v34  ;;  %v740_v38 = vmul.f32 %v6726_v28, %v692_v35  ;;  %v1274_v50 = vrot.slane %v6736_v34, 7  ;;  %v1467_v51 = vrot.slane %v6736_v34, 1 }
  0xe5   : > { %v634_v39 = vpop.f32.mrf.mxu0  ;;  %v837_v34 = vadd.s32 88, %v6743_v43 }
  0xe6   : > { %1725 = vst [vmem:[#allocation2 + $0x1c] sm:$0xf] %v1693_v37  ;;  %v776_v40 = vadd.f32 %v6731_v29, %v740_v38  ;;  %v717_v41 = vmul.f32 %v6726_v28, %v634_v39 }
  0xe8   : > { %v6745_v44 = vmax.f32 %v776_v40, 0.0  ;;  %v753_v45 = vadd.f32 %v6731_v29, %v717_v41 }
  0xea   : > { %v1717_v48 = vpack.c.bf16 %v6745_v44, %v6745_v44  ;;  %v785_v49 = vmax.f32 %v753_v45, 0.0  ;;  %v1298_v7 = vrot.slane %v6745_v44, 7  ;;  %v1491_v8 = vrot.slane %v6745_v44, 1 }
  0xeb   : > { %v694_v52 = vpop.f32.mrf.mxu3 }
  0xec   : > { %1749 = vst [vmem:[#allocation2 + $0x13c] sm:$0xf] %v1717_v48  ;;  %v1275_v54 = vrot.slane %v785_v49, 7  ;;  %v1468_v55 = vrot.slane %v785_v49, 1  ;;  %v1694_v56 = vpack.c.bf16 %v785_v49, %v785_v49  ;;  %v741_v57 = vmul.f32 %v6726_v28, %v694_v52 }
  0xed   : > { %v637_v59 = vpop.f32.mrf.mxu0  ;;  %v5925_v41 = vld [vmem:[#allocation2 + $0x1c] sm:$0xf] }
  0xee   : > { %v1337_v62 = vsel %vm1306_vm0, %v1274_v50, %v1275_v54  ;;  %v1530_v63 = vsel %vm1499_vm1, %v1467_v51, %v1468_v55  ;;  %1726 = vst [vmem:[#allocation2 + $0x28] sm:$0xf] %v1694_v56  ;;  %v777_v0 = vadd.f32 %v6731_v29, %v741_v57  ;;  %v718_v1 = vmul.f32 %v6726_v28, %v637_v59  ;;  %v5980_v56 = vld [vmem:[#allocation8 + $0xf8] sm:$0xff] }
  0xef   : > { %v1629_v2 = vpack.c.bf16 %v1337_v62, %v1337_v62  ;;  %v1757_v3 = vpack.c.bf16 %v1530_v63, %v1530_v63  ;;  %v5904_v57 = vld [vmem:[#allocation8 + $0x18] sm:$0xff]  ;;  %2446 = vmatpush.bf16.msra.mxu1 %v5980_v56  ;;  %6181 = vmatpush.bf16.msrb.mxu3 %v5980_v56  ;;  %v5901_v56 = vld [vmem:[#allocation8] sm:$0xff] }
  0xf0   : > { %v6772_v9 = vmax.f32 %v777_v0, 0.0  ;;  %v754_v10 = vadd.f32 %v6731_v29, %v718_v1  ;;  %676 = vmatmul.bf16.gmra.mxu0 %v5838_v58 }
  0xf1   : > { %1662 = vst [vmem:[#allocation2 + $0x24] sm:$0xf] %v1629_v2  ;;  %3117 = vmatpush.bf16.msrb.mxu0 %v5904_v57 }
  0xf2   : > { %1789 = vst [vmem:[#allocation2 + $0x20] sm:$0xf] %v1757_v3  ;;  %v1299_v11 = vrot.slane %v6772_v9, 7  ;;  %v1492_v12 = vrot.slane %v6772_v9, 1  ;;  %v1718_v13 = vpack.c.bf16 %v6772_v9, %v6772_v9  ;;  %v6779_v14 = vmax.f32 %v754_v10, 0.0 }
  0xf3   : > { %v697_v17 = vpop.f32.mrf.mxu3  ;;  %2447 = vmatpush.bf16.msra.mxu1 %v5979_v5  ;;  %6182 = vmatpush.bf16.msrb.mxu3 %v5979_v5  ;;  %v6488_v5 = vmov 0  }
  0xf4   : > { %v1313_v31 = vsel %vm1306_vm0, %v1298_v7, %v1299_v11  ;;  %v1506_v32 = vsel %vm1499_vm1, %v1491_v8, %v1492_v12  ;;  %1750 = vst [vmem:[#allocation2 + $0x148] sm:$0xf] %v1718_v13  ;;  %v1276_v33 = vrot.slane %v6779_v14, 7  ;;  %v1469_v35 = vrot.slane %v6779_v14, 1 }
  0xf5   : > { %v1653_v36 = vpack.c.bf16 %v1313_v31, %v1313_v31  ;;  %v1781_v37 = vpack.c.bf16 %v1506_v32, %v1506_v32  ;;  %v1695_v38 = vpack.c.bf16 %v6779_v14, %v6779_v14  ;;  %v742_v39 = vmul.f32 %v6726_v28, %v697_v17  ;;  %v639_v40 = vpop.f32.mrf.mxu0  ;;  %v4931_v42 = vld [vmem:[#allocation2 + $0x24] sm:$0xf0]  ;;  %v5839_v14 = vld [vmem:[%s6673_s4 + $0x50] sm:$0xff]  ;;  %3118 = vmatpush.bf16.msrb.mxu0 %v5903_v15 }
  0xf6   : > { %v1336_v45 = vsel %vm1306_vm0, %v1275_v54, %v1276_v33  ;;  %v1529_v46 = vsel %vm1499_vm1, %v1468_v55, %v1469_v35  ;;  %v719_v47 = vmul.f32 %v6726_v28, %v639_v40  ;;  %v4934_v48 = vor.u32 %v5925_v41, %v4931_v42  ;;  %v5902_v40 = vld [vmem:[#allocation8 + $0x8] sm:$0xff]  ;;  %816 = vst [vmem:[#allocation2] sm:$0xff] %v6488_v5 }
  0xf7   : > { %1686 = vst [vmem:[#allocation2 + $0x144] sm:$0xf] %v1653_v36  ;;  %v1405_v49 = vsel %vm6781_vm2, %v1336_v45, 0.0  ;;  %v1597_v52 = vsel %vm6785_vm3, %v1529_v46, 0.0  ;;  %v778_v53 = vadd.f32 %v6731_v29, %v742_v39  ;;  %v5978_v39 = vld [vmem:[#allocation8 + $0xe8] sm:$0xff] }
  0xf8   : > { %1813 = vst [vmem:[#allocation2 + $0x140] sm:$0xf] %v1781_v37  ;;  %v1630_v58 = vpack.c.bf16 %v1405_v49, %v1405_v49  ;;  %v1758_v54 = vpack.c.bf16 %v1597_v52, %v1597_v52  ;;  %v755_v59 = vadd.f32 %v6731_v29, %v719_v47  ;;  %2543 = vmatmul.bf16.vlgmr.msra.gmra.mxu2 %v4934_v48  ;;  %v5840_v48 = vld [vmem:[%s6673_s4 + $0x58] sm:$0xff]  ;;  %v856_v49 = vadd.s32 240, %v6743_v43 }
  0xf9   : > { %1727 = vst [vmem:[#allocation2 + $0x34] sm:$0xf] %v1695_v38  ;;  %v6813_v55 = vmax.f32 %v778_v53, 0.0  ;;  %v890_v38 = vand.u32 15, %v830_v4  ;;  %2448 = vmatpush.bf16.msra.mxu1 %v5978_v39  ;;  %3119 = vmatpush.bf16.msrb.mxu0 %v5902_v40  ;;  %v5977_v53 = vld [vmem:[#allocation8 + $0xe0] sm:$0xff]  ;;  %v6880_v4 = vadd.s32 40, %v6743_v43 }
  0xfa   : > { %1663 = vst [vmem:[#allocation2 + $0x30] sm:$0xf] %v1630_v58  ;;  %v6824_v63 = vmax.f32 %v755_v59, 0.0  ;;  %6183 = vmatpush.bf16.msrb.mxu3 %v5978_v39 }
  0xfb   : > { %1790 = vst [vmem:[#allocation2 + $0x2c] sm:$0xf] %v1758_v54  ;;  %v1300_v0 = vrot.slane %v6813_v55, 7  ;;  %v1493_v1 = vrot.slane %v6813_v55, 1  ;;  %v1719_v2 = vpack.c.bf16 %v6813_v55, %v6813_v55  ;;  %v699_v3 = vpop.f32.mrf.mxu3  ;;  %vm6864_vm6 = vcmp.gt.s32.totalorder %v890_v38, 0  ;;  %v5976_v55 = vld [vmem:[#allocation8 + $0xd8] sm:$0xff] }
  0xfc   : > { %v1277_v6 = vrot.slane %v6824_v63, 7  ;;  %v1470_v9 = vrot.slane %v6824_v63, 1  ;;  %v1696_v10 = vpack.c.bf16 %v6824_v63, %v6824_v63  ;;  %v743_v13 = vmul.f32 %v6726_v28, %v699_v3  ;;  %818 = vst [vmem:[#allocation2 + $0xc] sm:$0xff] %v6488_v5 }
  0xfd   : > { %v1312_v16 = vsel %vm1306_vm0, %v1299_v11, %v1300_v0  ;;  %v1505_v17 = vsel %vm1499_vm1, %v1492_v12, %v1493_v1  ;;  %1751 = vst [vmem:[#allocation2 + $0x154] sm:$0xf] %v1719_v2  ;;  %v642_v20 = vpop.f32.mrf.mxu0  ;;  %2449 = vmatpush.bf16.msra.mxu1 %v5977_v53  ;;  %3120 = vmatpush.bf16.msrb.mxu0 %v5901_v56 }
  0xfe   : > { %v1429_v30 = vsel %vm6816_vm4, %v1312_v16, 0.0  ;;  %v1621_v31 = vsel %vm6820_vm5, %v1505_v17, 0.0  ;;  %v1335_v11 = vsel %vm1306_vm0, %v1276_v33, %v1277_v6  ;;  %v1528_v12 = vsel %vm1499_vm1, %v1469_v35, %v1470_v9  ;;  %1728 = vst [vmem:[#allocation2 + $0x40] sm:$0xf] %v1696_v10  ;;  %6184 = vmatpush.bf16.msrb.mxu3 %v5977_v53 }
  0xff   : > { %v1654_v32 = vpack.c.bf16 %v1429_v30, %v1429_v30  ;;  %v1782_v36 = vpack.c.bf16 %v1621_v31, %v1621_v31  ;;  %v1631_v37 = vpack.c.bf16 %v1335_v11, %v1335_v11  ;;  %v1759_v41 = vpack.c.bf16 %v1528_v12, %v1528_v12  ;;  %817 = vst [vmem:[#allocation2 + $0x8] sm:$0xf] %v6488_v5 }
 0x100   : > { %v779_v42 = vadd.f32 %v6731_v29, %v743_v13  ;;  %v720_v45 = vmul.f32 %v6726_v28, %v642_v20  ;;  %681 = vmatmul.bf16.gmra.mxu0 %v5839_v14  ;;  %v853_v33 = vadd.s32 216, %v6743_v43  ;;  %v854_v35 = vadd.s32 224, %v6743_v43  ;;  %819 = vst [vmem:[#allocation2 + $0x14] sm:$0xf] %v6488_v5 }
 0x101   : > { %1687 = vst [vmem:[#allocation2 + $0x150] sm:$0xf] %v1654_v32  ;;  %2450 = vmatpush.bf16.msra.mxu1 %v5976_v55 }
 0x102   : > { %1814 = vst [vmem:[#allocation2 + $0x14c] sm:$0xf] %v1782_v36  ;;  %v6861_v46 = vmax.f32 %v779_v42, 0.0  ;;  %v756_v47 = vadd.f32 %v6731_v29, %v720_v45  ;;  %v1051_v61 = vand.u32 15, %v853_v33  ;;  %v1058_v62 = vand.u32 15, %v854_v35  ;;  %v5975_v33 = vld [vmem:[#allocation8 + $0xd0] sm:$0xff]  ;;  %6185 = vmatpush.bf16.msrb.mxu3 %v5976_v55 }
 0x103   : > { %1664 = vst [vmem:[#allocation2 + $0x3c] sm:$0xf] %v1631_v37  ;;  %v702_v52 = vpop.f32.mrf.mxu3 }
 0x104   : > { %1791 = vst [vmem:[#allocation2 + $0x38] sm:$0xf] %v1759_v41  ;;  %v1301_v57 = vrot.slane %v6861_v46, 7  ;;  %v1494_v58 = vrot.slane %v6861_v46, 1  ;;  %v1720_v54 = vpack.c.bf16 %v6861_v46, %v6861_v46  ;;  %v6876_v59 = vmax.f32 %v756_v47, 0.0 }
 0x105   : > { %v744_v60 = vmul.f32 %v6726_v28, %v702_v52  ;;  %v644_v2 = vpop.f32.mrf.mxu0  ;;  %v4943_v3 = vld [vmem:[#allocation2 + $0x3c] sm:$0xf0]  ;;  %vm6914_vm8 = vcmp.gt.s32.totalorder %v1058_v62, 0  ;;  %vm6920_vm9 = vcmp.lt.s32.totalorder %v1051_v61, 15  ;;  %v897_v47 = vand.u32 15, %v6880_v4  ;;  %2451 = vmatpush.bf16.msra.mxu1 %v5975_v33  ;;  %821 = vst [vmem:[#allocation2 + $0x198] sm:$0xff] %v6488_v5 }
 0x106   : > { %v1311_v10 = vsel %vm1306_vm0, %v1300_v0, %v1301_v57  ;;  %v1504_v13 = vsel %vm1499_vm1, %v1493_v1, %v1494_v58  ;;  %1752 = vst [vmem:[#allocation2 + $0x160] sm:$0xf] %v1720_v54  ;;  %v1278_v14 = vrot.slane %v6876_v59, 7  ;;  %v1471_v15 = vrot.slane %v6876_v59, 1  ;;  %v5928_v0 = vld [vmem:[#allocation2 + $0x34] sm:$0xf]  ;;  %6186 = vmatpush.bf16.msrb.mxu3 %v5975_v33 }
 0x107   : > { %v1655_v16 = vpack.c.bf16 %v1311_v10, %v1311_v10  ;;  %v1783_v17 = vpack.c.bf16 %v1504_v13, %v1504_v13  ;;  %v1697_v20 = vpack.c.bf16 %v6876_v59, %v6876_v59  ;;  %v780_v24 = vadd.f32 %v6731_v29, %v744_v60  ;;  %v5974_v10 = vld [vmem:[#allocation8 + $0xc8] sm:$0xff]  ;;  %822 = vst [vmem:[#allocation2 + $0x1a0] sm:$0xf] %v6488_v5 }
 0x108   : > { %v1334_v1 = vsel %vm1306_vm0, %v1277_v6, %v1278_v14  ;;  %v1527_v30 = vsel %vm1499_vm1, %v1470_v9, %v1471_v15  ;;  %v721_v31 = vmul.f32 %v6726_v28, %v644_v2  ;;  %v4946_v11 = vor.u32 %v5928_v0, %v4943_v3  ;;  %823 = vst [vmem:[#allocation2 + $0x1a4] sm:$0xff] %v6488_v5 }
 0x109   : > { %1688 = vst [vmem:[#allocation2 + $0x15c] sm:$0xf] %v1655_v16  ;;  %v1407_v12 = vsel %vm6864_vm6, %v1334_v1, 0.0  ;;  %v1599_v32 = vsel %vm6868_vm7, %v1527_v30, 0.0  ;;  %v6911_v36 = vmax.f32 %v780_v24, 0.0  ;;  %v832_v6 = vadd.s32 48, %v6743_v43  ;;  %2452 = vmatpush.bf16.msra.mxu1 %v5974_v10 }
 0x10a   : > { %1815 = vst [vmem:[#allocation2 + $0x158] sm:$0xf] %v1783_v17  ;;  %v1632_v63 = vpack.c.bf16 %v1407_v12, %v1407_v12  ;;  %v1760_v9 = vpack.c.bf16 %v1599_v32, %v1599_v32  ;;  %v757_v38 = vadd.f32 %v6731_v29, %v721_v31  ;;  %2548 = vmatmul.bf16.gmra.mxu2 %v4946_v11  ;;  %v855_v59 = vadd.s32 232, %v6743_v43  ;;  %v5973_v32 = vld [vmem:[#allocation8 + $0xc0] sm:$0xff] }
 0x10b   : > { %1729 = vst [vmem:[#allocation2 + $0x4c] sm:$0xf] %v1697_v20  ;;  %v1302_v39 = vrot.slane %v6911_v36, 7  ;;  %v1495_v41 = vrot.slane %v6911_v36, 1  ;;  %v1721_v42 = vpack.c.bf16 %v6911_v36, %v6911_v36  ;;  %v704_v45 = vpop.f32.mrf.mxu3  ;;  %v904_v54 = vand.u32 15, %v832_v6  ;;  %6187 = vmatpush.bf16.msrb.mxu3 %v5974_v10 }
 0x10c   : > { %1665 = vst [vmem:[#allocation2 + $0x48] sm:$0xf] %v1632_v63  ;;  %v6927_v35 = vmax.f32 %v757_v38, 0.0  ;;  %v745_v46 = vmul.f32 %v6726_v28, %v704_v45  ;;  %v1072_v20 = vand.u32 15, %v856_v49  ;;  %v1065_v1 = vand.u32 15, %v855_v59 }
 0x10d   : > { %1792 = vst [vmem:[#allocation2 + $0x44] sm:$0xf] %v1760_v9  ;;  %v1310_v52 = vsel %vm1306_vm0, %v1301_v57, %v1302_v39  ;;  %v1503_v53 = vsel %vm1499_vm1, %v1494_v58, %v1495_v41  ;;  %v647_v56 = vpop.f32.mrf.mxu0  ;;  %vm6961_vm10 = vcmp.gt.s32.totalorder %v904_v54, 0  ;;  %vm6967_vm11 = vcmp.lt.s32.totalorder %v897_v47, 15  ;;  %2453 = vmatpush.bf16.msra.mxu1 %v5973_v32  ;;  %v5854_v54 = vld [vmem:[#allocation2 + $0x8] sm:$0xf0] }
 0x10e   : > { %v1431_v60 = vsel %vm6914_vm8, %v1310_v52, 0.0  ;;  %v1623_v61 = vsel %vm6920_vm9, %v1503_v53, 0.0  ;;  %1753 = vst [vmem:[#allocation2 + $0x16c] sm:$0xf] %v1721_v42  ;;  %v1279_v62 = vrot.slane %v6927_v35, 7  ;;  %v1472_v2 = vrot.slane %v6927_v35, 1 }
 0x10f   : > { %v1656_v57 = vpack.c.bf16 %v1431_v60, %v1431_v60  ;;  %v1784_v3 = vpack.c.bf16 %v1623_v61, %v1623_v61  ;;  %v1698_v58 = vpack.c.bf16 %v6927_v35, %v6927_v35  ;;  %v781_v4 = vadd.f32 %v6731_v29, %v745_v46  ;;  %6188 = vmatpush.bf16.msrb.mxu3 %v5973_v32 }
 0x110   : > { %v1333_v13 = vsel %vm1306_vm0, %v1278_v14, %v1279_v62  ;;  %v1526_v16 = vsel %vm1499_vm1, %v1471_v15, %v1472_v2  ;;  %v722_v17 = vmul.f32 %v6726_v28, %v647_v56  ;;  %686 = vmatmul.bf16.gmra.mxu0 %v5840_v48  ;;  %vm6972_vm12 = vcmp.gt.s32.totalorder %v1072_v20, 0  ;;  %v5217_v56 = vld [vmem:[#allocation2] sm:$0xf]  ;;  %824 = vst [vmem:[#allocation2 + $0x1ac] sm:$0xf] %v6488_v5 }
 0x111   : > { %1689 = vst [vmem:[#allocation2 + $0x168] sm:$0xf] %v1656_v57  ;;  %v1633_v24 = vpack.c.bf16 %v1333_v13, %v1333_v13  ;;  %v1761_v0 = vpack.c.bf16 %v1526_v16, %v1526_v16  ;;  %v6954_v55 = vmax.f32 %v781_v4, 0.0  ;;  %vm6980_vm13 = vcmp.lt.s32.totalorder %v1065_v1, 15 }
 0x112   : > { %1816 = vst [vmem:[#allocation2 + $0x164] sm:$0xf] %v1784_v3  ;;  %v758_v14 = vadd.f32 %v6731_v29, %v722_v17  ;;  %v6985_v45 = vadd.s32 248, %v6743_v43  ;;  %v862_v49 = vand.u32 15, %v6743_v43  ;;  %v7008_v4 = vadd.s32 56, %v6743_v43 }
 0x113   : > { %1666 = vst [vmem:[#allocation2 + $0x54] sm:$0xf] %v1633_v24  ;;  %v1303_v15 = vrot.slane %v6954_v55, 7  ;;  %v1496_v30 = vrot.slane %v6954_v55, 1  ;;  %v1722_v31 = vpack.c.bf16 %v6954_v55, %v6954_v55  ;;  %v707_v12 = vpop.f32.mrf.mxu3  ;;  %6189 = vmatpush.bf16.msra.mxu3 %v6697_v18  ;;  %v834_v1 = vadd.s32 64, %v6743_v43 }
 0x114   : > { %1730 = vst [vmem:[#allocation2 + $0x58] sm:$0xf] %v1698_v58  ;;  %v6965_v36 = vmax.f32 %v758_v14, 0.0  ;;  %v746_v63 = vmul.f32 %v6726_v28, %v707_v12  ;;  %v5931_v58 = vld [vmem:[#allocation2 + $0x4c] sm:$0xf]  ;;  %v5218_v18 = vor.u32 %v5854_v54, %v5217_v56  ;;  %vm7044_vm14 = vcmp.gt.s32.totalorder %v862_v49, 0 }
 0x115   : > { %1793 = vst [vmem:[#allocation2 + $0x50] sm:$0xf] %v1761_v0  ;;  %v1309_v37 = vsel %vm1306_vm0, %v1302_v39, %v1303_v15  ;;  %v1502_v38 = vsel %vm1499_vm1, %v1495_v41, %v1496_v30  ;;  %v649_v42 = vpop.f32.mrf.mxu0 }
 0x116   : > { %v1657_v33 = vpack.c.bf16 %v1309_v37, %v1309_v37  ;;  %1754 = vst [vmem:[#allocation2 + $0x178] sm:$0xf] %v1722_v31  ;;  %v1785_v35 = vpack.c.bf16 %v1502_v38, %v1502_v38  ;;  %v1280_v46 = vrot.slane %v6965_v36, 7  ;;  %v1473_v39 = vrot.slane %v6965_v36, 1 }
 0x117   : > { %v1699_v41 = vpack.c.bf16 %v6965_v36, %v6965_v36  ;;  %v782_v47 = vadd.f32 %v6731_v29, %v746_v63  ;;  %v723_v48 = vmul.f32 %v6726_v28, %v649_v42  ;;  %6190 = vmatpush.bf16.msra.mxu3 %v6700_v19 }
 0x118   : > { %1690 = vst [vmem:[#allocation2 + $0x174] sm:$0xf] %v1657_v33  ;;  %v1332_v52 = vsel %vm1306_vm0, %v1279_v62, %v1280_v46  ;;  %v1525_v53 = vsel %vm1499_vm1, %v1472_v2, %v1473_v39  ;;  %v1079_v2 = vand.u32 15, %v6985_v45 }
 0x119   : > { %1817 = vst [vmem:[#allocation2 + $0x170] sm:$0xf] %v1785_v35  ;;  %v1409_v59 = vsel %vm6961_vm10, %v1332_v52, 0.0  ;;  %v1601_v60 = vsel %vm6967_vm11, %v1525_v53, 0.0  ;;  %v7003_v61 = vmax.f32 %v782_v47, 0.0  ;;  %v759_v57 = vadd.f32 %v6731_v29, %v723_v48 }
 0x11a   : > { %v1634_v3 = vpack.c.bf16 %v1409_v59, %v1409_v59  ;;  %1731 = vst [vmem:[#allocation2 + $0x64] sm:$0xf] %v1699_v41  ;;  %v1762_v62 = vpack.c.bf16 %v1601_v60, %v1601_v60  ;;  %vm7048_vm15 = vcmp.lt.s32.totalorder %v1079_v2, 15  ;;  %v911_v47 = vand.u32 15, %v7008_v4 }
 0x11b   : > { %v1304_v10 = vrot.slane %v7003_v61, 7  ;;  %v1497_v13 = vrot.slane %v7003_v61, 1  ;;  %v1723_v16 = vpack.c.bf16 %v7003_v61, %v7003_v61  ;;  %v7015_v17 = vmax.f32 %v759_v57, 0.0  ;;  %v4955_v20 = vld [vmem:[#allocation2 + $0x54] sm:$0xf0]  ;;  %v709_v24 = vpop.f32.mrf.mxu3  ;;  %6191 = vmatpush.bf16.msra.mxu3 %v6704_v21 }
 0x11c   : > { %1667 = vst [vmem:[#allocation2 + $0x60] sm:$0xf] %v1634_v3  ;;  %v4958_v0 = vor.u32 %v5931_v58, %v4955_v20  ;;  %v747_v55 = vmul.f32 %v6726_v28, %v709_v24  ;;  %v918_v48 = vand.u32 15, %v834_v1  ;;  %vm7077_vm3 = vcmp.lt.s32.totalorder %v911_v47, 15 }
 0x11d   : > { %1794 = vst [vmem:[#allocation2 + $0x5c] sm:$0xf] %v1762_v62  ;;  %v1308_v14 = vsel %vm1306_vm0, %v1303_v15, %v1304_v10  ;;  %v1501_v31 = vsel %vm1499_vm1, %v1496_v30, %v1497_v13  ;;  %v1281_v11 = vrot.slane %v7015_v17, 7  ;;  %v1474_v12 = vrot.slane %v7015_v17, 1  ;;  %v652_v32 = vpop.f32.mrf.mxu0 }
 0x11e   : > { %v1433_v36 = vsel %vm6972_vm12, %v1308_v14, 0.0  ;;  %v1625_v6 = vsel %vm6980_vm13, %v1501_v31, 0.0  ;;  %1755 = vst [vmem:[#allocation2 + $0x184] sm:$0xf] %v1723_v16  ;;  %v1700_v63 = vpack.c.bf16 %v7015_v17, %v7015_v17  ;;  %2553 = vmatmul.bf16.gmra.mxu2 %v4958_v0  ;;  %v783_v15 = vadd.f32 %v6731_v29, %v747_v55 }
 0x11f   : > { %v1658_v30 = vpack.c.bf16 %v1433_v36, %v1433_v36  ;;  %v1786_v37 = vpack.c.bf16 %v1625_v6, %v1625_v6  ;;  %v1331_v9 = vsel %vm1306_vm0, %v1280_v46, %v1281_v11  ;;  %v1524_v38 = vsel %vm1499_vm1, %v1473_v39, %v1474_v12  ;;  %6192 = vmatpush.bf16.msra.mxu3 %v6707_v22 }
 0x120   : > { %v1635_v40 = vpack.c.bf16 %v1331_v9, %v1331_v9  ;;  %1732 = vst [vmem:[#allocation2 + $0x70] sm:$0xf] %v1700_v63  ;;  %v1763_v42 = vpack.c.bf16 %v1524_v38, %v1524_v38  ;;  %v815_v45 = vmax.f32 %v783_v15, 0.0  ;;  %v724_v19 = vmul.f32 %v6726_v28, %v652_v32  ;;  %3121 = vmatmul.bf16.vlgmr.msrb.gmra.mxu0 %v5218_v18 }
 0x121   : > { %1691 = vst [vmem:[#allocation2 + $0x180] sm:$0xf] %v1658_v30  ;;  %vm7073_vm2 = vcmp.gt.s32.totalorder %v918_v48, 0  ;;  %v5934_v16 = vld [vmem:[#allocation2 + $0x64] sm:$0xf]  ;;  %v835_v22 = vadd.s32 72, %v6743_v43 }
 0x122   : > { %1818 = vst [vmem:[#allocation2 + $0x17c] sm:$0xf] %v1786_v37  ;;  %v1305_v46 = vrot.slane %v815_v45, 7  ;;  %v1498_v39 = vrot.slane %v815_v45, 1  ;;  %v1724_v5 = vpack.c.bf16 %v815_v45, %v815_v45  ;;  %v760_v41 = vadd.f32 %v6731_v29, %v724_v19  ;;  %v5926_v30 = vld [vmem:[#allocation2 + $0x20] sm:$0xf0] }
 0x123   : > { %1668 = vst [vmem:[#allocation2 + $0x6c] sm:$0xf] %v1635_v40  ;;  %6193 = vmatpush.bf16.msra.mxu3 %v6710_v23  ;;  %v836_v14 = vadd.s32 80, %v6743_v43  ;;  %v5857_v37 = vld [vmem:[#allocation2 + $0x20] sm:$0xf0] }
 0x124   : > { %1795 = vst [vmem:[#allocation2 + $0x68] sm:$0xf] %v1763_v42  ;;  %v1307_v49 = vsel %vm1306_vm0, %v1304_v10, %v1305_v46  ;;  %v1338_v52 = vsel %vm1306_vm0, %v1305_v46, %v1274_v50  ;;  %v1500_v53 = vsel %vm1499_vm1, %v1497_v13, %v1498_v39  ;;  %v1531_v21 = vsel %vm1499_vm1, %v1498_v39, %v1467_v51 }
 0x125   : > { %v1403_v56 = vsel %vm7044_vm14, %v1338_v52, 0.0  ;;  %v1627_v54 = vsel %vm7048_vm15, %v1531_v21, 0.0  ;;  %v1659_v59 = vpack.c.bf16 %v1307_v49, %v1307_v49  ;;  %1756 = vst [vmem:[#allocation2 + $0x190] sm:$0xf] %v1724_v5  ;;  %v1787_v60 = vpack.c.bf16 %v1500_v53, %v1500_v53  ;;  %v654_v61 = vpop.f32.mrf.mxu0 }
 0x126   : > { %v1628_v57 = vpack.c.bf16 %v1403_v56, %v1403_v56  ;;  %v1788_v50 = vpack.c.bf16 %v1627_v54, %v1627_v54  ;;  %v792_v3 = vmax.f32 %v760_v41, 0.0  ;;  %v725_v62 = vmul.f32 %v6726_v28, %v654_v61 }
 0x127   : > { %1692 = vst [vmem:[#allocation2 + $0x18c] sm:$0xf] %v1659_v59  ;;  %v4967_v58 = vld [vmem:[#allocation2 + $0x6c] sm:$0xf0]  ;;  %6194 = vmatpush.bf16.msra.mxu3 %v6714_v25  ;;  %v932_v19 = vand.u32 15, %v836_v14 }
 0x128   : > { %1661 = vst [vmem:[#allocation2 + $0x18] sm:$0xf] %v1628_v57  ;;  %v1282_v2 = vrot.slane %v792_v3, 7  ;;  %v1475_v4 = vrot.slane %v792_v3, 1  ;;  %v1701_v10 = vpack.c.bf16 %v792_v3, %v792_v3  ;;  %v761_v13 = vadd.f32 %v6731_v29, %v725_v62 }
 0x129   : > { %1819 = vst [vmem:[#allocation2 + $0x188] sm:$0xf] %v1787_v60  ;;  %v4970_v55 = vor.u32 %v5934_v16, %v4967_v58  ;;  %vm1252_vm5 = vcmp.gt.s32.totalorder %v932_v19, 0  ;;  %v838_v57 = vadd.s32 96, %v6743_v43  ;;  %v5929_v58 = vld [vmem:[#allocation2 + $0x38] sm:$0xf0] }
 0x12a   : > { %1820 = vst [vmem:[#allocation2 + $0x194] sm:$0xf] %v1788_v50  ;;  %v1330_v20 = vsel %vm1306_vm0, %v1281_v11, %v1282_v2  ;;  %v1523_v24 = vsel %vm1499_vm1, %v1474_v12, %v1475_v4  ;;  %v793_v0 = vmax.f32 %v761_v13, 0.0  ;;  %v925_v12 = vand.u32 15, %v835_v22 }
 0x12b   : > { %v1411_v1 = vsel %vm7073_vm2, %v1330_v20, 0.0  ;;  %v1603_v18 = vsel %vm7077_vm3, %v1523_v24, 0.0  ;;  %1733 = vst [vmem:[#allocation2 + $0x7c] sm:$0xf] %v1701_v10  ;;  %6195 = vmatpush.bf16.msra.mxu3 %v6717_v26  ;;  %v946_v22 = vand.u32 15, %v838_v57 }
 0x12c   : > { %v1636_v31 = vpack.c.bf16 %v1411_v1, %v1411_v1  ;;  %v1764_v11 = vpack.c.bf16 %v1603_v18, %v1603_v18  ;;  %v1283_v32 = vrot.slane %v793_v0, 7  ;;  %v1476_v17 = vrot.slane %v793_v0, 1  ;;  %v4941_v20 = vld [vmem:[#allocation2 + $0x30] sm:$0xf] }
 0x12d   : > { %v1702_v36 = vpack.c.bf16 %v793_v0, %v793_v0  ;;  %v657_v6 = vpop.f32.mrf.mxu0  ;;  %vm1444_vm4 = vcmp.lt.s32.totalorder %v925_v12, 15  ;;  %v5241_v24 = vld [vmem:[#allocation2 + $0x30] sm:$0xf]  ;;  %v4942_v1 = vor.u32 %v5929_v58, %v4941_v20  ;;  %vm1254_vm6 = vcmp.gt.s32.totalorder %v946_v22, 0 }
 0x12e   : > { %1669 = vst [vmem:[#allocation2 + $0x78] sm:$0xf] %v1636_v31  ;;  %v1329_v23 = vsel %vm1306_vm0, %v1282_v2, %v1283_v32  ;;  %v1522_v63 = vsel %vm1499_vm1, %v1475_v4, %v1476_v17  ;;  %2558 = vmatmul.bf16.gmra.mxu2 %v4970_v55  ;;  %v726_v15 = vmul.f32 %v6726_v28, %v657_v6  ;;  %v5860_v2 = vld [vmem:[#allocation2 + $0x38] sm:$0xf0]  ;;  %v939_v55 = vand.u32 15, %v837_v34 }
 0x12f   : > { %1796 = vst [vmem:[#allocation2 + $0x74] sm:$0xf] %v1764_v11  ;;  %v1637_v9 = vpack.c.bf16 %v1329_v23, %v1329_v23  ;;  %v1765_v38 = vpack.c.bf16 %v1522_v63, %v1522_v63  ;;  %v4929_v40 = vld [vmem:[#allocation2 + $0x18] sm:$0xf]  ;;  %6196 = vmatpush.bf16.msra.mxu3 %v6720_v27  ;;  %v5242_v18 = vor.u32 %v5860_v2, %v5241_v24  ;;  %v7141_v34 = vld [vmem:[%s8073_s2] ss:$0 sm:$0xff] }
 0x130   : > { %v5229_v42 = vld [vmem:[#allocation2 + $0x18] sm:$0xf]  ;;  %1734 = vst [vmem:[#allocation2 + $0x88] sm:$0xf] %v1702_v36  ;;  %v762_v45 = vadd.f32 %v6731_v29, %v726_v15  ;;  %v4930_v33 = vor.u32 %v5926_v30, %v4929_v40  ;;  %vm1446_vm7 = vcmp.lt.s32.totalorder %v939_v55, 15  ;;  %v5916_v55 = vld [vmem:[#allocation8 + $0x78] sm:$0xff] }
 0x131   : > { %v5230_v35 = vor.u32 %v5857_v37, %v5229_v42  ;;  %1670 = vst [vmem:[#allocation2 + $0x84] sm:$0xf] %v1637_v9  ;;  %3202 = vmatpush.bf16.msrb.mxu1 %v5916_v55  ;;  %v5915_v55 = vld [vmem:[#allocation8 + $0x70] sm:$0xff] }
 0x132   : > { %1797 = vst [vmem:[#allocation2 + $0x80] sm:$0xf] %v1765_v38  ;;  %v794_v46 = vmax.f32 %v762_v45, 0.0  ;;  %2454 = vmatmul.bf16.vlgmr.msra.gmra.mxu1 %v4930_v33  ;;  %v5937_v59 = vld [vmem:[#allocation2 + $0x7c] sm:$0xf]  ;;  %v840_v45 = vadd.s32 112, %v6743_v43 }
 0x133   : > { %3126 = vmatmul.bf16.gmra.mxu0 %v5230_v35 }
 0x134   : > { %v1284_v25 = vrot.slane %v794_v46, 7  ;;  %v1477_v39 = vrot.slane %v794_v46, 1  ;;  %v1703_v5 = vpack.c.bf16 %v794_v46, %v794_v46  ;;  %v839_v46 = vadd.s32 104, %v6743_v43 }
 0x135   : > { %v659_v41 = vpop.f32.mrf.mxu0  ;;  %3203 = vmatpush.bf16.msrb.mxu1 %v5915_v55 }
 0x136   : > { %v1328_v47 = vsel %vm1306_vm0, %v1283_v32, %v1284_v25  ;;  %v1521_v48 = vsel %vm1499_vm1, %v1476_v17, %v1477_v39  ;;  %1735 = vst [vmem:[#allocation2 + $0x94] sm:$0xf] %v1703_v5  ;;  %v727_v49 = vmul.f32 %v6726_v28, %v659_v41  ;;  %v5863_v5 = vld [vmem:[#allocation2 + $0x50] sm:$0xf0] }
 0x137   : > { %v1413_v52 = vsel %vm1252_vm5, %v1328_v47, 0.0  ;;  %v1605_v53 = vsel %vm1444_vm4, %v1521_v48, 0.0  ;;  %v4979_v21 = vld [vmem:[#allocation2 + $0x84] sm:$0xf0] }
 0x138   : > { %v1638_v26 = vpack.c.bf16 %v1413_v52, %v1413_v52  ;;  %v1766_v56 = vpack.c.bf16 %v1605_v53, %v1605_v53  ;;  %v763_v54 = vadd.f32 %v6731_v29, %v727_v49  ;;  %v4982_v61 = vor.u32 %v5937_v59, %v4979_v21  ;;  %v4953_v21 = vld [vmem:[#allocation2 + $0x48] sm:$0xf] }
 0x139   : > { %v960_v53 = vand.u32 15, %v840_v45 }
 0x13a   : > { %1671 = vst [vmem:[#allocation2 + $0x90] sm:$0xf] %v1638_v26  ;;  %v795_v60 = vmax.f32 %v763_v54, 0.0  ;;  %v5253_v26 = vld [vmem:[#allocation2 + $0x48] sm:$0xf]  ;;  %v953_v54 = vand.u32 15, %v839_v46 }
 0x13b   : > { %1798 = vst [vmem:[#allocation2 + $0x8c] sm:$0xf] %v1766_v56  ;;  %vm1256_vm8 = vcmp.gt.s32.totalorder %v960_v53, 0 }
 0x13c   : > { %v1285_v50 = vrot.slane %v795_v60, 7  ;;  %v1478_v3 = vrot.slane %v795_v60, 1  ;;  %v1704_v62 = vpack.c.bf16 %v795_v60, %v795_v60  ;;  %v5254_v60 = vor.u32 %v5863_v5, %v5253_v26 }
 0x13d   : > { %v662_v51 = vpop.f32.mrf.mxu0  ;;  %v5940_v38 = vld [vmem:[#allocation2 + $0x94] sm:$0xf]  ;;  %vm1448_vm9 = vcmp.lt.s32.totalorder %v953_v54, 15  ;;  %v844_v54 = vadd.s32 144, %v6743_v43 }
 0x13e   : > { %v1327_v27 = vsel %vm1306_vm0, %v1284_v25, %v1285_v50  ;;  %v1520_v4 = vsel %vm1499_vm1, %v1477_v39, %v1478_v3  ;;  %1736 = vst [vmem:[#allocation2 + $0xa0] sm:$0xf] %v1704_v62  ;;  %2563 = vmatmul.bf16.gmra.mxu2 %v4982_v61  ;;  %v728_v10 = vmul.f32 %v6726_v28, %v662_v51  ;;  %v5932_v39 = vld [vmem:[#allocation2 + $0x50] sm:$0xf0] }
 0x13f   : > { %v1639_v13 = vpack.c.bf16 %v1327_v27, %v1327_v27  ;;  %v1767_v16 = vpack.c.bf16 %v1520_v4, %v1520_v4  ;;  %v4954_v59 = vor.u32 %v5932_v39, %v4953_v21 }
 0x140   : > { %v764_v0 = vadd.f32 %v6731_v29, %v728_v10 }
 0x141   : > { %1672 = vst [vmem:[#allocation2 + $0x9c] sm:$0xf] %v1639_v13  ;;  %v7147_v13 = vld [vmem:[%s8074_s3] ss:$0 sm:$0xff] }
 0x142   : > { %1799 = vst [vmem:[#allocation2 + $0x98] sm:$0xf] %v1767_v16  ;;  %v796_v14 = vmax.f32 %v764_v0, 0.0  ;;  %2459 = vmatmul.bf16.gmra.mxu1 %v4942_v1  ;;  %v842_v0 = vadd.s32 128, %v6743_v43 }
 0x143   : > { %3131 = vmatmul.bf16.gmra.mxu0 %v5242_v18 }
 0x144   : > { %v1286_v31 = vrot.slane %v796_v14, 7  ;;  %v1479_v11 = vrot.slane %v796_v14, 1  ;;  %v1705_v32 = vpack.c.bf16 %v796_v14, %v796_v14 }
 0x145   : > { %v664_v17 = vpop.f32.mrf.mxu0  ;;  %v4991_v15 = vld [vmem:[#allocation2 + $0x9c] sm:$0xf0] }
 0x146   : > { %v1326_v36 = vsel %vm1306_vm0, %v1285_v50, %v1286_v31  ;;  %v1519_v6 = vsel %vm1499_vm1, %v1478_v3, %v1479_v11  ;;  %1737 = vst [vmem:[#allocation2 + $0xac] sm:$0xf] %v1705_v32  ;;  %v729_v12 = vmul.f32 %v6726_v28, %v664_v17  ;;  %v4994_v42 = vor.u32 %v5940_v38, %v4991_v15  ;;  %v5935_v32 = vld [vmem:[#allocation2 + $0x68] sm:$0xf0] }
 0x147   : > { %v1415_v23 = vsel %vm1254_vm6, %v1326_v36, 0.0  ;;  %v1607_v63 = vsel %vm1446_vm7, %v1519_v6, 0.0  ;;  %v5866_v17 = vld [vmem:[#allocation2 + $0x68] sm:$0xf0]  ;;  %v974_v15 = vand.u32 15, %v842_v0 }
 0x148   : > { %v1640_v30 = vpack.c.bf16 %v1415_v23, %v1415_v23  ;;  %v1768_v37 = vpack.c.bf16 %v1607_v63, %v1607_v63  ;;  %v765_v9 = vadd.f32 %v6731_v29, %v729_v12 }
 0x149   : > { %vm1258_vm10 = vcmp.gt.s32.totalorder %v974_v15, 0 }
 0x14a   : > { %1673 = vst [vmem:[#allocation2 + $0xa8] sm:$0xf] %v1640_v30  ;;  %v797_v40 = vmax.f32 %v765_v9, 0.0  ;;  %v4965_v30 = vld [vmem:[#allocation2 + $0x60] sm:$0xf] }
 0x14b   : > { %1800 = vst [vmem:[#allocation2 + $0xa4] sm:$0xf] %v1768_v37  ;;  %v5265_v37 = vld [vmem:[#allocation2 + $0x60] sm:$0xf] }
 0x14c   : > { %v1287_v19 = vrot.slane %v797_v40, 7  ;;  %v1480_v33 = vrot.slane %v797_v40, 1  ;;  %v1706_v35 = vpack.c.bf16 %v797_v40, %v797_v40  ;;  %v4966_v40 = vor.u32 %v5935_v32, %v4965_v30 }
 0x14d   : > { %v667_v25 = vpop.f32.mrf.mxu0  ;;  %v5943_v22 = vld [vmem:[#allocation2 + $0xac] sm:$0xf] }
 0x14e   : > { %v1325_v41 = vsel %vm1306_vm0, %v1286_v31, %v1287_v19  ;;  %v1518_v47 = vsel %vm1499_vm1, %v1479_v11, %v1480_v33  ;;  %1738 = vst [vmem:[#allocation2 + $0xb8] sm:$0xf] %v1706_v35  ;;  %2568 = vmatmul.bf16.gmra.mxu2 %v4994_v42  ;;  %v730_v48 = vmul.f32 %v6726_v28, %v667_v25  ;;  %v841_v31 = vadd.s32 120, %v6743_v43 }
 0x14f   : > { %v1641_v49 = vpack.c.bf16 %v1325_v41, %v1325_v41  ;;  %v1769_v52 = vpack.c.bf16 %v1518_v47, %v1518_v47  ;;  %v5266_v42 = vor.u32 %v5866_v17, %v5265_v37 }
 0x150   : > { %v766_v56 = vadd.f32 %v6731_v29, %v730_v48  ;;  %v967_v38 = vand.u32 15, %v841_v31 }
 0x151   : > { %1674 = vst [vmem:[#allocation2 + $0xb4] sm:$0xf] %v1641_v49 }
 0x152   : > { %1801 = vst [vmem:[#allocation2 + $0xb0] sm:$0xf] %v1769_v52  ;;  %v798_v61 = vmax.f32 %v766_v56, 0.0  ;;  %2464 = vmatmul.bf16.gmra.mxu1 %v4954_v59  ;;  %vm1450_vm11 = vcmp.lt.s32.totalorder %v967_v38, 15 }
 0x153   : > { %3136 = vmatmul.bf16.gmra.mxu0 %v5254_v60 }
 0x154   : > { %v1288_v57 = vrot.slane %v798_v61, 7  ;;  %v1481_v50 = vrot.slane %v798_v61, 1  ;;  %v1707_v28 = vpack.c.bf16 %v798_v61, %v798_v61 }
 0x155   : > { %v669_v3 = vpop.f32.mrf.mxu0  ;;  %v5003_v27 = vld [vmem:[#allocation2 + $0xb4] sm:$0xf0] }
 0x156   : > { %v1324_v62 = vsel %vm1306_vm0, %v1287_v19, %v1288_v57  ;;  %v1517_v29 = vsel %vm1499_vm1, %v1480_v33, %v1481_v50  ;;  %1739 = vst [vmem:[#allocation2 + $0xc4] sm:$0xf] %v1707_v28  ;;  %v731_v51 = vmul.f32 %v7141_v34, %v669_v3  ;;  %v5006_v24 = vor.u32 %v5943_v22, %v5003_v27  ;;  %v5938_v28 = vld [vmem:[#allocation2 + $0x80] sm:$0xf0] }
 0x157   : > { %v1417_v58 = vsel %vm1256_vm8, %v1324_v62, 0.0  ;;  %v1609_v2 = vsel %vm1448_vm9, %v1517_v29, 0.0  ;;  %v5869_v3 = vld [vmem:[#allocation2 + $0x80] sm:$0xf0]  ;;  %v988_v27 = vand.u32 15, %v844_v54 }
 0x158   : > { %v1642_v4 = vpack.c.bf16 %v1417_v58, %v1417_v58  ;;  %v1770_v10 = vpack.c.bf16 %v1609_v2, %v1609_v2  ;;  %v767_v16 = vadd.f32 %v7147_v13, %v731_v51 }
 0x159   : > { %vm1260_vm12 = vcmp.gt.s32.totalorder %v988_v27, 0 }
 0x15a   : > { %1675 = vst [vmem:[#allocation2 + $0xc0] sm:$0xf] %v1642_v4  ;;  %v799_v20 = vmax.f32 %v767_v16, 0.0  ;;  %v4977_v4 = vld [vmem:[#allocation2 + $0x78] sm:$0xf] }
 0x15b   : > { %1802 = vst [vmem:[#allocation2 + $0xbc] sm:$0xf] %v1770_v10  ;;  %v5277_v10 = vld [vmem:[#allocation2 + $0x78] sm:$0xf] }
 0x15c   : > { %v1289_v1 = vrot.slane %v799_v20, 7  ;;  %v1482_v18 = vrot.slane %v799_v20, 1  ;;  %v1708_v14 = vpack.c.bf16 %v799_v20, %v799_v20  ;;  %v4978_v20 = vor.u32 %v5938_v28, %v4977_v4 }
 0x15d   : > { %v672_v11 = vpop.f32.mrf.mxu0  ;;  %v5946_v21 = vld [vmem:[#allocation2 + $0xc4] sm:$0xf] }
 0x15e   : > { %v1323_v36 = vsel %vm1306_vm0, %v1288_v57, %v1289_v1  ;;  %v1516_v6 = vsel %vm1499_vm1, %v1481_v50, %v1482_v18  ;;  %1740 = vst [vmem:[#allocation2 + $0xd0] sm:$0xf] %v1708_v14  ;;  %2573 = vmatmul.bf16.gmra.mxu2 %v5006_v24  ;;  %v732_v12 = vmul.f32 %v7141_v34, %v672_v11  ;;  %v843_v57 = vadd.s32 136, %v6743_v43 }
 0x15f   : > { %v1643_v23 = vpack.c.bf16 %v1323_v36, %v1323_v36  ;;  %v1771_v63 = vpack.c.bf16 %v1516_v6, %v1516_v6  ;;  %v5278_v24 = vor.u32 %v5869_v3, %v5277_v10 }
 0x160   : > { %v768_v9 = vadd.f32 %v7147_v13, %v732_v12  ;;  %v981_v22 = vand.u32 15, %v843_v57 }
 0x161   : > { %1676 = vst [vmem:[#allocation2 + $0xcc] sm:$0xf] %v1643_v23 }
 0x162   : > { %1803 = vst [vmem:[#allocation2 + $0xc8] sm:$0xf] %v1771_v63  ;;  %v800_v45 = vmax.f32 %v768_v9, 0.0  ;;  %2469 = vmatmul.bf16.gmra.mxu1 %v4966_v40  ;;  %vm1452_vm13 = vcmp.lt.s32.totalorder %v981_v22, 15  ;;  %v846_v40 = vadd.s32 160, %v6743_v43 }
 0x163   : > { %3141 = vmatmul.bf16.gmra.mxu0 %v5266_v42 }
 0x164   : > { %v1290_v19 = vrot.slane %v800_v45, 7  ;;  %v1483_v33 = vrot.slane %v800_v45, 1  ;;  %v1709_v35 = vpack.c.bf16 %v800_v45, %v800_v45 }
 0x165   : > { %v674_v46 = vpop.f32.mrf.mxu0  ;;  %v5015_v48 = vld [vmem:[#allocation2 + $0xcc] sm:$0xf0] }
 0x166   : > { %v1322_v25 = vsel %vm1306_vm0, %v1289_v1, %v1290_v19  ;;  %v1515_v39 = vsel %vm1499_vm1, %v1482_v18, %v1483_v33  ;;  %1741 = vst [vmem:[#allocation2 + $0xdc] sm:$0xf] %v1709_v35  ;;  %v733_v5 = vmul.f32 %v7141_v34, %v674_v46  ;;  %v5018_v56 = vor.u32 %v5946_v21, %v5015_v48  ;;  %v5941_v46 = vld [vmem:[#allocation2 + $0x98] sm:$0xf0] }
 0x167   : > { %v1419_v41 = vsel %vm1258_vm10, %v1322_v25, 0.0  ;;  %v1611_v47 = vsel %vm1450_vm11, %v1515_v39, 0.0  ;;  %v5872_v25 = vld [vmem:[#allocation2 + $0x98] sm:$0xf0] }
 0x168   : > { %v1644_v49 = vpack.c.bf16 %v1419_v41, %v1419_v41  ;;  %v1772_v52 = vpack.c.bf16 %v1611_v47, %v1611_v47  ;;  %v769_v53 = vadd.f32 %v7147_v13, %v733_v5 }
 0x16a   : > { %1677 = vst [vmem:[#allocation2 + $0xd8] sm:$0xf] %v1644_v49  ;;  %v801_v26 = vmax.f32 %v769_v53, 0.0  ;;  %v1002_v49 = vand.u32 15, %v846_v40  ;;  %v5289_v53 = vld [vmem:[#allocation2 + $0x90] sm:$0xf] }
 0x16b   : > { %1804 = vst [vmem:[#allocation2 + $0xd4] sm:$0xf] %v1772_v52  ;;  %v4989_v52 = vld [vmem:[#allocation2 + $0x90] sm:$0xf]  ;;  %v5290_v54 = vor.u32 %v5872_v25, %v5289_v53  ;;  %v5920_v25 = vld [vmem:[#allocation8 + $0x98] sm:$0xff]  ;;  %v5919_v53 = vld [vmem:[#allocation8 + $0x90] sm:$0xff] }
 0x16c   : > { %v1291_v59 = vrot.slane %v801_v26, 7  ;;  %v1484_v60 = vrot.slane %v801_v26, 1  ;;  %v1710_v61 = vpack.c.bf16 %v801_v26, %v801_v26  ;;  %vm1262_vm14 = vcmp.gt.s32.totalorder %v1002_v49, 0 }
 0x16d   : > { %v677_v50 = vpop.f32.mrf.mxu0  ;;  %v5949_v30 = vld [vmem:[#allocation2 + $0xdc] sm:$0xf]  ;;  %v849_v49 = vadd.s32 184, %v6743_v43 }
 0x16e   : > { %v1321_v62 = vsel %vm1306_vm0, %v1290_v19, %v1291_v59  ;;  %v1514_v29 = vsel %vm1499_vm1, %v1483_v33, %v1484_v60  ;;  %1742 = vst [vmem:[#allocation2 + $0xe8] sm:$0xf] %v1710_v61  ;;  %2578 = vmatmul.bf16.gmra.mxu2 %v5018_v56  ;;  %v734_v51 = vmul.f32 %v7141_v34, %v677_v50  ;;  %v845_v33 = vadd.s32 152, %v6743_v43  ;;  %v5924_v61 = vld [vmem:[#allocation8 + $0xb8] sm:$0xff] }
 0x16f   : > { %v1645_v58 = vpack.c.bf16 %v1321_v62, %v1321_v62  ;;  %v1773_v2 = vpack.c.bf16 %v1514_v29, %v1514_v29  ;;  %v4990_v56 = vor.u32 %v5941_v46, %v4989_v52  ;;  %3291 = vmatpush.bf16.msrb.mxu2 %v5924_v61  ;;  %v5923_v62 = vld [vmem:[#allocation8 + $0xb0] sm:$0xff] }
 0x170   : > { %v770_v16 = vadd.f32 %v7147_v13, %v734_v51  ;;  %v995_v26 = vand.u32 15, %v845_v33 }
 0x171   : > { %1678 = vst [vmem:[#allocation2 + $0xe4] sm:$0xf] %v1645_v58 }
 0x172   : > { %1805 = vst [vmem:[#allocation2 + $0xe0] sm:$0xf] %v1773_v2  ;;  %v802_v0 = vmax.f32 %v770_v16, 0.0  ;;  %2474 = vmatmul.bf16.gmra.mxu1 %v4978_v20  ;;  %vm1454_vm15 = vcmp.lt.s32.totalorder %v995_v26, 15 }
 0x173   : > { %3146 = vmatmul.bf16.gmra.mxu0 %v5278_v24  ;;  %3292 = vmatpush.bf16.msrb.mxu2 %v5923_v62  ;;  %v5922_v24 = vld [vmem:[#allocation8 + $0xa8] sm:$0xff]  ;;  %v1023_v62 = vand.u32 15, %v849_v49 }
 0x174   : > { %v1292_v1 = vrot.slane %v802_v0, 7  ;;  %v1485_v18 = vrot.slane %v802_v0, 1  ;;  %v1711_v14 = vpack.c.bf16 %v802_v0, %v802_v0  ;;  %v5914_v0 = vld [vmem:[#allocation8 + $0x68] sm:$0xff] }
 0x175   : > { %v679_v31 = vpop.f32.mrf.mxu0  ;;  %v5027_v12 = vld [vmem:[#allocation2 + $0xe4] sm:$0xf0]  ;;  %3204 = vmatpush.bf16.msrb.mxu1 %v5914_v0  ;;  %vm1458_vm5 = vcmp.lt.s32.totalorder %v1023_v62, 15 }
 0x176   : > { %v1320_v11 = vsel %vm1306_vm0, %v1291_v59, %v1292_v1  ;;  %v1513_v32 = vsel %vm1499_vm1, %v1484_v60, %v1485_v18  ;;  %1743 = vst [vmem:[#allocation2 + $0xf4] sm:$0xf] %v1711_v14  ;;  %v735_v17 = vmul.f32 %v7141_v34, %v679_v31  ;;  %v5030_v9 = vor.u32 %v5949_v30, %v5027_v12  ;;  %v5875_v12 = vld [vmem:[#allocation2 + $0xb0] sm:$0xf0] }
 0x177   : > { %v1421_v36 = vsel %vm1260_vm12, %v1320_v11, 0.0  ;;  %v1613_v6 = vsel %vm1452_vm13, %v1513_v32, 0.0  ;;  %v848_v14 = vadd.s32 176, %v6743_v43  ;;  %3293 = vmatpush.bf16.msrb.mxu2 %v5922_v24  ;;  %v5917_v24 = vld [vmem:[#allocation8 + $0x80] sm:$0xff] }
 0x178   : > { %v1646_v23 = vpack.c.bf16 %v1421_v36, %v1421_v36  ;;  %v1774_v63 = vpack.c.bf16 %v1613_v6, %v1613_v6  ;;  %v771_v15 = vadd.f32 %v7147_v13, %v735_v17  ;;  %v5944_v6 = vld [vmem:[#allocation2 + $0xb0] sm:$0xf0] }
 0x17a   : > { %1679 = vst [vmem:[#allocation2 + $0xf0] sm:$0xf] %v1646_v23  ;;  %v803_v37 = vmax.f32 %v771_v15, 0.0  ;;  %v5921_v23 = vld [vmem:[#allocation8 + $0xa0] sm:$0xff] }
 0x17b   : > { %1806 = vst [vmem:[#allocation2 + $0xec] sm:$0xf] %v1774_v63  ;;  %v7178_v38 = vpop.f32.mrf.mxu2  ;;  %3294 = vmatpush.bf16.msrb.mxu2 %v5921_v23 }
 0x17c   : > { %v1293_v42 = vrot.slane %v803_v37, 7  ;;  %v1486_v45 = vrot.slane %v803_v37, 1  ;;  %v1712_v19 = vpack.c.bf16 %v803_v37, %v803_v37 }
 0x17d   : > { %v682_v35 = vpop.f32.mrf.mxu0  ;;  %v5952_v20 = vld [vmem:[#allocation2 + $0xf4] sm:$0xf] }
 0x17e   : > { %v1319_v39 = vsel %vm1306_vm0, %v1292_v1, %v1293_v42  ;;  %v1512_v5 = vsel %vm1499_vm1, %v1485_v18, %v1486_v45  ;;  %1744 = vst [vmem:[#allocation2 + $0x100] sm:$0xf] %v1712_v19  ;;  %2583 = vmatmul.bf16.gmra.mxu2 %v5030_v9  ;;  %v736_v41 = vmul.f32 %v7141_v34, %v682_v35  ;;  %v847_v18 = vadd.s32 168, %v6743_v43  ;;  %v5301_v19 = vld [vmem:[#allocation2 + $0xa8] sm:$0xf] }
 0x17f   : > { %v1647_v47 = vpack.c.bf16 %v1319_v39, %v1319_v39  ;;  %v1775_v48 = vpack.c.bf16 %v1512_v5, %v1512_v5  ;;  %v5302_v46 = vor.u32 %v5875_v12, %v5301_v19  ;;  %v850_v5 = vadd.s32 192, %v6743_v43  ;;  %3295 = vmatpush.bf16.msrb.mxu2 %v5920_v25  ;;  %v5913_v43 = vld [vmem:[#allocation8 + $0x60] sm:$0xff]  ;;  %v5950_v19 = vld [vmem:[#allocation2 + $0xe0] sm:$0xf0]  ;;  %v5025_v25 = vld [vmem:[#allocation2 + $0xd8] sm:$0xf] }
 0x180   : > { %v772_v21 = vadd.f32 %v7147_v13, %v736_v41  ;;  %v1009_v40 = vand.u32 15, %v847_v18  ;;  %3205 = vmatpush.bf16.msrb.mxu1 %v5913_v43  ;;  %v5909_v43 = vld [vmem:[#allocation8 + $0x40] sm:$0xff] }
 0x181   : > { %1680 = vst [vmem:[#allocation2 + $0xfc] sm:$0xf] %v1647_v47 }
 0x182   : > { %1807 = vst [vmem:[#allocation2 + $0xf8] sm:$0xf] %v1775_v48  ;;  %v804_v59 = vmax.f32 %v772_v21, 0.0  ;;  %2479 = vmatmul.bf16.gmra.mxu1 %v4990_v56  ;;  %vm1456_vm3 = vcmp.lt.s32.totalorder %v1009_v40, 15 }
 0x183   : > { %3151 = vmatmul.bf16.gmra.mxu0 %v5290_v54  ;;  %v7188_v60 = vpop.f32.mrf.mxu2  ;;  %3296 = vmatpush.bf16.msrb.mxu2 %v5919_v53  ;;  %v5085_v53 = vld [vmem:[#allocation2 + $0x150] sm:$0xf] }
 0x184   : > { %v1294_v57 = vrot.slane %v804_v59, 7  ;;  %v1487_v50 = vrot.slane %v804_v59, 1  ;;  %v1713_v28 = vpack.c.bf16 %v804_v59, %v804_v59 }
 0x185   : > { %v684_v3 = vpop.f32.mrf.mxu0  ;;  %v5039_v4 = vld [vmem:[#allocation2 + $0xfc] sm:$0xf0] }
 0x186   : > { %v1318_v29 = vsel %vm1306_vm0, %v1293_v42, %v1294_v57  ;;  %v1511_v51 = vsel %vm1499_vm1, %v1486_v45, %v1487_v50  ;;  %1745 = vst [vmem:[#allocation2 + $0x10c] sm:$0xf] %v1713_v28  ;;  %v737_v58 = vmul.f32 %v7141_v34, %v684_v3  ;;  %v5042_v1 = vor.u32 %v5952_v20, %v5039_v4  ;;  %v5001_v45 = vld [vmem:[#allocation2 + $0xa8] sm:$0xf]  ;;  %v5878_v20 = vld [vmem:[#allocation2 + $0xc8] sm:$0xf0] }
 0x187   : > { %v1423_v2 = vsel %vm1262_vm14, %v1318_v29, 0.0  ;;  %v1615_v27 = vsel %vm1454_vm15, %v1511_v51, 0.0  ;;  %v1016_v42 = vand.u32 15, %v848_v14  ;;  %v5002_v35 = vor.u32 %v5944_v6, %v5001_v45  ;;  %v5918_v51 = vld [vmem:[#allocation8 + $0x88] sm:$0xff] }
 0x188   : > { %v1648_v10 = vpack.c.bf16 %v1423_v2, %v1423_v2  ;;  %v1776_v16 = vpack.c.bf16 %v1615_v27, %v1615_v27  ;;  %v773_v22 = vadd.f32 %v7147_v13, %v737_v58  ;;  %3297 = vmatpush.bf16.msrb.mxu2 %v5918_v51  ;;  %v5037_v51 = vld [vmem:[#allocation2 + $0xf0] sm:$0xf] }
 0x189   : > { %vm1264_vm2 = vcmp.gt.s32.totalorder %v1016_v42, 0 }
 0x18a   : > { %1681 = vst [vmem:[#allocation2 + $0x108] sm:$0xf] %v1648_v10  ;;  %v805_v55 = vmax.f32 %v773_v22, 0.0 }
 0x18b   : > { %1808 = vst [vmem:[#allocation2 + $0x104] sm:$0xf] %v1776_v16 }
 0x18c   : > { %v1295_v31 = vrot.slane %v805_v55, 7  ;;  %v1488_v11 = vrot.slane %v805_v55, 1  ;;  %v1714_v32 = vpack.c.bf16 %v805_v55, %v805_v55  ;;  %3298 = vmatpush.bf16.msrb.mxu2 %v5917_v24  ;;  %v5911_v24 = vld [vmem:[#allocation8 + $0x50] sm:$0xff] }
 0x18d   : > { %v7198_v17 = vpop.f32.mrf.mxu2  ;;  %v687_v36 = vpop.f32.mrf.mxu0  ;;  %v5955_v2 = vld [vmem:[#allocation2 + $0x10c] sm:$0xf] }
 0x18e   : > { %v1317_v63 = vsel %vm1306_vm0, %v1294_v57, %v1295_v31  ;;  %v1510_v15 = vsel %vm1499_vm1, %v1487_v50, %v1488_v11  ;;  %1746 = vst [vmem:[#allocation2 + $0x118] sm:$0xf] %v1714_v32  ;;  %2588 = vmatmul.bf16.gmra.mxu2 %v5042_v1  ;;  %v738_v30 = vmul.f32 %v7141_v34, %v687_v36  ;;  %v1030_v57 = vand.u32 15, %v850_v5  ;;  %v5313_v36 = vld [vmem:[#allocation2 + $0xc0] sm:$0xf] }
 0x18f   : > { %v1649_v37 = vpack.c.bf16 %v1317_v63, %v1317_v63  ;;  %v1777_v9 = vpack.c.bf16 %v1510_v15, %v1510_v15  ;;  %v5314_v44 = vor.u32 %v5878_v20, %v5313_v36 }
 0x190   : > { %v774_v33 = vadd.f32 %v7147_v13, %v738_v30  ;;  %vm7216_vm4 = vcmp.gt.s32.totalorder %v1030_v57, 0 }
 0x191   : > { %1682 = vst [vmem:[#allocation2 + $0x114] sm:$0xf] %v1649_v37  ;;  %v5962_v37 = vld [vmem:[#allocation2 + $0x140] sm:$0xf0] }
 0x192   : > { %1809 = vst [vmem:[#allocation2 + $0x110] sm:$0xf] %v1777_v9  ;;  %v806_v39 = vmax.f32 %v774_v33, 0.0  ;;  %2484 = vmatmul.bf16.gmra.mxu1 %v5002_v35  ;;  %v5881_v33 = vld [vmem:[#allocation2 + $0xe0] sm:$0xf0] }
 0x193   : > { %3156 = vmatmul.bf16.gmra.mxu0 %v5302_v46 }
 0x194   : > { %v1296_v41 = vrot.slane %v806_v39, 7  ;;  %v1489_v47 = vrot.slane %v806_v39, 1  ;;  %v1715_v48 = vpack.c.bf16 %v806_v39, %v806_v39  ;;  %v5325_v39 = vld [vmem:[#allocation2 + $0xd8] sm:$0xf] }
 0x195   : > { %v689_v52 = vpop.f32.mrf.mxu0  ;;  %v7213_v61 = vpop.f32.mrf.mxu2  ;;  %v5051_v29 = vld [vmem:[#allocation2 + $0x114] sm:$0xf0] }
 0x196   : > { %v1316_v21 = vsel %vm1306_vm0, %v1295_v31, %v1296_v41  ;;  %v1509_v26 = vsel %vm1499_vm1, %v1488_v11, %v1489_v47  ;;  %1747 = vst [vmem:[#allocation2 + $0x124] sm:$0xf] %v1715_v48  ;;  %v739_v56 = vmul.f32 %v7141_v34, %v689_v52  ;;  %v5054_v34 = vor.u32 %v5955_v2, %v5051_v29 }
 0x197   : > { %v1425_v54 = vsel %vm1264_vm2, %v1316_v21, 0.0  ;;  %v1617_v59 = vsel %vm1456_vm3, %v1509_v26, 0.0  ;;  %v5965_v21 = vld [vmem:[#allocation2 + $0x158] sm:$0xf0] }
 0x198   : > { %v1650_v50 = vpack.c.bf16 %v1425_v54, %v1425_v54  ;;  %v1778_v28 = vpack.c.bf16 %v1617_v59, %v1617_v59  ;;  %v775_v3 = vadd.f32 %v7147_v13, %v739_v56  ;;  %v5947_v13 = vld [vmem:[#allocation2 + $0xc8] sm:$0xf0]  ;;  %v5225_v56 = vld [vmem:[#allocation2 + $0x8] sm:$0xf]  ;;  %v5855_v54 = vld [vmem:[#allocation2 + $0x10] sm:$0xf0]  ;;  %v5086_v57 = vor.u32 %v5965_v21, %v5085_v53 }
 0x199   : > { %v5912_v59 = vld [vmem:[#allocation8 + $0x58] sm:$0xff] }
 0x19a   : > { %1683 = vst [vmem:[#allocation2 + $0x120] sm:$0xf] %v1650_v50  ;;  %v807_v58 = vmax.f32 %v775_v3, 0.0  ;;  %3206 = vmatpush.bf16.msrb.mxu1 %v5912_v59  ;;  %v5953_v50 = vld [vmem:[#allocation2 + $0xf8] sm:$0xf0] }
 0x19b   : > { %1810 = vst [vmem:[#allocation2 + $0x11c] sm:$0xf] %v1778_v28  ;;  %v5884_v28 = vld [vmem:[#allocation2 + $0xf8] sm:$0xf0]  ;;  %v5038_v2 = vor.u32 %v5953_v50, %v5037_v51  ;;  %v6060_v51 = vld [vmem:[#allocation8 + $0x1f8] sm:$0xff] }
 0x19c   : > { %v1297_v4 = vrot.slane %v807_v58, 7  ;;  %v1490_v10 = vrot.slane %v807_v58, 1  ;;  %v1716_v16 = vpack.c.bf16 %v807_v58, %v807_v58  ;;  %v5337_v58 = vld [vmem:[#allocation2 + $0xf0] sm:$0xf]  ;;  %v5994_v59 = vld [vmem:[#allocation8 + $0x168] sm:$0xff]  ;;  %3983 = vmatpush.bf16.msra.mxu0 %v6060_v51 }
 0x19d   : > { %v7220_v22 = vpop.f32.mrf.mxu0  ;;  %v5958_v40 = vld [vmem:[#allocation2 + $0x124] sm:$0xf]  ;;  %v5338_v27 = vor.u32 %v5884_v28, %v5337_v58  ;;  %v5961_v50 = vld [vmem:[#allocation2 + $0x13c] sm:$0xf]  ;;  %v5075_v28 = vld [vmem:[#allocation2 + $0x144] sm:$0xf0] }
 0x19e   : > { %v1314_v0 = vsel %vm1306_vm0, %v1297_v4, %v1298_v7  ;;  %v1315_v55 = vsel %vm1306_vm0, %v1296_v41, %v1297_v4  ;;  %v1507_v1 = vsel %vm1499_vm1, %v1490_v10, %v1491_v8  ;;  %v1508_v18 = vsel %vm1499_vm1, %v1489_v47, %v1490_v10  ;;  %1748 = vst [vmem:[#allocation2 + $0x130] sm:$0xf] %v1716_v16  ;;  %v5013_v7 = vld [vmem:[#allocation2 + $0xc0] sm:$0xf]  ;;  %v5097_v10 = vld [vmem:[#allocation2 + $0x168] sm:$0xf] }
 0x19f   : > { %v1427_v14 = vsel %vm7216_vm4, %v1314_v0, 0.0  ;;  %v1619_v31 = vsel %vm1458_vm5, %v1507_v1, 0.0  ;;  %v1651_v11 = vpack.c.bf16 %v1315_v55, %v1315_v55  ;;  %v1779_v32 = vpack.c.bf16 %v1508_v18, %v1508_v18  ;;  %2593 = vmatmul.bf16.gmra.mxu2 %v5054_v34  ;;  %v5968_v16 = vld [vmem:[#allocation2 + $0x170] sm:$0xf0]  ;;  %v5858_v0 = vld [vmem:[#allocation2 + $0x28] sm:$0xf0]  ;;  %3207 = vmatpush.bf16.msrb.mxu1 %v5911_v24 }
 0x1a0   : > { %v1652_v6 = vpack.c.bf16 %v1427_v14, %v1427_v14  ;;  %v1780_v12 = vpack.c.bf16 %v1619_v31, %v1619_v31  ;;  %v5014_v23 = vor.u32 %v5947_v13, %v5013_v7  ;;  %v5026_v41 = vor.u32 %v5950_v19, %v5025_v25  ;;  %v5956_v18 = vld [vmem:[#allocation2 + $0x110] sm:$0xf0]  ;;  %v5349_v7 = vld [vmem:[#allocation2 + $0x108] sm:$0xf]  ;;  %v5261_v24 = vld [vmem:[#allocation2 + $0x50] sm:$0xf] }
 0x1a1   : > { %1684 = vst [vmem:[#allocation2 + $0x12c] sm:$0xf] %v1651_v11  ;;  %v7236_v63 = vpop.f32.mrf.mxu2  ;;  %v5326_v47 = vor.u32 %v5881_v33, %v5325_v39  ;;  %v5098_v55 = vor.u32 %v5968_v16, %v5097_v10  ;;  %v5887_v14 = vld [vmem:[#allocation2 + $0x110] sm:$0xf0]  ;;  %v5361_v53 = vld [vmem:[#allocation2 + $0x120] sm:$0xf] }
 0x1a2   : > { %1685 = vst [vmem:[#allocation2 + $0x138] sm:$0xf] %v1652_v6  ;;  %2489 = vmatmul.bf16.gmra.mxu1 %v5014_v23  ;;  %v5350_v6 = vor.u32 %v5887_v14, %v5349_v7  ;;  %v5996_v23 = vld [vmem:[#allocation8 + $0x178] sm:$0xff]  ;;  %v5993_v58 = vld [vmem:[#allocation8 + $0x160] sm:$0xff]  ;;  %v6059_v16 = vld [vmem:[#allocation8 + $0x1f0] sm:$0xff] }
 0x1a3   : > { %3161 = vmatmul.bf16.gmra.mxu0 %v5314_v44  ;;  %1811 = vst [vmem:[#allocation2 + $0x128] sm:$0xf] %v1779_v32  ;;  %v5049_v32 = vld [vmem:[#allocation2 + $0x108] sm:$0xf]  ;;  %v5219_v10 = vld [vmem:[#allocation2 + $0xc] sm:$0xf0] }
 0x1a4   : > { %1812 = vst [vmem:[#allocation2 + $0x134] sm:$0xf] %v1780_v12  ;;  %v5910_v12 = vld [vmem:[#allocation8 + $0x48] sm:$0xff]  ;;  %3984 = vmatpush.bf16.msra.mxu0 %v6059_v16  ;;  %v5992_v7 = vld [vmem:[#allocation8 + $0x158] sm:$0xff]  ;;  %v6053_v51 = vld [vmem:[#allocation8 + $0x1c0] sm:$0xff] }
 0x1a5   : > { %v7238_v8 = vpop.f32.mrf.mxu0  ;;  %v5063_v15 = vld [vmem:[#allocation2 + $0x12c] sm:$0xf0]  ;;  %3208 = vmatpush.bf16.msrb.mxu1 %v5910_v12 }
 0x1a6   : > { %v5066_v45 = vor.u32 %v5958_v40, %v5063_v15  ;;  %v5971_v40 = vld [vmem:[#allocation2 + $0x188] sm:$0xf0] }
 0x1a8   : > { %v5959_v39 = vld [vmem:[#allocation2 + $0x128] sm:$0xf0] }
 0x1a9   : > { %v5073_v30 = vld [vmem:[#allocation2 + $0x138] sm:$0xf]  ;;  %v7240_v9 = vpop.f32.mrf.mxu2  ;;  %3209 = vmatpush.bf16.msrb.mxu1 %v5909_v43  ;;  %v5087_v43 = vld [vmem:[#allocation2 + $0x15c] sm:$0xf0] }
 0x1aa   : > { %v5074_v42 = vor.u32 %v5962_v37, %v5073_v30  ;;  %v5109_v37 = vld [vmem:[#allocation2 + $0x180] sm:$0xf] }
 0x1ab   : > { %v5110_v19 = vor.u32 %v5971_v40, %v5109_v37  ;;  %v6056_v37 = vld [vmem:[#allocation8 + $0x1d8] sm:$0xff] }
 0x1ac   : > { %2514 = vmatmul.bf16.vlgmr.msrb.gmra.mxu3 %v5074_v42  ;;  %v5995_v42 = vld [vmem:[#allocation8 + $0x170] sm:$0xff] }
 0x1ad   : > { %2624 = vmatpush.bf16.msrb.mxu3 %v5996_v23  ;;  %v5964_v23 = vld [vmem:[#allocation2 + $0x154] sm:$0xf] }
 0x1af   : > { %2598 = vmatmul.bf16.gmra.mxu2 %v5066_v45  ;;  %v2455_v35 = vpop.f32.mrf.mxu1  ;;  %v5861_v45 = vld [vmem:[#allocation2 + $0x40] sm:$0xf0] }
 0x1b0   : > { %v7242_v46 = vpop.f32.mrf.mxu0  ;;  %v7245_v5 = vadd.f32 %v7178_v38, %v2455_v35  ;;  %v5226_v38 = vor.u32 %v5855_v54, %v5225_v56  ;;  %v5249_v35 = vld [vmem:[#allocation2 + $0x38] sm:$0xf] }
 0x1b1   : > { %v7247_v48 = vpop.f32.mrf.mxu2  ;;  %2625 = vmatpush.bf16.msrb.mxu3 %v5995_v42  ;;  %v5250_v25 = vor.u32 %v5861_v45, %v5249_v35  ;;  %v5867_v42 = vld [vmem:[#allocation2 + $0x70] sm:$0xf0]  ;;  %v5090_v45 = vor.u32 %v5964_v23, %v5087_v43  ;;  %v5273_v35 = vld [vmem:[#allocation2 + $0x68] sm:$0xf] }
 0x1b2   : > { %2494 = vmatmul.bf16.gmra.mxu1 %v5026_v41  ;;  %v5890_v41 = vld [vmem:[#allocation2 + $0x128] sm:$0xf0] }
 0x1b3   : > { %3166 = vmatmul.bf16.gmra.mxu0 %v5326_v47  ;;  %v5362_v54 = vor.u32 %v5890_v41, %v5361_v53  ;;  %v5896_v41 = vld [vmem:[#allocation2 + $0x158] sm:$0xf0]  ;;  %v6052_v43 = vld [vmem:[#allocation8 + $0x1b8] sm:$0xff] }
 0x1b5   : > { %2626 = vmatpush.bf16.msrb.mxu3 %v5994_v59 }
 0x1b7   : > { %v2457_v49 = vpop.f32.mrf.mxu1 }
 0x1b8   : > { %v7249_v52 = vpop.f32.mrf.mxu0  ;;  %v7252_v26 = vadd.f32 %v7188_v60, %v2457_v49  ;;  %v5061_v49 = vld [vmem:[#allocation2 + $0x120] sm:$0xf] }
 0x1b9   : > { %v7254_v3 = vpop.f32.mrf.mxu2  ;;  %v5062_v56 = vor.u32 %v5959_v39, %v5061_v49  ;;  %2627 = vmatpush.bf16.msrb.mxu3 %v5993_v58  ;;  %v5385_v39 = vld [vmem:[#allocation2 + $0x150] sm:$0xf] }
 0x1bc   : > { %2519 = vmatmul.bf16.gmra.mxu3 %v5086_v57 }
 0x1bd   : > { %2628 = vmatpush.bf16.msrb.mxu3 %v5992_v7  ;;  %v5859_v7 = vld [vmem:[#allocation2 + $0x34] sm:$0xf] }
 0x1bf   : > { %3299 = vmatmul.bf16.vlgmr.msrb.gmra.mxu2 %v5226_v38  ;;  %v2460_v62 = vpop.f32.mrf.mxu1 }
 0x1c0   : > { %v7256_v29 = vpop.f32.mrf.mxu0  ;;  %v7259_v60 = vadd.f32 %v7198_v17, %v2460_v62  ;;  %v5237_v17 = vld [vmem:[#allocation2 + $0x20] sm:$0xf] }
 0x1c1   : > { %v7263_v13 = vpop.f32.mrf.mxu2  ;;  %v5238_v1 = vor.u32 %v5858_v0, %v5237_v17 }
 0x1c2   : > { %2499 = vmatmul.bf16.gmra.mxu1 %v5038_v2  ;;  %v5864_v2 = vld [vmem:[#allocation2 + $0x58] sm:$0xf0] }
 0x1c3   : > { %3171 = vmatmul.bf16.gmra.mxu0 %v5338_v27  ;;  %v5078_v27 = vor.u32 %v5961_v50, %v5075_v28  ;;  %v5262_v0 = vor.u32 %v5864_v2, %v5261_v24  ;;  %v5990_v50 = vld [vmem:[#allocation8 + $0x148] sm:$0xff]  ;;  %v5967_v2 = vld [vmem:[#allocation2 + $0x16c] sm:$0xf]  ;;  %v5989_v24 = vld [vmem:[#allocation8 + $0x140] sm:$0xff] }
 0x1c7   : > { %v2462_v34 = vpop.f32.mrf.mxu1 }
 0x1c8   : > { %v7261_v4 = vpop.f32.mrf.mxu0  ;;  %v7266_v20 = vadd.f32 %v7213_v61, %v2462_v34  ;;  %v5050_v61 = vor.u32 %v5956_v18, %v5049_v32  ;;  %v5853_v34 = vld [vmem:[#allocation2 + $0x4] sm:$0xf]  ;;  %v6058_v32 = vld [vmem:[#allocation8 + $0x1e8] sm:$0xff] }
 0x1c9   : > { %v7273_v44 = vpop.f32.mrf.mxu2  ;;  %v5222_v17 = vor.u32 %v5853_v34, %v5219_v10  ;;  %3985 = vmatpush.bf16.msra.mxu0 %v6058_v32 }
 0x1cc   : > { %2524 = vmatmul.bf16.gmra.mxu3 %v5098_v55  ;;  %v5373_v55 = vld [vmem:[#allocation2 + $0x138] sm:$0xf] }
 0x1cf   : > { %3304 = vmatmul.bf16.gmra.mxu2 %v5238_v1  ;;  %v2465_v31 = vpop.f32.mrf.mxu1 }
 0x1d0   : > { %v7268_v11 = vpop.f32.mrf.mxu0  ;;  %v7271_v36 = vadd.f32 %v7236_v63, %v2465_v31 }
 0x1d1   : > { %v7280_v33 = vpop.f32.mrf.mxu2 }
 0x1d2   : > { %2504 = vmatmul.bf16.gmra.mxu1 %v5050_v61  ;;  %v6057_v61 = vld [vmem:[#allocation8 + $0x1e0] sm:$0xff] }
 0x1d3   : > { %3176 = vmatmul.bf16.gmra.mxu0 %v5350_v6 }
 0x1d4   : > { %3986 = vmatpush.bf16.msra.mxu0 %v6057_v61 }
 0x1d7   : > { %v2467_v15 = vpop.f32.mrf.mxu1 }
 0x1d8   : > { %v7275_v30 = vpop.f32.mrf.mxu0  ;;  %v7278_v63 = vadd.f32 %v7240_v9, %v2467_v15  ;;  %3987 = vmatpush.bf16.msra.mxu0 %v6056_v37 }
 0x1d9   : > { %v7287_v57 = vpop.f32.mrf.mxu2 }
 0x1dc   : > { %2529 = vmatmul.bf16.gmra.mxu3 %v5110_v19  ;;  %v6055_v19 = vld [vmem:[#allocation8 + $0x1d0] sm:$0xff] }
 0x1dd   : > { %3988 = vmatpush.bf16.msra.mxu0 %v6055_v19 }
 0x1df   : > { %3309 = vmatmul.bf16.gmra.mxu2 %v5250_v25  ;;  %v2470_v47 = vpop.f32.mrf.mxu1  ;;  %v5274_v25 = vor.u32 %v5867_v42, %v5273_v35  ;;  %v5111_v42 = vld [vmem:[#allocation2 + $0x18c] sm:$0xf0]  ;;  %v5873_v35 = vld [vmem:[#allocation2 + $0xa0] sm:$0xf0] }
 0x1e0   : > { %v7283_v21 = vadd.f32 %v7247_v48, %v2470_v47  ;;  %v7285_v9 = vpop.f32.mrf.mxu0  ;;  %v5231_v47 = vld [vmem:[#allocation2 + $0x24] sm:$0xf0] }
 0x1e1   : > { %v7294_v18 = vpop.f32.mrf.mxu2 }
 0x1e2   : > { %2509 = vmatmul.bf16.gmra.mxu1 %v5062_v56 }
 0x1e3   : > { %3181 = vmatmul.bf16.gmra.mxu0 %v5362_v54  ;;  %v5386_v54 = vor.u32 %v5896_v41, %v5385_v39  ;;  %v6068_v39 = vld [vmem:[#allocation8 + $0x238] sm:$0xff] }
 0x1e4   : > { %4072 = vmatpush.bf16.msra.mxu1 %v6068_v39 }
 0x1e7   : > { %v2472_v38 = vpop.f32.mrf.mxu1 }
 0x1e8   : > { %v7290_v62 = vadd.f32 %v7254_v3, %v2472_v38  ;;  %v7292_v48 = vpop.f32.mrf.mxu0  ;;  %v5893_v3 = vld [vmem:[#allocation2 + $0x140] sm:$0xf0]  ;;  %v6054_v38 = vld [vmem:[#allocation8 + $0x1c8] sm:$0xff] }
 0x1e9   : > { %v5374_v31 = vor.u32 %v5893_v3, %v5373_v55  ;;  %v2576_v40 = vpop.f32.mrf.mxu2  ;;  %3989 = vmatpush.bf16.msra.mxu0 %v6054_v38  ;;  %v5243_v3 = vld [vmem:[#allocation2 + $0x3c] sm:$0xf0]  ;;  %v5997_v38 = vld [vmem:[#allocation2 + $0x34] sm:$0xf] }
 0x1ec   : > { %2603 = vmatmul.bf16.vlgmr.msra.gmra.mxu3 %v5078_v27  ;;  %v5099_v27 = vld [vmem:[#allocation2 + $0x174] sm:$0xf0] }
 0x1ed   : > { %3990 = vmatpush.bf16.msra.mxu0 %v6053_v51  ;;  %v5102_v16 = vor.u32 %v5967_v2, %v5099_v27 }
 0x1ef   : > { %3314 = vmatmul.bf16.gmra.mxu2 %v5262_v0  ;;  %v2475_v1 = vpop.f32.mrf.mxu1  ;;  %v5285_v0 = vld [vmem:[#allocation2 + $0x80] sm:$0xf] }
 0x1f0   : > { %v7297_v14 = vadd.f32 %v7263_v13, %v2475_v1  ;;  %v7299_v6 = vpop.f32.mrf.mxu0  ;;  %v5991_v13 = vld [vmem:[#allocation8 + $0x150] sm:$0xff]  ;;  %v5899_v1 = vld [vmem:[#allocation2 + $0x170] sm:$0xf0] }
 0x1f1   : > { %2629 = vmatpush.bf16.msrb.mxu3 %v5991_v13  ;;  %v2579_v28 = vpop.f32.mrf.mxu2  ;;  %v5970_v13 = vld [vmem:[#allocation2 + $0x184] sm:$0xf] }
 0x1f2   : > { %3210 = vmatmul.bf16.vlgmr.msrb.gmra.mxu1 %v5222_v17  ;;  %v5397_v17 = vld [vmem:[#allocation2 + $0x168] sm:$0xf] }
 0x1f3   : > { %3186 = vmatmul.bf16.gmra.mxu0 %v5374_v31 }
 0x1f5   : > { %2630 = vmatpush.bf16.msrb.mxu3 %v5990_v50 }
 0x1f7   : > { %v2477_v12 = vpop.f32.mrf.mxu1 }
 0x1f8   : > { %v7302_v15 = vadd.f32 %v7273_v44, %v2477_v12  ;;  %v7304_v49 = vpop.f32.mrf.mxu0  ;;  %v5856_v44 = vld [vmem:[#allocation2 + $0x1c] sm:$0xf]  ;;  %v5246_v12 = vor.u32 %v5859_v7, %v5243_v3 }
 0x1f9   : > { %v5234_v59 = vor.u32 %v5856_v44, %v5231_v47  ;;  %2631 = vmatpush.bf16.msrb.mxu3 %v5989_v24  ;;  %v2581_v31 = vpop.f32.mrf.mxu2  ;;  %v5507_v44 = vld [vmem:[#allocation2 + $0x3c] sm:$0xf0] }
 0x1fa   : > { %v4937_v24 = vld [vmem:[#allocation2 + $0x20] sm:$0xf] }
 0x1fc   : > { %2608 = vmatmul.bf16.gmra.mxu3 %v5090_v45 }
 0x1fd   : > { %3894 = vmatpush.bf16.msra.mxu3 %v6052_v43  ;;  %v6000_v43 = vld [vmem:[#allocation2 + $0x4c] sm:$0xf] }
 0x1ff   : > { %3319 = vmatmul.bf16.gmra.mxu2 %v5274_v25  ;;  %v2480_v53 = vpop.f32.mrf.mxu1  ;;  %v5114_v25 = vor.u32 %v5970_v13, %v5111_v42 }
 0x200   : > { %v7307_v56 = vadd.f32 %v7280_v33, %v2480_v53  ;;  %v7309_v34 = vpop.f32.mrf.mxu0  ;;  %v5870_v33 = vld [vmem:[#allocation2 + $0x88] sm:$0xf0]  ;;  %v5255_v53 = vld [vmem:[#allocation2 + $0x54] sm:$0xf0] }
 0x201   : > { %v5286_v55 = vor.u32 %v5870_v33, %v5285_v0  ;;  %v2584_v45 = vpop.f32.mrf.mxu2  ;;  %v5927_v33 = vld [vmem:[#allocation2 + $0x28] sm:$0xf0]  ;;  %v5876_v0 = vld [vmem:[#allocation2 + $0xb8] sm:$0xf0] }
 0x202   : > { %3215 = vmatmul.bf16.gmra.mxu1 %v5234_v59  ;;  %v5862_v59 = vld [vmem:[#allocation2 + $0x4c] sm:$0xf] }
 0x203   : > { %3191 = vmatmul.bf16.gmra.mxu0 %v5386_v54  ;;  %v5258_v51 = vor.u32 %v5862_v59, %v5255_v53  ;;  %v5879_v59 = vld [vmem:[#allocation2 + $0xd0] sm:$0xf0] }
 0x207   : > { %v2482_v58 = vpop.f32.mrf.mxu1 }
 0x208   : > { %v7312_v10 = vadd.f32 %v7287_v57, %v2482_v58  ;;  %v5398_v57 = vor.u32 %v5899_v1, %v5397_v17  ;;  %v7317_v23 = vpop.f32.mrf.mxu0  ;;  %v5309_v1 = vld [vmem:[#allocation2 + $0xb0] sm:$0xf] }
 0x209   : > { %v2586_v58 = vpop.f32.mrf.mxu2  ;;  %v5310_v3 = vor.u32 %v5876_v0, %v5309_v1  ;;  %v6003_v1 = vld [vmem:[#allocation2 + $0x64] sm:$0xf] }
 0x20c   : > { %2613 = vmatmul.bf16.gmra.mxu3 %v5102_v16 }
 0x20f   : > { %3324 = vmatmul.bf16.gmra.mxu2 %v5286_v55  ;;  %v2485_v32 = vpop.f32.mrf.mxu1  ;;  %v4938_v55 = vor.u32 %v5927_v33, %v4937_v24  ;;  %v5531_v33 = vld [vmem:[#allocation2 + $0x6c] sm:$0xf0] }
 0x210   : > { %v7315_v61 = vadd.f32 %v7294_v18, %v2485_v32  ;;  %v7321_v41 = vpop.f32.mrf.mxu0  ;;  %v5297_v18 = vld [vmem:[#allocation2 + $0x98] sm:$0xf] }
 0x211   : > { %v5298_v47 = vor.u32 %v5873_v35, %v5297_v18  ;;  %v2589_v17 = vpop.f32.mrf.mxu2  ;;  %v5519_v32 = vld [vmem:[#allocation2 + $0x54] sm:$0xf0]  ;;  %v6051_v35 = vld [vmem:[#allocation8 + $0x1b0] sm:$0xff] }
 0x212   : > { %3220 = vmatmul.bf16.gmra.mxu1 %v5246_v12  ;;  %v5865_v12 = vld [vmem:[#allocation2 + $0x64] sm:$0xf]  ;;  %v5522_v42 = vor.u32 %v6000_v43, %v5519_v32  ;;  %3895 = vmatpush.bf16.msra.mxu3 %v6051_v35  ;;  %v5534_v32 = vor.u32 %v6003_v1, %v5531_v33  ;;  %v4961_v35 = vld [vmem:[#allocation2 + $0x50] sm:$0xf]  ;;  %v5871_v33 = vld [vmem:[#allocation2 + $0x94] sm:$0xf] }
 0x213   : > { %3196 = vmatmul.bf16.gmra.mxu0 %v5398_v57 }
 0x217   : > { %v2487_v37 = vpop.f32.mrf.mxu1 }
 0x218   : > { %v7319_v19 = vadd.f32 %v2576_v40, %v2487_v37  ;;  %v5510_v40 = vor.u32 %v5997_v38, %v5507_v44  ;;  %v7325_v2 = vpop.f32.mrf.mxu0  ;;  %v4949_v44 = vld [vmem:[#allocation2 + $0x38] sm:$0xf] }
 0x21c   : > { %2618 = vmatmul.bf16.gmra.mxu3 %v5114_v25  ;;  %v2591_v25 = vpop.f32.mrf.mxu2 }
 0x21f   : > { %3329 = vmatmul.bf16.gmra.mxu2 %v5298_v47  ;;  %v2490_v54 = vpop.f32.mrf.mxu1  ;;  %v5930_v47 = vld [vmem:[#allocation2 + $0x40] sm:$0xf0] }
 0x220   : > { %v7323_v50 = vadd.f32 %v2579_v28, %v2490_v54  ;;  %v5267_v28 = vld [vmem:[#allocation2 + $0x6c] sm:$0xf0]  ;;  %v7331_v37 = vpop.f32.mrf.mxu0  ;;  %v4950_v38 = vor.u32 %v5930_v47, %v4949_v44  ;;  %v5882_v47 = vld [vmem:[#allocation2 + $0xe8] sm:$0xf0] }
 0x222   : > { %3225 = vmatmul.bf16.gmra.mxu1 %v5258_v51  ;;  %v5321_v51 = vld [vmem:[#allocation2 + $0xc8] sm:$0xf] }
 0x223   : > { %3991 = vmatmul.bf16.vlgmr.msra.gmra.mxu0 %v5510_v40  ;;  %v5322_v40 = vor.u32 %v5879_v59, %v5321_v51  ;;  %v5333_v59 = vld [vmem:[#allocation2 + $0xe0] sm:$0xf] }
 0x227   : > { %v2492_v27 = vpop.f32.mrf.mxu1 }
 0x228   : > { %v7327_v16 = vadd.f32 %v2581_v31, %v2492_v27  ;;  %v5270_v31 = vor.u32 %v5865_v12, %v5267_v28  ;;  %v7339_v54 = vpop.f32.mrf.mxu0  ;;  %v5279_v27 = vld [vmem:[#allocation2 + $0x84] sm:$0xf0] }
 0x22c   : > { %2632 = vmatmul.bf16.vlgmr.msrb.gmra.mxu3 %v4938_v55  ;;  %v5868_v55 = vld [vmem:[#allocation2 + $0x7c] sm:$0xf] }
 0x22d   : > { %v5282_v28 = vor.u32 %v5868_v55, %v5279_v27 }
 0x22f   : > { %3334 = vmatmul.bf16.gmra.mxu2 %v5310_v3  ;;  %v2495_v7 = vpop.f32.mrf.mxu1  ;;  %v7329_v57 = vpop.f32.mrf.mxu3 }
 0x230   : > { %v7333_v13 = vadd.f32 %v2584_v45, %v2495_v7  ;;  %v6067_v45 = vld [vmem:[#allocation8 + $0x230] sm:$0xff]  ;;  %v7345_v7 = vpop.f32.mrf.mxu0 }
 0x231   : > { %4073 = vmatpush.bf16.msra.mxu1 %v6067_v45  ;;  %8133 = vst [vmem:[#allocation17_spill] sm:$0xff] %v7345_v7  ;;  %v5543_v45 = vld [vmem:[#allocation2 + $0x84] sm:$0xf0] }
 0x232   : > { %3230 = vmatmul.bf16.gmra.mxu1 %v5270_v31  ;;  %v5933_v31 = vld [vmem:[#allocation2 + $0x58] sm:$0xf0] }
 0x233   : > { %3996 = vmatmul.bf16.gmra.mxu0 %v5522_v42  ;;  %v4962_v44 = vor.u32 %v5933_v31, %v4961_v35  ;;  %v5936_v35 = vld [vmem:[#allocation2 + $0x70] sm:$0xf0] }
 0x237   : > { %v2497_v39 = vpop.f32.mrf.mxu1  ;;  %v7335_v18 = vpop.f32.mrf.mxu3 }
 0x238   : > { %v7337_v53 = vadd.f32 %v2586_v58, %v2497_v39  ;;  %v2594_v58 = vpop.f32.mrf.mxu2  ;;  %v7351_v51 = vpop.f32.mrf.mxu0 }
 0x239   : > { %8135 = vst [vmem:[#allocation19_spill] sm:$0xff] %v7351_v51 }
 0x23c   : > { %2637 = vmatmul.bf16.gmra.mxu3 %v4950_v38  ;;  %v5291_v38 = vld [vmem:[#allocation2 + $0x9c] sm:$0xf0] }
 0x23f   : > { %3339 = vmatmul.bf16.gmra.mxu2 %v5322_v40  ;;  %v2500_v24 = vpop.f32.mrf.mxu1  ;;  %v7341_v0 = vpop.f32.mrf.mxu3 }
 0x240   : > { %v7343_v3 = vadd.f32 %v2589_v17, %v2500_v24  ;;  %v2596_v39 = vpop.f32.mrf.mxu2  ;;  %v5334_v17 = vor.u32 %v5882_v47, %v5333_v59  ;;  %v6006_v24 = vld [vmem:[#allocation2 + $0x7c] sm:$0xf]  ;;  %v7359_v47 = vpop.f32.mrf.mxu0  ;;  %v4973_v59 = vld [vmem:[#allocation2 + $0x68] sm:$0xf] }
 0x241   : > { %v5546_v1 = vor.u32 %v6006_v24, %v5543_v45  ;;  %8137 = vst [vmem:[#allocation21_spill] sm:$0xff] %v7359_v47  ;;  %v4974_v51 = vor.u32 %v5936_v35, %v4973_v59  ;;  %v5303_v45 = vld [vmem:[#allocation2 + $0xb4] sm:$0xf0]  ;;  %v5939_v59 = vld [vmem:[#allocation2 + $0x88] sm:$0xf0] }
 0x242   : > { %3235 = vmatmul.bf16.gmra.mxu1 %v5282_v28  ;;  %v6050_v28 = vld [vmem:[#allocation8 + $0x1a8] sm:$0xff] }
 0x243   : > { %4001 = vmatmul.bf16.gmra.mxu0 %v5534_v32  ;;  %3896 = vmatpush.bf16.msra.mxu3 %v6050_v28  ;;  %v5874_v28 = vld [vmem:[#allocation2 + $0xac] sm:$0xf] }
 0x247   : > { %v2502_v12 = vpop.f32.mrf.mxu1  ;;  %v7347_v43 = vpop.f32.mrf.mxu3 }
 0x248   : > { %v7349_v42 = vadd.f32 %v2591_v25, %v2502_v12  ;;  %v5294_v25 = vor.u32 %v5871_v33, %v5291_v38  ;;  %v2599_v32 = vpop.f32.mrf.mxu2  ;;  %v5555_v33 = vld [vmem:[#allocation2 + $0x9c] sm:$0xf0] }
 0x24a   : > { %8134 = vst [vmem:[#allocation18_spill] sm:$0xff] %v7349_v42 }
 0x24c   : > { %2642 = vmatmul.bf16.gmra.mxu3 %v4962_v44 }
 0x24f   : > { %3344 = vmatmul.bf16.gmra.mxu2 %v5334_v17  ;;  %v2505_v40 = vpop.f32.mrf.mxu1  ;;  %v7353_v27 = vpop.f32.mrf.mxu3  ;;  %v5885_v17 = vld [vmem:[#allocation2 + $0x100] sm:$0xf0] }
 0x250   : > { %v7355_v55 = vadd.f32 %v2594_v58, %v2505_v40  ;;  %v6066_v58 = vld [vmem:[#allocation8 + $0x228] sm:$0xff]  ;;  %v2601_v24 = vpop.f32.mrf.mxu2 }
 0x251   : > { %v5345_v40 = vld [vmem:[#allocation2 + $0xf8] sm:$0xf]  ;;  %4074 = vmatpush.bf16.msra.mxu1 %v6066_v58 }
 0x252   : > { %8136 = vst [vmem:[#allocation20_spill] sm:$0xff] %v7355_v55  ;;  %3240 = vmatmul.bf16.gmra.mxu1 %v5294_v25  ;;  %v5346_v38 = vor.u32 %v5885_v17, %v5345_v40  ;;  %v6009_v55 = vld [vmem:[#allocation2 + $0x94] sm:$0xf]  ;;  %v4985_v40 = vld [vmem:[#allocation2 + $0x80] sm:$0xf] }
 0x253   : > { %4006 = vmatmul.bf16.gmra.mxu0 %v5546_v1  ;;  %v4986_v42 = vor.u32 %v5939_v59, %v4985_v40  ;;  %v6049_v59 = vld [vmem:[#allocation8 + $0x1a0] sm:$0xff] }
 0x254   : > { %3897 = vmatpush.bf16.msra.mxu3 %v6049_v59 }
 0x257   : > { %v2507_v12 = vpop.f32.mrf.mxu1  ;;  %v7357_v31 = vpop.f32.mrf.mxu3 }
 0x258   : > { %v7361_v44 = vadd.f32 %v2596_v39, %v2507_v12  ;;  %v5306_v39 = vor.u32 %v5874_v28, %v5303_v45  ;;  %v5558_v12 = vor.u32 %v6009_v55, %v5555_v33  ;;  %v7371_v17 = vpop.f32.mrf.mxu2  ;;  %v5315_v45 = vld [vmem:[#allocation2 + $0xcc] sm:$0xf0]  ;;  %v5567_v33 = vld [vmem:[#allocation2 + $0xb4] sm:$0xf0] }
 0x259   : > { %8140 = vst [vmem:[#allocation24_spill] sm:$0xff] %v7371_v17 }
 0x25a   : > { %8138 = vst [vmem:[#allocation22_spill] sm:$0xff] %v7361_v44  ;;  %v7367_v44 = vpop.f32.mrf.mxu0 }
 0x25c   : > { %2647 = vmatmul.bf16.gmra.mxu3 %v4974_v51 }
 0x25f   : > { %3349 = vmatmul.bf16.gmra.mxu2 %v5346_v38  ;;  %v2510_v25 = vpop.f32.mrf.mxu1  ;;  %v7363_v1 = vpop.f32.mrf.mxu3  ;;  %v5888_v38 = vld [vmem:[#allocation2 + $0x118] sm:$0xf0] }
 0x260   : > { %v7365_v47 = vadd.f32 %v2599_v32, %v2510_v25  ;;  %v5357_v32 = vld [vmem:[#allocation2 + $0x110] sm:$0xf] }
 0x261   : > { %v5358_v55 = vor.u32 %v5888_v38, %v5357_v32  ;;  %v5942_v32 = vld [vmem:[#allocation2 + $0xa0] sm:$0xf0] }
 0x262   : > { %8139 = vst [vmem:[#allocation23_spill] sm:$0xff] %v7365_v47  ;;  %3245 = vmatmul.bf16.gmra.mxu1 %v5306_v39  ;;  %v7375_v7 = vpop.f32.mrf.mxu0  ;;  %v5877_v39 = vld [vmem:[#allocation2 + $0xc4] sm:$0xf]  ;;  %v5894_v47 = vld [vmem:[#allocation2 + $0x148] sm:$0xf0] }
 0x263   : > { %4011 = vmatmul.bf16.gmra.mxu0 %v5558_v12  ;;  %8142 = vst [vmem:[#allocation26_spill] sm:$0xff] %v7375_v7  ;;  %v6012_v12 = vld [vmem:[#allocation2 + $0xac] sm:$0xf]  ;;  %v4997_v7 = vld [vmem:[#allocation2 + $0x98] sm:$0xf] }
 0x267   : > { %v2512_v51 = vpop.f32.mrf.mxu1  ;;  %v7369_v35 = vpop.f32.mrf.mxu3 }
 0x268   : > { %v7373_v58 = vadd.f32 %v2601_v24, %v2512_v51  ;;  %v5318_v24 = vor.u32 %v5877_v39, %v5315_v45  ;;  %v5570_v51 = vor.u32 %v6012_v12, %v5567_v33  ;;  %v4998_v45 = vor.u32 %v5942_v32, %v4997_v7  ;;  %v6065_v33 = vld [vmem:[#allocation8 + $0x220] sm:$0xff] }
 0x269   : > { %4075 = vmatpush.bf16.msra.mxu1 %v6065_v33  ;;  %v5945_v33 = vld [vmem:[#allocation2 + $0xb8] sm:$0xf0] }
 0x26a   : > { %8141 = vst [vmem:[#allocation25_spill] sm:$0xff] %v7373_v58  ;;  %v7382_v58 = vpop.f32.mrf.mxu2 }
 0x26b   : > { %8144 = vst [vmem:[#allocation28_spill] sm:$0xff] %v7382_v58 }
 0x26c   : > { %2652 = vmatmul.bf16.gmra.mxu3 %v4986_v42  ;;  %v7384_v42 = vpop.f32.mrf.mxu0 }
 0x26d   : > { %8145 = vst [vmem:[#allocation29_spill] sm:$0xff] %v7384_v42  ;;  %v6015_v42 = vld [vmem:[#allocation2 + $0xc4] sm:$0xf] }
 0x26f   : > { %3354 = vmatmul.bf16.gmra.mxu2 %v5358_v55  ;;  %v2604_v25 = vpop.f32.mrf.mxu3  ;;  %v7377_v28 = vpop.f32.mrf.mxu1 }
 0x270   : > { %v7380_v17 = vadd.f32 %v2604_v25, %v7329_v57  ;;  %v5369_v57 = vld [vmem:[#allocation2 + $0x128] sm:$0xf]  ;;  %v5891_v25 = vld [vmem:[#allocation2 + $0x130] sm:$0xf0] }
 0x271   : > { %v5370_v12 = vor.u32 %v5891_v25, %v5369_v57 }
 0x272   : > { %8143 = vst [vmem:[#allocation27_spill] sm:$0xff] %v7380_v17  ;;  %3250 = vmatmul.bf16.gmra.mxu1 %v5318_v24  ;;  %v7391_v39 = vpop.f32.mrf.mxu2  ;;  %v5327_v24 = vld [vmem:[#allocation2 + $0xe4] sm:$0xf0]  ;;  %v5880_v17 = vld [vmem:[#allocation2 + $0xdc] sm:$0xf] }
 0x273   : > { %4016 = vmatmul.bf16.gmra.mxu0 %v5570_v51  ;;  %8147 = vst [vmem:[#allocation31_spill] sm:$0xff] %v7391_v39  ;;  %v5579_v51 = vld [vmem:[#allocation2 + $0xcc] sm:$0xf0]  ;;  %v5330_v7 = vor.u32 %v5880_v17, %v5327_v24  ;;  %v5591_v24 = vld [vmem:[#allocation2 + $0xe4] sm:$0xf0] }
 0x274   : > { %v5582_v32 = vor.u32 %v6015_v42, %v5579_v51  ;;  %v5009_v39 = vld [vmem:[#allocation2 + $0xb0] sm:$0xf]  ;;  %v5339_v42 = vld [vmem:[#allocation2 + $0xfc] sm:$0xf0] }
 0x277   : > { %v2606_v40 = vpop.f32.mrf.mxu3  ;;  %v7386_v38 = vpop.f32.mrf.mxu1 }
 0x278   : > { %v7389_v55 = vadd.f32 %v2606_v40, %v7335_v18  ;;  %v7395_v18 = vpop.f32.mrf.mxu0 }
 0x279   : > { %8148 = vst [vmem:[#allocation32_spill] sm:$0xff] %v7395_v18  ;;  %v5381_v18 = vld [vmem:[#allocation2 + $0x140] sm:$0xf] }
 0x27a   : > { %8146 = vst [vmem:[#allocation30_spill] sm:$0xff] %v7389_v55  ;;  %v5382_v17 = vor.u32 %v5894_v47, %v5381_v18 }
 0x27c   : > { %2657 = vmatmul.bf16.gmra.mxu3 %v4998_v45  ;;  %v7400_v45 = vpop.f32.mrf.mxu2 }
 0x27d   : > { %8150 = vst [vmem:[#allocation34_spill] sm:$0xff] %v7400_v45 }
 0x27f   : > { %3359 = vmatmul.bf16.gmra.mxu2 %v5370_v12  ;;  %v2609_v59 = vpop.f32.mrf.mxu3  ;;  %v7393_v58 = vpop.f32.mrf.mxu1 }
 0x280   : > { %v7398_v40 = vadd.f32 %v2609_v59, %v7341_v0  ;;  %v7407_v55 = vpop.f32.mrf.mxu0  ;;  %v5010_v0 = vor.u32 %v5945_v33, %v5009_v39  ;;  %v6048_v39 = vld [vmem:[#allocation8 + $0x198] sm:$0xff] }
 0x281   : > { %8152 = vst [vmem:[#allocation36_spill] sm:$0xff] %v7407_v55  ;;  %3898 = vmatpush.bf16.msra.mxu3 %v6048_v39  ;;  %v5900_v55 = vld [vmem:[#allocation2 + $0x178] sm:$0xf0] }
 0x282   : > { %8149 = vst [vmem:[#allocation33_spill] sm:$0xff] %v7398_v40  ;;  %3255 = vmatmul.bf16.gmra.mxu1 %v5330_v7  ;;  %v5883_v7 = vld [vmem:[#allocation2 + $0xf4] sm:$0xf]  ;;  %v5021_v40 = vld [vmem:[#allocation2 + $0xc8] sm:$0xf] }
 0x283   : > { %4021 = vmatmul.bf16.gmra.mxu0 %v5582_v32  ;;  %v6018_v32 = vld [vmem:[#allocation2 + $0xdc] sm:$0xf] }
 0x284   : > { %v7411_v45 = vpop.f32.mrf.mxu2 }
 0x285   : > { %8153 = vst [vmem:[#allocation37_spill] sm:$0xff] %v7411_v45 }
 0x287   : > { %v2611_v57 = vpop.f32.mrf.mxu3  ;;  %v7402_v25 = vpop.f32.mrf.mxu1 }
 0x288   : > { %v7405_v12 = vadd.f32 %v2611_v57, %v7347_v43  ;;  %v5342_v57 = vor.u32 %v5883_v7, %v5339_v42  ;;  %v7416_v33 = vpop.f32.mrf.mxu0  ;;  %v5351_v7 = vld [vmem:[#allocation2 + $0x114] sm:$0xf0] }
 0x289   : > { %8155 = vst [vmem:[#allocation39_spill] sm:$0xff] %v7416_v33 }
 0x28a   : > { %8151 = vst [vmem:[#allocation35_spill] sm:$0xff] %v7405_v12  ;;  %v5594_v12 = vor.u32 %v6018_v32, %v5591_v24  ;;  %v6064_v24 = vld [vmem:[#allocation8 + $0x218] sm:$0xff]  ;;  %v5603_v32 = vld [vmem:[#allocation2 + $0xfc] sm:$0xf0] }
 0x28b   : > { %4076 = vmatpush.bf16.msra.mxu1 %v6064_v24 }
 0x28c   : > { %2662 = vmatmul.bf16.gmra.mxu3 %v5010_v0  ;;  %v5948_v0 = vld [vmem:[#allocation2 + $0xd0] sm:$0xf0]  ;;  %v7423_v45 = vpop.f32.mrf.mxu2 }
 0x28d   : > { %8157 = vst [vmem:[#allocation41_spill] sm:$0xff] %v7423_v45  ;;  %v5022_v42 = vor.u32 %v5948_v0, %v5021_v40 }
 0x28f   : > { %3364 = vmatmul.bf16.gmra.mxu2 %v5382_v17  ;;  %v2614_v51 = vpop.f32.mrf.mxu3  ;;  %v7409_v59 = vpop.f32.mrf.mxu1 }
 0x290   : > { %v7414_v43 = vadd.f32 %v2614_v51, %v7353_v27  ;;  %v5393_v27 = vld [vmem:[#allocation2 + $0x158] sm:$0xf]  ;;  %v5897_v51 = vld [vmem:[#allocation2 + $0x160] sm:$0xf0] }
 0x292   : > { %8154 = vst [vmem:[#allocation38_spill] sm:$0xff] %v7414_v43  ;;  %3260 = vmatmul.bf16.gmra.mxu1 %v5342_v57  ;;  %v7425_v57 = vpop.f32.mrf.mxu0 }
 0x293   : > { %4026 = vmatmul.bf16.gmra.mxu0 %v5594_v12  ;;  %v5394_v12 = vor.u32 %v5897_v51, %v5393_v27  ;;  %8158 = vst [vmem:[#allocation42_spill] sm:$0xff] %v7425_v57  ;;  %v5951_v51 = vld [vmem:[#allocation2 + $0xe8] sm:$0xf0]  ;;  %v5405_v57 = vld [vmem:[#allocation2 + $0x170] sm:$0xf] }
 0x294   : > { %v7432_v40 = vpop.f32.mrf.mxu2 }
 0x295   : > { %8160 = vst [vmem:[#allocation44_spill] sm:$0xff] %v7432_v40  ;;  %v5889_v40 = vld [vmem:[#allocation2 + $0x124] sm:$0xf] }
 0x297   : > { %v2616_v47 = vpop.f32.mrf.mxu3  ;;  %v7418_v18 = vpop.f32.mrf.mxu1 }
 0x298   : > { %v7421_v17 = vadd.f32 %v2616_v47, %v7357_v31  ;;  %v5886_v31 = vld [vmem:[#allocation2 + $0x10c] sm:$0xf]  ;;  %v6021_v47 = vld [vmem:[#allocation2 + $0xf4] sm:$0xf] }
 0x299   : > { %v5354_v45 = vor.u32 %v5886_v31, %v5351_v7  ;;  %v5606_v33 = vor.u32 %v6021_v47, %v5603_v32  ;;  %v5615_v7 = vld [vmem:[#allocation2 + $0x114] sm:$0xf0] }
 0x29a   : > { %8156 = vst [vmem:[#allocation40_spill] sm:$0xff] %v7421_v17 }
 0x29c   : > { %2667 = vmatmul.bf16.gmra.mxu3 %v5022_v42  ;;  %v7436_v42 = vpop.f32.mrf.mxu0  ;;  %v7441_v32 = vpop.f32.mrf.mxu2 }
 0x29d   : > { %8161 = vst [vmem:[#allocation45_spill] sm:$0xff] %v7436_v42 }
 0x29e   : > { %8163 = vst [vmem:[#allocation47_spill] sm:$0xff] %v7441_v32  ;;  %v5960_v32 = vld [vmem:[#allocation2 + $0x130] sm:$0xf0] }
 0x29f   : > { %3369 = vmatmul.bf16.gmra.mxu2 %v5394_v12  ;;  %v2619_v39 = vpop.f32.mrf.mxu3  ;;  %v7427_v43 = vpop.f32.mrf.mxu1  ;;  %v5033_v12 = vld [vmem:[#allocation2 + $0xe0] sm:$0xf] }
 0x2a0   : > { %v7430_v17 = vadd.f32 %v2619_v39, %v7363_v1  ;;  %v5034_v1 = vor.u32 %v5951_v51, %v5033_v12  ;;  %v6076_v39 = vld [vmem:[#allocation9 + $0x38] sm:$0xff] }
 0x2a1   : > { %4377 = vmatpush.bf16.msra.mxu2 %v6076_v39  ;;  %v5954_v39 = vld [vmem:[#allocation2 + $0x100] sm:$0xf0] }
 0x2a2   : > { %8159 = vst [vmem:[#allocation43_spill] sm:$0xff] %v7430_v17  ;;  %3265 = vmatmul.bf16.gmra.mxu1 %v5354_v45  ;;  %v5406_v45 = vor.u32 %v5900_v55, %v5405_v57  ;;  %v6024_v17 = vld [vmem:[#allocation2 + $0x10c] sm:$0xf]  ;;  %v6047_v55 = vld [vmem:[#allocation8 + $0x190] sm:$0xff] }
 0x2a3   : > { %4031 = vmatmul.bf16.gmra.mxu0 %v5606_v33  ;;  %v5363_v33 = vld [vmem:[#allocation2 + $0x12c] sm:$0xf0]  ;;  %3899 = vmatpush.bf16.msra.mxu3 %v6047_v55 }
 0x2a4   : > { %v7446_v42 = vpop.f32.mrf.mxu0 }
 0x2a7   : > { %v2621_v0 = vpop.f32.mrf.mxu3  ;;  %v7434_v27 = vpop.f32.mrf.mxu1 }
 0x2a8   : > { %v7439_v24 = vadd.f32 %v2621_v0, %v7369_v35  ;;  %v5366_v0 = vor.u32 %v5889_v40, %v5363_v33  ;;  %v6063_v33 = vld [vmem:[#allocation8 + $0x210] sm:$0xff] }
 0x2a9   : > { %4077 = vmatpush.bf16.msra.mxu1 %v6063_v33  ;;  %v5057_v33 = vld [vmem:[#allocation2 + $0x110] sm:$0xf] }
 0x2aa   : > { %8162 = vst [vmem:[#allocation46_spill] sm:$0xff] %v7439_v24  ;;  %v5618_v24 = vor.u32 %v6024_v17, %v5615_v7 }
 0x2ac   : > { %2672 = vmatmul.bf16.gmra.mxu3 %v5034_v1  ;;  %v7456_v7 = vpop.f32.mrf.mxu0 }
 0x2af   : > { %3374 = vmatmul.bf16.gmra.mxu2 %v5406_v45  ;;  %v2633_v31 = vpop.f32.mrf.mxu3  ;;  %v7443_v47 = vpop.f32.mrf.mxu1 }
 0x2b0   : > { %v2634_v35 = vadd.f32 %v2633_v31, %v7245_v5  ;;  %v5045_v5 = vld [vmem:[#allocation2 + $0xf8] sm:$0xf]  ;;  %v5627_v31 = vld [vmem:[#allocation2 + $0x12c] sm:$0xf0] }
 0x2b1   : > { %v5046_v40 = vor.u32 %v5954_v39, %v5045_v5 }
 0x2b2   : > { %v3123_v51 = vadd.f32 %v7220_v22, %v2634_v35  ;;  %3270 = vmatmul.bf16.gmra.mxu1 %v5366_v0 }
 0x2b3   : > { %4036 = vmatmul.bf16.gmra.mxu0 %v5618_v24  ;;  %v5375_v24 = vld [vmem:[#allocation2 + $0x144] sm:$0xf0] }
 0x2b4   : > { %v7450_v57 = vadd.f32 %v7377_v28, %v3123_v51  ;;  %v5892_v28 = vld [vmem:[#allocation2 + $0x13c] sm:$0xf]  ;;  %v6027_v51 = vld [vmem:[#allocation2 + $0x124] sm:$0xf]  ;;  %v7468_v39 = vpop.f32.mrf.mxu0 }
 0x2b5   : > { %v5378_v55 = vor.u32 %v5892_v28, %v5375_v24  ;;  %v6075_v24 = vld [vmem:[#allocation9 + $0x30] sm:$0xff] }
 0x2b6   : > { %4378 = vmatpush.bf16.msra.mxu2 %v6075_v24  ;;  %v5069_v24 = vld [vmem:[#allocation2 + $0x128] sm:$0xf] }
 0x2b7   : > { %v2635_v12 = vpop.f32.mrf.mxu3  ;;  %v7452_v1 = vpop.f32.mrf.mxu1 }
 0x2b8   : > { %v2636_v45 = vadd.f32 %v2635_v12, %v7252_v26 }
 0x2ba   : > { %v3125_v17 = vadd.f32 %v7238_v8, %v2636_v45  ;;  %v5630_v8 = vor.u32 %v6027_v51, %v5627_v31  ;;  %v6030_v31 = vld [vmem:[#allocation2 + $0x13c] sm:$0xf]  ;;  %v5639_v51 = vld [vmem:[#allocation2 + $0x144] sm:$0xf0] }
 0x2bc   : > { %v7459_v22 = vadd.f32 %v7386_v38, %v3125_v17  ;;  %2677 = vmatmul.bf16.gmra.mxu3 %v5046_v40  ;;  %v5957_v17 = vld [vmem:[#allocation2 + $0x118] sm:$0xf0] }
 0x2bd   : > { %v5058_v28 = vor.u32 %v5957_v17, %v5057_v33  ;;  %v6046_v17 = vld [vmem:[#allocation8 + $0x188] sm:$0xff]  ;;  %v6061_v33 = vld [vmem:[#allocation8 + $0x200] sm:$0xff] }
 0x2be   : > { %3900 = vmatpush.bf16.msra.mxu3 %v6046_v17 }
 0x2bf   : > { %v2638_v35 = vpop.f32.mrf.mxu3  ;;  %v7461_v0 = vpop.f32.mrf.mxu1 }
 0x2c0   : > { %v2639_v26 = vadd.f32 %v2638_v35, %v7259_v60  ;;  %v5387_v35 = vld [vmem:[#allocation2 + $0x15c] sm:$0xf0] }
 0x2c2   : > { %v3128_v12 = vadd.f32 %v7242_v46, %v2639_v26  ;;  %3275 = vmatmul.bf16.gmra.mxu1 %v5378_v55 }
 0x2c3   : > { %4041 = vmatmul.bf16.gmra.mxu0 %v5630_v8  ;;  %v7479_v8 = vpop.f32.mrf.mxu0 }
 0x2c4   : > { %v7466_v38 = vadd.f32 %v7393_v58, %v3128_v12  ;;  %v5895_v58 = vld [vmem:[#allocation2 + $0x154] sm:$0xf] }
 0x2c5   : > { %v5390_v12 = vor.u32 %v5895_v58, %v5387_v35  ;;  %v5070_v58 = vor.u32 %v5960_v32, %v5069_v24  ;;  %v5963_v24 = vld [vmem:[#allocation2 + $0x148] sm:$0xf0] }
 0x2c7   : > { %v2640_v45 = vpop.f32.mrf.mxu3  ;;  %v7470_v5 = vpop.f32.mrf.mxu1 }
 0x2c8   : > { %v2641_v40 = vadd.f32 %v2640_v45, %v7266_v20 }
 0x2ca   : > { %v3130_v60 = vadd.f32 %v7249_v52, %v2641_v40  ;;  %v5642_v52 = vor.u32 %v6030_v31, %v5639_v51  ;;  %v5898_v51 = vld [vmem:[#allocation2 + $0x16c] sm:$0xf] }
 0x2cb   : > { %v7489_v31 = vpop.f32.mrf.mxu0 }
 0x2cc   : > { %v7475_v46 = vadd.f32 %v7402_v25, %v3130_v60  ;;  %2682 = vmatmul.bf16.gmra.mxu3 %v5058_v28  ;;  %v6062_v25 = vld [vmem:[#allocation8 + $0x208] sm:$0xff] }
 0x2cd   : > { %4078 = vmatpush.bf16.msra.mxu1 %v6062_v25 }
 0x2cf   : > { %v2643_v26 = vpop.f32.mrf.mxu3  ;;  %v7477_v55 = vpop.f32.mrf.mxu1 }
 0x2d0   : > { %v2644_v20 = vadd.f32 %v2643_v26, %v7271_v36  ;;  %v5399_v26 = vld [vmem:[#allocation2 + $0x174] sm:$0xf0] }
 0x2d1   : > { %4079 = vmatpush.bf16.msra.mxu1 %v6061_v33 }
 0x2d2   : > { %v3133_v45 = vadd.f32 %v7256_v29, %v2644_v20  ;;  %3280 = vmatmul.bf16.gmra.mxu1 %v5390_v12  ;;  %v5651_v20 = vld [vmem:[#allocation2 + $0x15c] sm:$0xf0] }
 0x2d3   : > { %4046 = vmatmul.bf16.gmra.mxu0 %v5642_v52 }
 0x2d4   : > { %v7484_v40 = vadd.f32 %v7409_v59, %v3133_v45  ;;  %v6033_v59 = vld [vmem:[#allocation2 + $0x154] sm:$0xf] }
 0x2d5   : > { %v5654_v25 = vor.u32 %v6033_v59, %v5651_v20  ;;  %v6036_v59 = vld [vmem:[#allocation2 + $0x16c] sm:$0xf] }
 0x2d7   : > { %v2645_v60 = vpop.f32.mrf.mxu3  ;;  %v7486_v28 = vpop.f32.mrf.mxu1 }
 0x2d8   : > { %v2646_v36 = vadd.f32 %v2645_v60, %v7278_v63  ;;  %v5402_v63 = vor.u32 %v5898_v51, %v5399_v26  ;;  %v5081_v60 = vld [vmem:[#allocation2 + $0x140] sm:$0xf]  ;;  %v5663_v51 = vld [vmem:[#allocation2 + $0x174] sm:$0xf0] }
 0x2da   : > { %v3135_v29 = vadd.f32 %v7261_v4, %v2646_v36  ;;  %v7499_v4 = vpop.f32.mrf.mxu0 }
 0x2dc   : > { %v7493_v35 = vadd.f32 %v7418_v18, %v3135_v29  ;;  %2687 = vmatmul.bf16.gmra.mxu3 %v5070_v58  ;;  %v5082_v29 = vor.u32 %v5963_v24, %v5081_v60  ;;  %v6074_v58 = vld [vmem:[#allocation9 + $0x28] sm:$0xff] }
 0x2dd   : > { %4379 = vmatpush.bf16.msra.mxu2 %v6074_v58  ;;  %v5093_v24 = vld [vmem:[#allocation2 + $0x158] sm:$0xf] }
 0x2df   : > { %v2648_v12 = vpop.f32.mrf.mxu3  ;;  %v7495_v52 = vpop.f32.mrf.mxu1 }
 0x2e0   : > { %v2649_v45 = vadd.f32 %v2648_v12, %v7283_v21 }
 0x2e2   : > { %v3138_v17 = vadd.f32 %v7268_v11, %v2649_v45  ;;  %3285 = vmatmul.bf16.gmra.mxu1 %v5402_v63  ;;  %v7511_v26 = vpop.f32.mrf.mxu0  ;;  %v5513_v45 = vld [vmem:[#allocation2 + $0x38] sm:$0xf]  ;;  %v5666_v63 = vor.u32 %v6036_v59, %v5663_v51  ;;  %v6039_v59 = vld [vmem:[#allocation2 + $0x184] sm:$0xf]  ;;  %v6002_v51 = vld [vmem:[#allocation2 + $0x58] sm:$0xf0] }
 0x2e3   : > { %4051 = vmatmul.bf16.gmra.mxu0 %v5654_v25 }
 0x2e4   : > { %v7502_v18 = vadd.f32 %v7427_v43, %v3138_v17  ;;  %v5999_v43 = vld [vmem:[#allocation2 + $0x40] sm:$0xf0] }
 0x2e7   : > { %v2650_v32 = vpop.f32.mrf.mxu3  ;;  %v7504_v33 = vpop.f32.mrf.mxu1 }
 0x2e8   : > { %v2651_v36 = vadd.f32 %v2650_v32, %v7290_v62 }
 0x2ea   : > { %v3140_v21 = vadd.f32 %v7275_v30, %v2651_v36  ;;  %v5514_v30 = vor.u32 %v5999_v43, %v5513_v45  ;;  %v5966_v36 = vld [vmem:[#allocation2 + $0x160] sm:$0xf0]  ;;  %v5525_v45 = vld [vmem:[#allocation2 + $0x50] sm:$0xf] }
 0x2eb   : > { %v5094_v58 = vor.u32 %v5966_v36, %v5093_v24  ;;  %v5969_v24 = vld [vmem:[#allocation2 + $0x178] sm:$0xf0] }
 0x2ec   : > { %v7509_v11 = vadd.f32 %v7434_v27, %v3140_v21  ;;  %2692 = vmatmul.bf16.gmra.mxu3 %v5082_v29  ;;  %v6045_v27 = vld [vmem:[#allocation8 + $0x180] sm:$0xff]  ;;  %v7522_v21 = vpop.f32.mrf.mxu0 }
 0x2ed   : > { %3901 = vmatpush.bf16.msra.mxu3 %v6045_v27 }
 0x2ef   : > { %v2653_v20 = vpop.f32.mrf.mxu3  ;;  %v7513_v12 = vpop.f32.mrf.mxu1 }
 0x2f0   : > { %v2654_v62 = vadd.f32 %v2653_v20, %v7297_v14 }
 0x2f2   : > { %v3143_v25 = vadd.f32 %v7285_v9, %v2654_v62  ;;  %4080 = vmatmul.bf16.vlgmr.msra.gmra.mxu1 %v5514_v30  ;;  %v5526_v30 = vor.u32 %v6002_v51, %v5525_v45 }
 0x2f3   : > { %4056 = vmatmul.bf16.gmra.mxu0 %v5666_v63 }
 0x2f4   : > { %v7518_v17 = vadd.f32 %v7443_v47, %v3143_v25  ;;  %v5675_v47 = vld [vmem:[#allocation2 + $0x18c] sm:$0xf0]  ;;  %v7532_v25 = vpop.f32.mrf.mxu0 }
 0x2f5   : > { %v5678_v63 = vor.u32 %v6039_v59, %v5675_v47  ;;  %v5537_v47 = vld [vmem:[#allocation2 + $0x68] sm:$0xf] }
 0x2f7   : > { %v2655_v32 = vpop.f32.mrf.mxu3  ;;  %v7520_v60 = vpop.f32.mrf.mxu1 }
 0x2f8   : > { %v2656_v14 = vadd.f32 %v2655_v32, %v7302_v15  ;;  %v5105_v32 = vld [vmem:[#allocation2 + $0x170] sm:$0xf] }
 0x2fa   : > { %v3145_v29 = vadd.f32 %v7292_v48, %v2656_v14  ;;  %v5106_v14 = vor.u32 %v5969_v24, %v5105_v32 }
 0x2fc   : > { %v7527_v9 = vadd.f32 %v7452_v1, %v3145_v29  ;;  %2697 = vmatmul.bf16.gmra.mxu3 %v5094_v58  ;;  %v6073_v29 = vld [vmem:[#allocation9 + $0x20] sm:$0xff] }
 0x2fd   : > { %4380 = vmatpush.bf16.msra.mxu2 %v6073_v29 }
 0x2ff   : > { %v2658_v43 = vpop.f32.mrf.mxu3  ;;  %v7529_v20 = vpop.f32.mrf.mxu1 }
 0x300   : > { %v2659_v62 = vadd.f32 %v2658_v43, %v7307_v56 }
 0x302   : > { %v3148_v48 = vadd.f32 %v7299_v6, %v2659_v62  ;;  %4085 = vmatmul.bf16.gmra.mxu1 %v5526_v30  ;;  %v6005_v6 = vld [vmem:[#allocation2 + $0x70] sm:$0xf0] }
 0x303   : > { %4061 = vmatmul.bf16.gmra.mxu0 %v5678_v63  ;;  %v5538_v43 = vor.u32 %v6005_v6, %v5537_v47  ;;  %v5972_v63 = vld [vmem:[#allocation2 + $0x190] sm:$0xf0]  ;;  %v5998_v6 = vld [vmem:[#allocation2 + $0x38] sm:$0xf0]  ;;  %v5505_v47 = vld [vmem:[#allocation2 + $0x30] sm:$0xf] }
 0x304   : > { %v7536_v15 = vadd.f32 %v7461_v0, %v3148_v48 }
 0x307   : > { %v2660_v1 = vpop.f32.mrf.mxu3  ;;  %v7538_v27 = vpop.f32.mrf.mxu1 }
 0x308   : > { %v2661_v36 = vadd.f32 %v2660_v1, %v7312_v10 }
 0x30a   : > { %v3150_v56 = vadd.f32 %v7304_v49, %v2661_v36 }
 0x30c   : > { %v7543_v58 = vadd.f32 %v7470_v5, %v3150_v56  ;;  %2702 = vmatmul.bf16.gmra.mxu3 %v5106_v14  ;;  %v5117_v5 = vld [vmem:[#allocation2 + $0x188] sm:$0xf] }
 0x30d   : > { %v5118_v1 = vor.u32 %v5972_v63, %v5117_v5 }
 0x30f   : > { %v2663_v59 = vpop.f32.mrf.mxu3  ;;  %v7545_v0 = vpop.f32.mrf.mxu1 }
 0x310   : > { %v2664_v51 = vadd.f32 %v2663_v59, %v7315_v61  ;;  %v6008_v61 = vld [vmem:[#allocation2 + $0x88] sm:$0xf0] }
 0x312   : > { %v3153_v45 = vadd.f32 %v7309_v34, %v2664_v51  ;;  %4090 = vmatmul.bf16.gmra.mxu1 %v5538_v43  ;;  %v5506_v43 = vor.u32 %v5998_v6, %v5505_v47  ;;  %v6004_v47 = vld [vmem:[#allocation2 + $0x68] sm:$0xf0] }
 0x314   : > { %v7550_v49 = vadd.f32 %v7477_v55, %v3153_v45  ;;  %v5549_v55 = vld [vmem:[#allocation2 + $0x80] sm:$0xf] }
 0x315   : > { %v5550_v56 = vor.u32 %v6008_v61, %v5549_v55  ;;  %v5517_v61 = vld [vmem:[#allocation2 + $0x48] sm:$0xf] }
 0x317   : > { %v2665_v10 = vpop.f32.mrf.mxu3  ;;  %v7552_v62 = vpop.f32.mrf.mxu1 }
 0x318   : > { %v2666_v30 = vadd.f32 %v2665_v10, %v7319_v19  ;;  %v5561_v10 = vld [vmem:[#allocation2 + $0x98] sm:$0xf] }
 0x31a   : > { %v3155_v48 = vadd.f32 %v7317_v23, %v2666_v30  ;;  %v6072_v23 = vld [vmem:[#allocation9 + $0x18] sm:$0xff] }
 0x31b   : > { %4381 = vmatpush.bf16.msra.mxu2 %v6072_v23 }
 0x31c   : > { %v7557_v32 = vadd.f32 %v7486_v28, %v3155_v48  ;;  %2707 = vmatmul.bf16.gmra.mxu3 %v5118_v1 }
 0x31f   : > { %v2668_v34 = vpop.f32.mrf.mxu3  ;;  %v7559_v24 = vpop.f32.mrf.mxu1 }
 0x320   : > { %v2669_v36 = vadd.f32 %v2668_v34, %v7323_v50 }
 0x322   : > { %v3158_v14 = vadd.f32 %v7321_v41, %v2669_v36  ;;  %4095 = vmatmul.bf16.gmra.mxu1 %v5550_v56  ;;  %v6011_v41 = vld [vmem:[#allocation2 + $0xa0] sm:$0xf0] }
 0x323   : > { %v5562_v63 = vor.u32 %v6011_v41, %v5561_v10  ;;  %v5529_v41 = vld [vmem:[#allocation2 + $0x60] sm:$0xf] }
 0x324   : > { %v7564_v19 = vadd.f32 %v7495_v52, %v3158_v14 }
 0x327   : > { %v2670_v29 = vpop.f32.mrf.mxu3  ;;  %v7566_v28 = vpop.f32.mrf.mxu1 }
 0x328   : > { %v2671_v59 = vadd.f32 %v2670_v29, %v7327_v16  ;;  %v8164_v29 = vld [vmem:[#allocation17_spill] sm:$0xff] }
 0x32a   : > { %v3160_v51 = vadd.f32 %v7325_v2, %v2671_v59 }
 0x32c   : > { %v7571_v50 = vadd.f32 %v7504_v33, %v3160_v51  ;;  %3902 = vmatmul.bf16.vlgmr.msra.gmra.mxu3 %v5506_v43  ;;  %v6001_v33 = vld [vmem:[#allocation2 + $0x50] sm:$0xf0]  ;;  %v8165_v51 = vld [vmem:[#allocation18_spill] sm:$0xff] }
 0x32d   : > { %v5518_v55 = vor.u32 %v6001_v33, %v5517_v61  ;;  %v8167_v33 = vld [vmem:[#allocation20_spill] sm:$0xff] }
 0x32f   : > { %v2673_v45 = vpop.f32.mrf.mxu3  ;;  %v7573_v52 = vpop.f32.mrf.mxu1 }
 0x330   : > { %v2674_v5 = vadd.f32 %v2673_v45, %v7333_v13  ;;  %v6014_v13 = vld [vmem:[#allocation2 + $0xb8] sm:$0xf0]  ;;  %v8166_v45 = vld [vmem:[#allocation19_spill] sm:$0xff] }
 0x332   : > { %v3163_v30 = vadd.f32 %v7331_v37, %v2674_v5  ;;  %4100 = vmatmul.bf16.gmra.mxu1 %v5562_v63  ;;  %v5530_v5 = vor.u32 %v6004_v47, %v5529_v41  ;;  %v6017_v63 = vld [vmem:[#allocation2 + $0xd0] sm:$0xf0]  ;;  %v8170_v41 = vld [vmem:[#allocation23_spill] sm:$0xff] }
 0x334   : > { %v7578_v16 = vadd.f32 %v7513_v12, %v3163_v30  ;;  %v5573_v12 = vld [vmem:[#allocation2 + $0xb0] sm:$0xf] }
 0x335   : > { %v5574_v23 = vor.u32 %v6014_v13, %v5573_v12 }
 0x337   : > { %v2675_v2 = vpop.f32.mrf.mxu3  ;;  %v7580_v48 = vpop.f32.mrf.mxu1 }
 0x338   : > { %v2676_v1 = vadd.f32 %v2675_v2, %v7337_v53  ;;  %v5585_v2 = vld [vmem:[#allocation2 + $0xc8] sm:$0xf] }
 0x339   : > { %v5586_v61 = vor.u32 %v6017_v63, %v5585_v2  ;;  %v8171_v63 = vld [vmem:[#allocation26_spill] sm:$0xff] }
 0x33a   : > { %v3165_v34 = vadd.f32 %v7339_v54, %v2676_v1  ;;  %v6071_v54 = vld [vmem:[#allocation9 + $0x10] sm:$0xff]  ;;  %v6070_v2 = vld [vmem:[#allocation9 + $0x8] sm:$0xff] }
 0x33b   : > { %4382 = vmatpush.bf16.msra.mxu2 %v6071_v54 }
 0x33c   : > { %v7585_v36 = vadd.f32 %v7520_v60, %v3165_v34  ;;  %3907 = vmatmul.bf16.gmra.mxu3 %v5518_v55  ;;  %v8168_v34 = vld [vmem:[#allocation21_spill] sm:$0xff] }
 0x33f   : > { %v2678_v37 = vpop.f32.mrf.mxu3  ;;  %v7587_v56 = vpop.f32.mrf.mxu1  ;;  %4383 = vmatpush.bf16.msra.mxu2 %v6070_v2 }
 0x340   : > { %v2679_v14 = vadd.f32 %v2678_v37, %v7343_v3 }
 0x342   : > { %v3168_v6 = vadd.f32 %v8164_v29, %v2679_v14  ;;  %4105 = vmatmul.bf16.gmra.mxu1 %v5574_v23  ;;  %v8169_v14 = vld [vmem:[#allocation22_spill] sm:$0xff] }
 0x343   : > { %v5541_v29 = vld [vmem:[#allocation2 + $0x78] sm:$0xf] }
 0x344   : > { %v7592_v53 = vadd.f32 %v7529_v20, %v3168_v6 }
 0x347   : > { %v2680_v59 = vpop.f32.mrf.mxu3  ;;  %v7594_v60 = vpop.f32.mrf.mxu1 }
 0x348   : > { %v2681_v43 = vadd.f32 %v2680_v59, %v8165_v51  ;;  %v7612_v59 = vpop.f32.mrf.mxu2  ;;  %v6020_v51 = vld [vmem:[#allocation2 + $0xe8] sm:$0xf0] }
 0x34a   : > { %v3170_v10 = vadd.f32 %v8166_v45, %v2681_v43 }
 0x34c   : > { %v7599_v3 = vadd.f32 %v7538_v27, %v3170_v10  ;;  %3912 = vmatmul.bf16.gmra.mxu3 %v5530_v5  ;;  %v6007_v27 = vld [vmem:[#allocation2 + $0x80] sm:$0xf0] }
 0x34d   : > { %v5542_v54 = vor.u32 %v6007_v27, %v5541_v29 }
 0x34f   : > { %v2683_v30 = vpop.f32.mrf.mxu3  ;;  %v7601_v20 = vpop.f32.mrf.mxu1 }
 0x350   : > { %v2684_v1 = vadd.f32 %v2683_v30, %v8167_v33  ;;  %v7624_v33 = vpop.f32.mrf.mxu2 }
 0x352   : > { %v3173_v55 = vadd.f32 %v8168_v34, %v2684_v1  ;;  %4110 = vmatmul.bf16.gmra.mxu1 %v5586_v61  ;;  %v6010_v1 = vld [vmem:[#allocation2 + $0x98] sm:$0xf0]  ;;  %v8172_v61 = vld [vmem:[#allocation25_spill] sm:$0xff] }
 0x354   : > { %v7606_v13 = vadd.f32 %v7545_v0, %v3173_v55  ;;  %v5597_v0 = vld [vmem:[#allocation2 + $0xe0] sm:$0xf]  ;;  %v5553_v55 = vld [vmem:[#allocation2 + $0x90] sm:$0xf] }
 0x355   : > { %v5598_v10 = vor.u32 %v6020_v51, %v5597_v0  ;;  %v5609_v51 = vld [vmem:[#allocation2 + $0xf8] sm:$0xf] }
 0x357   : > { %v2685_v37 = vpop.f32.mrf.mxu3  ;;  %v7608_v12 = vpop.f32.mrf.mxu1 }
 0x358   : > { %v2686_v23 = vadd.f32 %v2685_v37, %v8169_v14  ;;  %v8173_v37 = vld [vmem:[#allocation29_spill] sm:$0xff]  ;;  %v5554_v14 = vor.u32 %v6010_v1, %v5553_v55  ;;  %v8179_v55 = vld [vmem:[#allocation36_spill] sm:$0xff] }
 0x35a   : > { %v3175_v6 = vadd.f32 %v7367_v44, %v2686_v23 }
 0x35c   : > { %v7615_v47 = vadd.f32 %v7552_v62, %v3175_v6  ;;  %3917 = vmatmul.bf16.gmra.mxu3 %v5542_v54  ;;  %v7633_v6 = vpop.f32.mrf.mxu2 }
 0x35f   : > { %v2688_v43 = vpop.f32.mrf.mxu3  ;;  %v7618_v5 = vpop.f32.mrf.mxu1 }
 0x360   : > { %v2689_v45 = vadd.f32 %v2688_v43, %v8170_v41  ;;  %v8175_v43 = vld [vmem:[#allocation27_spill] sm:$0xff] }
 0x362   : > { %v3178_v30 = vadd.f32 %v8171_v63, %v2689_v45  ;;  %4115 = vmatmul.bf16.gmra.mxu1 %v5598_v10  ;;  %v8176_v45 = vld [vmem:[#allocation32_spill] sm:$0xff] }
 0x364   : > { %v7622_v44 = vadd.f32 %v7559_v24, %v3178_v30  ;;  %v6023_v24 = vld [vmem:[#allocation2 + $0x100] sm:$0xf0] }
 0x365   : > { %v5610_v41 = vor.u32 %v6023_v24, %v5609_v51  ;;  %v6026_v24 = vld [vmem:[#allocation2 + $0x118] sm:$0xf0]  ;;  %v5621_v51 = vld [vmem:[#allocation2 + $0x110] sm:$0xf] }
 0x367   : > { %v2690_v62 = vpop.f32.mrf.mxu3  ;;  %v7628_v23 = vpop.f32.mrf.mxu1 }
 0x368   : > { %v2691_v34 = vadd.f32 %v2690_v62, %v8172_v61  ;;  %v8178_v62 = vld [vmem:[#allocation30_spill] sm:$0xff]  ;;  %v7643_v61 = vpop.f32.mrf.mxu2 }
 0x36a   : > { %v3180_v27 = vadd.f32 %v8173_v37, %v2691_v34  ;;  %v5565_v34 = vld [vmem:[#allocation2 + $0xa8] sm:$0xf] }
 0x36c   : > { %v7631_v29 = vadd.f32 %v7566_v28, %v3180_v27  ;;  %3922 = vmatmul.bf16.gmra.mxu3 %v5554_v14  ;;  %v6013_v28 = vld [vmem:[#allocation2 + $0xb0] sm:$0xf0] }
 0x36d   : > { %v5566_v27 = vor.u32 %v6013_v28, %v5565_v34  ;;  %v6069_v28 = vld [vmem:[#allocation9] sm:$0xff]  ;;  %v8184_v34 = vld [vmem:[#allocation35_spill] sm:$0xff] }
 0x36e   : > { %8174 = vst [vmem:[#allocation17_spill] sm:$0xff] %v7631_v29  ;;  %4384 = vmatpush.bf16.msra.mxu2 %v6069_v28 }
 0x36f   : > { %v2693_v54 = vpop.f32.mrf.mxu3  ;;  %v7640_v30 = vpop.f32.mrf.mxu1 }
 0x370   : > { %v2694_v0 = vadd.f32 %v2693_v54, %v8175_v43  ;;  %v8181_v43 = vld [vmem:[#allocation33_spill] sm:$0xff] }
 0x372   : > { %v3183_v10 = vadd.f32 %v8176_v45, %v2694_v0  ;;  %4120 = vmatmul.bf16.gmra.mxu1 %v5610_v41  ;;  %v5622_v41 = vor.u32 %v6026_v24, %v5621_v51  ;;  %v8182_v45 = vld [vmem:[#allocation39_spill] sm:$0xff] }
 0x374   : > { %v7638_v63 = vadd.f32 %v7573_v52, %v3183_v10 }
 0x376   : > { %8177 = vst [vmem:[#allocation18_spill] sm:$0xff] %v7638_v63 }
 0x377   : > { %v2695_v2 = vpop.f32.mrf.mxu3  ;;  %v7649_v54 = vpop.f32.mrf.mxu1 }
 0x378   : > { %v2696_v1 = vadd.f32 %v2695_v2, %v8178_v62  ;;  %v7653_v2 = vpop.f32.mrf.mxu2 }
 0x37a   : > { %v3185_v37 = vadd.f32 %v8179_v55, %v2696_v1  ;;  %v6016_v1 = vld [vmem:[#allocation2 + $0xc8] sm:$0xf0] }
 0x37c   : > { %v7647_v14 = vadd.f32 %v7580_v48, %v3185_v37  ;;  %3927 = vmatmul.bf16.gmra.mxu3 %v5566_v27  ;;  %v5577_v27 = vld [vmem:[#allocation2 + $0xc0] sm:$0xf] }
 0x37d   : > { %v5578_v24 = vor.u32 %v6016_v1, %v5577_v27  ;;  %v8190_v27 = vld [vmem:[#allocation40_spill] sm:$0xff] }
 0x37e   : > { %8180 = vst [vmem:[#allocation19_spill] sm:$0xff] %v7647_v14  ;;  %v8185_v14 = vld [vmem:[#allocation42_spill] sm:$0xff] }
 0x37f   : > { %v2698_v52 = vpop.f32.mrf.mxu3  ;;  %v7659_v37 = vpop.f32.mrf.mxu1 }
 0x380   : > { %v2699_v0 = vadd.f32 %v2698_v52, %v8181_v43  ;;  %v7665_v43 = vpop.f32.mrf.mxu2 }
 0x382   : > { %v3188_v10 = vadd.f32 %v8182_v45, %v2699_v0  ;;  %4125 = vmatmul.bf16.gmra.mxu1 %v5622_v41  ;;  %v6029_v0 = vld [vmem:[#allocation2 + $0x130] sm:$0xf0]  ;;  %v8187_v45 = vld [vmem:[#allocation38_spill] sm:$0xff] }
 0x384   : > { %v7656_v62 = vadd.f32 %v7587_v56, %v3188_v10  ;;  %v5633_v56 = vld [vmem:[#allocation2 + $0x128] sm:$0xf] }
 0x385   : > { %v5634_v28 = vor.u32 %v6029_v0, %v5633_v56  ;;  %v5645_v0 = vld [vmem:[#allocation2 + $0x140] sm:$0xf] }
 0x386   : > { %8183 = vst [vmem:[#allocation20_spill] sm:$0xff] %v7656_v62  ;;  %v8188_v62 = vld [vmem:[#allocation45_spill] sm:$0xff] }
 0x387   : > { %v2700_v48 = vpop.f32.mrf.mxu3 }
 0x388   : > { %v2701_v55 = vadd.f32 %v2700_v48, %v8184_v34  ;;  %v7669_v34 = vpop.f32.mrf.mxu1  ;;  %v7674_v1 = vpop.f32.mrf.mxu2 }
 0x38a   : > { %v3190_v52 = vadd.f32 %v8185_v14, %v2701_v55  ;;  %v6019_v55 = vld [vmem:[#allocation2 + $0xe0] sm:$0xf0] }
 0x38c   : > { %v7663_v51 = vadd.f32 %v7594_v60, %v3190_v52  ;;  %3932 = vmatmul.bf16.gmra.mxu3 %v5578_v24  ;;  %v5589_v24 = vld [vmem:[#allocation2 + $0xd8] sm:$0xf] }
 0x38d   : > { %v5590_v63 = vor.u32 %v6019_v55, %v5589_v24 }
 0x38e   : > { %8186 = vst [vmem:[#allocation21_spill] sm:$0xff] %v7663_v51 }
 0x38f   : > { %v2703_v41 = vpop.f32.mrf.mxu3 }
 0x390   : > { %v2704_v10 = vadd.f32 %v2703_v41, %v8187_v45  ;;  %v6032_v41 = vld [vmem:[#allocation2 + $0x148] sm:$0xf0]  ;;  %v8192_v45 = vld [vmem:[#allocation43_spill] sm:$0xff] }
 0x392   : > { %v3193_v48 = vadd.f32 %v8188_v62, %v2704_v10  ;;  %4130 = vmatmul.bf16.gmra.mxu1 %v5634_v28  ;;  %v7681_v62 = vpop.f32.mrf.mxu1  ;;  %v5646_v28 = vor.u32 %v6032_v41, %v5645_v0  ;;  %v6035_v41 = vld [vmem:[#allocation2 + $0x160] sm:$0xf0] }
 0x394   : > { %v7672_v14 = vadd.f32 %v7601_v20, %v3193_v48  ;;  %v7684_v48 = vpop.f32.mrf.mxu2 }
 0x396   : > { %8189 = vst [vmem:[#allocation22_spill] sm:$0xff] %v7672_v14 }
 0x397   : > { %v2705_v60 = vpop.f32.mrf.mxu3 }
 0x398   : > { %v2706_v52 = vadd.f32 %v2705_v60, %v8190_v27 }
 0x39a   : > { %v3195_v51 = vadd.f32 %v7446_v42, %v2706_v52  ;;  %v7690_v55 = vpop.f32.mrf.mxu1  ;;  %v5601_v52 = vld [vmem:[#allocation2 + $0xf0] sm:$0xf] }
 0x39c   : > { %v7679_v56 = vadd.f32 %v7608_v12, %v3195_v51  ;;  %3937 = vmatmul.bf16.gmra.mxu3 %v5590_v63  ;;  %v6022_v63 = vld [vmem:[#allocation2 + $0xf8] sm:$0xf0] }
 0x39d   : > { %v8194_v51 = vld [vmem:[#allocation46_spill] sm:$0xff] }
 0x39e   : > { %8191 = vst [vmem:[#allocation23_spill] sm:$0xff] %v7679_v56  ;;  %v5602_v56 = vor.u32 %v6022_v63, %v5601_v52  ;;  %v6025_v52 = vld [vmem:[#allocation2 + $0x110] sm:$0xf0] }
 0x39f   : > { %v2708_v20 = vpop.f32.mrf.mxu3 }
 0x3a0   : > { %v2709_v10 = vadd.f32 %v2708_v20, %v8192_v45  ;;  %v7694_v20 = vpop.f32.mrf.mxu2 }
 0x3a2   : > { %v3198_v60 = vadd.f32 %v7456_v7, %v2709_v10  ;;  %4135 = vmatmul.bf16.gmra.mxu1 %v5646_v28  ;;  %v5657_v7 = vld [vmem:[#allocation2 + $0x158] sm:$0xf] }
 0x3a3   : > { %v5658_v28 = vor.u32 %v6035_v41, %v5657_v7  ;;  %v5613_v7 = vld [vmem:[#allocation2 + $0x108] sm:$0xf] }
 0x3a4   : > { %v7688_v42 = vadd.f32 %v7618_v5, %v3198_v60  ;;  %v7699_v5 = vpop.f32.mrf.mxu0  ;;  %v7702_v60 = vpop.f32.mrf.mxu1  ;;  %v8197_v41 = vld [vmem:[#allocation28_spill] sm:$0xff] }
 0x3a6   : > { %8193 = vst [vmem:[#allocation26_spill] sm:$0xff] %v7688_v42 }
 0x3a7   : > { %v2710_v12 = vpop.f32.mrf.mxu3 }
 0x3a8   : > { %v2711_v27 = vadd.f32 %v2710_v12, %v8194_v51  ;;  %v7707_v51 = vpop.f32.mrf.mxu2 }
 0x3aa   : > { %v3200_v24 = vadd.f32 %v7468_v39, %v2711_v27  ;;  %v8196_v39 = vld [vmem:[#allocation24_spill] sm:$0xff] }
 0x3ab   : > { %v3301_v63 = vadd.f32 %v8196_v39, %v7450_v57  ;;  %v7721_v57 = vld [vmem:[%s8077_s6] ss:$0 sm:$0xff] }
 0x3ac   : > { %v7697_v0 = vadd.f32 %v7628_v23, %v3200_v24  ;;  %3942 = vmatmul.bf16.gmra.mxu3 %v5602_v56  ;;  %v7712_v56 = vld [vmem:[%s8076_s5] ss:$0 sm:$0xff]  ;;  %v7715_v24 = vpop.f32.mrf.mxu0 }
 0x3ae   : > { %8195 = vst [vmem:[#allocation25_spill] sm:$0xff] %v7697_v0 }
 0x3af   : > { %v3903_v45 = vpop.f32.mrf.mxu3 }
 0x3b0   : > { %v3993_v10 = vadd.f32 %v7479_v8, %v3903_v45  ;;  %v3303_v45 = vadd.f32 %v8197_v41, %v7459_v22  ;;  %v7730_v0 = vpop.f32.mrf.mxu2 }
 0x3b2   : > { %v4082_v12 = vadd.f32 %v7640_v30, %v3993_v10  ;;  %4140 = vmatmul.bf16.gmra.mxu1 %v5658_v28  ;;  %v5614_v28 = vor.u32 %v6025_v52, %v5613_v7 }
 0x3b4   : > { %v4161_v23 = vadd.f32 %v4082_v12, %v3301_v63  ;;  %v7726_v12 = vpop.f32.mrf.mxu1  ;;  %v6038_v63 = vld [vmem:[#allocation2 + $0x178] sm:$0xf0]  ;;  %v7735_v7 = vpop.f32.mrf.mxu0 }
 0x3b6   : > { %v4197_v30 = vmul.f32 %v7712_v56, %v4161_v23 }
 0x3b7   : > { %v3905_v27 = vpop.f32.mrf.mxu3 }
 0x3b8   : > { %v3995_v8 = vadd.f32 %v7489_v31, %v3905_v27  ;;  %v5669_v31 = vld [vmem:[#allocation2 + $0x170] sm:$0xf]  ;;  %v4233_v27 = vadd.f32 %v7721_v57, %v4197_v30 }
 0x3b9   : > { %v5670_v41 = vor.u32 %v6038_v63, %v5669_v31  ;;  %v8199_v31 = vld [vmem:[#allocation34_spill] sm:$0xff] }
 0x3ba   : > { %v4084_v10 = vadd.f32 %v7649_v54, %v3995_v8  ;;  %v4265_v54 = vmax.f32 %v4233_v27, 0.0  ;;  %v3308_v63 = vadd.f32 %v8199_v31, %v7475_v46 }
 0x3bc   : > { %v4162_v39 = vadd.f32 %v4084_v10, %v3303_v45  ;;  %3947 = vmatmul.bf16.gmra.mxu3 %v5614_v28  ;;  %v8198_v45 = vld [vmem:[#allocation31_spill] sm:$0xff]  ;;  %v7739_v28 = vpop.f32.mrf.mxu1 }
 0x3bd   : > { %v3306_v30 = vadd.f32 %v8198_v45, %v7466_v38 }
 0x3be   : > { %v4198_v23 = vmul.f32 %v7712_v56, %v4162_v39 }
 0x3bf   : > { %v3908_v42 = vpop.f32.mrf.mxu3 }
 0x3c0   : > { %v4234_v14 = vadd.f32 %v7721_v57, %v4198_v23  ;;  %v3998_v22 = vadd.f32 %v7499_v4, %v3908_v42  ;;  %v6028_v23 = vld [vmem:[#allocation2 + $0x128] sm:$0xf0]  ;;  %v7742_v42 = vpop.f32.mrf.mxu2 }
 0x3c2   : > { %v4266_v52 = vmax.f32 %v4234_v14, 0.0  ;;  %v4087_v8 = vadd.f32 %v7659_v37, %v3998_v22  ;;  %4145 = vmatmul.bf16.gmra.mxu1 %v5670_v41  ;;  %v5625_v14 = vld [vmem:[#allocation2 + $0x120] sm:$0xf]  ;;  %v7748_v41 = vpop.f32.mrf.mxu0 }
 0x3c3   : > { %v5626_v38 = vor.u32 %v6028_v23, %v5625_v14  ;;  %v8200_v14 = vld [vmem:[#allocation37_spill] sm:$0xff] }
 0x3c4   : > { %v4297_v10 = vpack.c.bf16 %v4266_v52, %v4265_v54  ;;  %v4163_v39 = vadd.f32 %v4087_v8, %v3306_v30  ;;  %v5681_v54 = vld [vmem:[#allocation2 + $0x188] sm:$0xf]  ;;  %v6041_v52 = vld [vmem:[#allocation2 + $0x190] sm:$0xf0]  ;;  %v3311_v31 = vadd.f32 %v8200_v14, %v7484_v40 }
 0x3c6   : > { %4385 = vmatmul.bf16.vlgmr.msra.gmra.mxu2 %v4297_v10  ;;  %v4199_v37 = vmul.f32 %v7712_v56, %v4163_v39  ;;  %v5682_v10 = vor.u32 %v6041_v52, %v5681_v54 }
 0x3c7   : > { %v3910_v29 = vpop.f32.mrf.mxu3 }
 0x3c8   : > { %v4000_v4 = vadd.f32 %v7511_v26, %v3910_v29  ;;  %v4235_v26 = vadd.f32 %v7721_v57, %v4199_v37  ;;  %v7752_v29 = vpop.f32.mrf.mxu1 }
 0x3ca   : > { %v4089_v27 = vadd.f32 %v7669_v34, %v4000_v4  ;;  %v4267_v39 = vmax.f32 %v4235_v26, 0.0  ;;  %v7757_v4 = vpop.f32.mrf.mxu2 }
 0x3cc   : > { %v4164_v22 = vadd.f32 %v4089_v27, %v3308_v63  ;;  %3952 = vmatmul.bf16.gmra.mxu3 %v5626_v38  ;;  %v7761_v27 = vpop.f32.mrf.mxu0 }
 0x3ce   : > { %v4200_v8 = vmul.f32 %v7712_v56, %v4164_v22 }
 0x3cf   : > { %v3913_v45 = vpop.f32.mrf.mxu3 }
 0x3d0   : > { %v4003_v30 = vadd.f32 %v7522_v21, %v3913_v45  ;;  %v4236_v46 = vadd.f32 %v7721_v57, %v4200_v8  ;;  %v5637_v21 = vld [vmem:[#allocation2 + $0x138] sm:$0xf]  ;;  %v7764_v54 = vpop.f32.mrf.mxu1  ;;  %v8201_v8 = vld [vmem:[#allocation41_spill] sm:$0xff] }
 0x3d1   : > { %v3313_v26 = vadd.f32 %v8201_v8, %v7493_v35  ;;  %v6034_v8 = vld [vmem:[#allocation2 + $0x158] sm:$0xf0] }
 0x3d2   : > { %v4092_v34 = vadd.f32 %v7681_v62, %v4003_v30  ;;  %4150 = vmatmul.bf16.gmra.mxu1 %v5682_v10  ;;  %v4268_v23 = vmax.f32 %v4236_v46, 0.0  ;;  %v6031_v62 = vld [vmem:[#allocation2 + $0x140] sm:$0xf0]  ;;  %v7770_v10 = vpop.f32.mrf.mxu2 }
 0x3d3   : > { %v5638_v40 = vor.u32 %v6031_v62, %v5637_v21 }
 0x3d4   : > { %v4298_v63 = vpack.c.bf16 %v4268_v23, %v4267_v39  ;;  %v4165_v37 = vadd.f32 %v4092_v34, %v3311_v31  ;;  %v7776_v14 = vpop.f32.mrf.mxu0 }
 0x3d6   : > { %4390 = vmatmul.bf16.gmra.mxu2 %v4298_v63  ;;  %v4201_v52 = vmul.f32 %v7712_v56, %v4165_v37  ;;  %v8202_v37 = vld [vmem:[#allocation44_spill] sm:$0xff] }
 0x3d7   : > { %v3915_v38 = vpop.f32.mrf.mxu3 }
 0x3d8   : > { %v4005_v22 = vadd.f32 %v7532_v25, %v3915_v38  ;;  %v4237_v34 = vadd.f32 %v7721_v57, %v4201_v52  ;;  %v7779_v63 = vpop.f32.mrf.mxu1  ;;  %v3316_v38 = vadd.f32 %v8202_v37, %v7502_v18 }
 0x3da   : > { %v4094_v45 = vadd.f32 %v7690_v55, %v4005_v22  ;;  %v4269_v31 = vmax.f32 %v4237_v34, 0.0  ;;  %v7783_v62 = vpop.f32.mrf.mxu2 }
 0x3dc   : > { %v4166_v30 = vadd.f32 %v4094_v45, %v3313_v26  ;;  %3957 = vmatmul.bf16.gmra.mxu3 %v5638_v40  ;;  %v7790_v34 = vpop.f32.mrf.mxu0 }
 0x3de   : > { %v4202_v46 = vmul.f32 %v7712_v56, %v4166_v30 }
 0x3df   : > { %v3918_v25 = vpop.f32.mrf.mxu3 }
 0x3e0   : > { %v4008_v39 = vadd.f32 %v7699_v5, %v3918_v25  ;;  %v4238_v23 = vadd.f32 %v7721_v57, %v4202_v46  ;;  %v5649_v5 = vld [vmem:[#allocation2 + $0x150] sm:$0xf]  ;;  %v7792_v25 = vpop.f32.mrf.mxu1 }
 0x3e1   : > { %v5650_v46 = vor.u32 %v6034_v8, %v5649_v5 }
 0x3e2   : > { %v4097_v35 = vadd.f32 %v7702_v60, %v4008_v39  ;;  %v4270_v55 = vmax.f32 %v4238_v23, 0.0  ;;  %v8203_v60 = vld [vmem:[#allocation47_spill] sm:$0xff] }
 0x3e3   : > { %v3318_v40 = vadd.f32 %v8203_v60, %v7509_v11 }
 0x3e4   : > { %v4299_v21 = vpack.c.bf16 %v4270_v55, %v4269_v31  ;;  %v4167_v22 = vadd.f32 %v4097_v35, %v3316_v38  ;;  %v7798_v55 = vpop.f32.mrf.mxu2  ;;  %v3321_v38 = vadd.f32 %v7612_v59, %v7518_v17 }
 0x3e6   : > { %4395 = vmatmul.bf16.gmra.mxu2 %v4299_v21  ;;  %v4203_v45 = vmul.f32 %v7712_v56, %v4167_v22  ;;  %v7803_v22 = vpop.f32.mrf.mxu0 }
 0x3e7   : > { %v3920_v52 = vpop.f32.mrf.mxu3 }
 0x3e8   : > { %v4010_v26 = vadd.f32 %v7715_v24, %v3920_v52  ;;  %v4239_v23 = vadd.f32 %v7721_v57, %v4203_v45  ;;  %v7805_v5 = vpop.f32.mrf.mxu1 }
 0x3ea   : > { %v4099_v30 = vadd.f32 %v7726_v12, %v4010_v26  ;;  %v4271_v12 = vmax.f32 %v4239_v23, 0.0  ;;  %v6037_v26 = vld [vmem:[#allocation2 + $0x170] sm:$0xf0]  ;;  %v5687_v23 = vld [vmem:[#allocation2 + $0x1a4] sm:$0xf0] }
 0x3ec   : > { %v4168_v18 = vadd.f32 %v4099_v30, %v3318_v40  ;;  %3962 = vmatmul.bf16.gmra.mxu3 %v5650_v46  ;;  %v7812_v59 = vpop.f32.mrf.mxu2 }
 0x3ee   : > { %v4204_v39 = vmul.f32 %v7712_v56, %v4168_v18 }
 0x3ef   : > { %v3923_v35 = vpop.f32.mrf.mxu3 }
 0x3f0   : > { %v4013_v24 = vadd.f32 %v7735_v7, %v3923_v35  ;;  %v4240_v31 = vadd.f32 %v7721_v57, %v4204_v39  ;;  %v5661_v7 = vld [vmem:[#allocation2 + $0x168] sm:$0xf]  ;;  %v6042_v39 = vld [vmem:[#allocation2 + $0x19c] sm:$0xf]  ;;  %v4027_v35 = vpop.f32.mrf.mxu0 }
 0x3f1   : > { %v5662_v17 = vor.u32 %v6037_v26, %v5661_v7 }
 0x3f2   : > { %v4102_v11 = vadd.f32 %v7739_v28, %v4013_v24  ;;  %v4272_v37 = vmax.f32 %v4240_v31, 0.0  ;;  %v3323_v28 = vadd.f32 %v7624_v33, %v7527_v9  ;;  %v5690_v24 = vor.u32 %v6042_v39, %v5687_v23  ;;  %v5693_v31 = vld [vmem:[#allocation2 + $0x1a0] sm:$0xf] }
 0x3f4   : > { %v4300_v21 = vpack.c.bf16 %v4272_v37, %v4271_v12  ;;  %v4169_v52 = vadd.f32 %v4102_v11, %v3321_v38  ;;  %v6044_v11 = vld [vmem:[#allocation2 + $0x1a8] sm:$0xf0]  ;;  %v4116_v12 = vpop.f32.mrf.mxu1  ;;  %4066 = vmatmul.bf16.gmra.mxu0 %v5690_v24  ;;  %v7821_v7 = vpop.f32.mrf.mxu2 }
 0x3f6   : > { %4400 = vmatmul.bf16.gmra.mxu2 %v4300_v21  ;;  %v4205_v60 = vmul.f32 %v7712_v56, %v4169_v52  ;;  %v3326_v52 = vadd.f32 %v7633_v6, %v7536_v15 }
 0x3f7   : > { %v3925_v8 = vpop.f32.mrf.mxu3 }
 0x3f8   : > { %v4015_v45 = vadd.f32 %v7748_v41, %v3925_v8  ;;  %v4241_v18 = vadd.f32 %v7721_v57, %v4205_v60  ;;  %v6040_v60 = vld [vmem:[#allocation2 + $0x188] sm:$0xf0] }
 0x3fa   : > { %v4104_v40 = vadd.f32 %v7752_v29, %v4015_v45  ;;  %v5694_v29 = vor.u32 %v6044_v11, %v5693_v31  ;;  %v4273_v38 = vmax.f32 %v4241_v18, 0.0  ;;  %v3331_v11 = vadd.f32 %v7653_v2, %v7550_v49 }
 0x3fc   : > { %v4170_v30 = vadd.f32 %v4104_v40, %v3323_v28  ;;  %3967 = vmatmul.bf16.gmra.mxu3 %v5662_v17  ;;  %4155 = vmatmul.bf16.gmra.mxu1 %v5694_v29  ;;  %v4029_v40 = vpop.f32.mrf.mxu0  ;;  %v4118_v15 = vpop.f32.mrf.mxu1  ;;  %v5685_v29 = vld [vmem:[#allocation2 + $0x198] sm:$0xf] }
 0x3fd   : > { %v7830_v23 = vpop.f32.mrf.mxu2 }
 0x3fe   : > { %v4206_v46 = vmul.f32 %v7712_v56, %v4170_v30 }
 0x3ff   : > { %v3928_v41 = vpop.f32.mrf.mxu3 }
 0x400   : > { %v4018_v9 = vadd.f32 %v7761_v27, %v3928_v41  ;;  %v4242_v33 = vadd.f32 %v7721_v57, %v4206_v46  ;;  %v5673_v27 = vld [vmem:[#allocation2 + $0x180] sm:$0xf] }
 0x401   : > { %v5674_v46 = vor.u32 %v6040_v60, %v5673_v27 }
 0x402   : > { %v4107_v37 = vadd.f32 %v7764_v54, %v4018_v9  ;;  %v4274_v21 = vmax.f32 %v4242_v33, 0.0  ;;  %v3328_v54 = vadd.f32 %v7643_v61, %v7543_v58 }
 0x404   : > { %v4301_v8 = vpack.c.bf16 %v4274_v21, %v4273_v38  ;;  %v4171_v26 = vadd.f32 %v4107_v37, %v3326_v52  ;;  %v4121_v33 = vpop.f32.mrf.mxu1  ;;  %v6043_v37 = vld [vmem:[#allocation2 + $0x1a0] sm:$0xf0] }
 0x406   : > { %4405 = vmatmul.bf16.gmra.mxu2 %v4301_v8  ;;  %v4207_v17 = vmul.f32 %v7712_v56, %v4171_v26  ;;  %v7838_v8 = vpop.f32.mrf.mxu2  ;;  %v3333_v26 = vadd.f32 %v7665_v43, %v7557_v32  ;;  %v3336_v32 = vadd.f32 %v7674_v1, %v7564_v19 }
 0x407   : > { %v3930_v45 = vpop.f32.mrf.mxu3 }
 0x408   : > { %v4020_v28 = vadd.f32 %v7776_v14, %v3930_v45  ;;  %v4243_v39 = vadd.f32 %v7721_v57, %v4207_v17 }
 0x40a   : > { %v4109_v30 = vadd.f32 %v7779_v63, %v4020_v28  ;;  %v4275_v58 = vmax.f32 %v4243_v39, 0.0  ;;  %v4032_v63 = vpop.f32.mrf.mxu0 }
 0x40c   : > { %v4172_v6 = vadd.f32 %v4109_v30, %v3328_v54  ;;  %3972 = vmatmul.bf16.gmra.mxu3 %v5674_v46  ;;  %v4123_v28 = vpop.f32.mrf.mxu1 }
 0x40e   : > { %v4208_v18 = vmul.f32 %v7712_v56, %v4172_v6 }
 0x40f   : > { %v3933_v41 = vpop.f32.mrf.mxu3 }
 0x410   : > { %v4023_v14 = vadd.f32 %v7790_v34, %v3933_v41  ;;  %v4244_v24 = vadd.f32 %v7721_v57, %v4208_v18  ;;  %v5686_v34 = vor.u32 %v6043_v37, %v5685_v29  ;;  %v7847_v18 = vpop.f32.mrf.mxu2 }
 0x412   : > { %v4112_v31 = vadd.f32 %v7792_v25, %v4023_v14  ;;  %v4276_v61 = vmax.f32 %v4244_v24, 0.0  ;;  %v4034_v2 = vpop.f32.mrf.mxu0 }
 0x414   : > { %v4302_v9 = vpack.c.bf16 %v4276_v61, %v4275_v58  ;;  %v4173_v38 = vadd.f32 %v4112_v31, %v3331_v11  ;;  %v4126_v24 = vpop.f32.mrf.mxu1 }
 0x416   : > { %4410 = vmatmul.bf16.gmra.mxu2 %v4302_v9  ;;  %v4209_v25 = vmul.f32 %v7712_v56, %v4173_v38 }
 0x417   : > { %v3935_v21 = vpop.f32.mrf.mxu3 }
 0x418   : > { %v4025_v52 = vadd.f32 %v7803_v22, %v3935_v21  ;;  %v4245_v60 = vadd.f32 %v7721_v57, %v4209_v25  ;;  %v7854_v61 = vpop.f32.mrf.mxu2 }
 0x41a   : > { %v4114_v45 = vadd.f32 %v7805_v5, %v4025_v52  ;;  %v4277_v46 = vmax.f32 %v4245_v60, 0.0  ;;  %v4037_v39 = vpop.f32.mrf.mxu0 }
 0x41c   : > { %v4174_v49 = vadd.f32 %v4114_v45, %v3333_v26  ;;  %3977 = vmatmul.bf16.gmra.mxu3 %v5686_v34  ;;  %v4128_v52 = vpop.f32.mrf.mxu1 }
 0x41e   : > { %v4210_v27 = vmul.f32 %v7712_v56, %v4174_v49 }
 0x41f   : > { %v3938_v17 = vpop.f32.mrf.mxu3 }
 0x420   : > { %v4028_v22 = vadd.f32 %v4027_v35, %v3938_v17  ;;  %v4246_v54 = vadd.f32 %v7721_v57, %v4210_v27  ;;  %v3338_v35 = vadd.f32 %v7684_v48, %v7571_v50  ;;  %v3341_v50 = vadd.f32 %v7694_v20, %v7578_v16  ;;  %v7861_v34 = vpop.f32.mrf.mxu2 }
 0x422   : > { %v4117_v30 = vadd.f32 %v4116_v12, %v4028_v22  ;;  %v4278_v6 = vmax.f32 %v4246_v54, 0.0  ;;  %v4039_v37 = vpop.f32.mrf.mxu0 }
 0x424   : > { %v4303_v43 = vpack.c.bf16 %v4278_v6, %v4277_v46  ;;  %v4175_v5 = vadd.f32 %v4117_v30, %v3336_v32  ;;  %v4131_v60 = vpop.f32.mrf.mxu1 }
 0x426   : > { %4415 = vmatmul.bf16.gmra.mxu2 %v4303_v43  ;;  %v4211_v31 = vmul.f32 %v7712_v56, %v4175_v5 }
 0x427   : > { %v3940_v41 = vpop.f32.mrf.mxu3 }
 0x428   : > { %v4030_v14 = vadd.f32 %v4029_v40, %v3940_v41  ;;  %v4247_v19 = vadd.f32 %v7721_v57, %v4211_v31  ;;  %v7869_v30 = vpop.f32.mrf.mxu2  ;;  %v3348_v31 = vadd.f32 %v7742_v42, %v7599_v3 }
 0x42a   : > { %v4119_v12 = vadd.f32 %v4118_v15, %v4030_v14  ;;  %v4279_v38 = vmax.f32 %v4247_v19, 0.0 }
 0x42c   : > { %v4176_v58 = vadd.f32 %v4119_v12, %v3338_v35  ;;  %v4133_v43 = vpop.f32.mrf.mxu1  ;;  %v7885_v12 = vld [vmem:[%s8080_s9] ss:$0 sm:$0xff] }
 0x42e   : > { %v4212_v11 = vmul.f32 %v7712_v56, %v4176_v58  ;;  %v431_v58 = vld [vmem:[%s6673_s4] sm:$0xff]  }
 0x42f   : > { %v3943_v1 = vpop.f32.mrf.mxu3 }
 0x430   : > { %v4033_v9 = vadd.f32 %v4032_v63, %v3943_v1  ;;  %v4248_v29 = vadd.f32 %v7721_v57, %v4212_v11  ;;  %v3343_v63 = vadd.f32 %v7707_v51, %v7585_v36  ;;  %v3346_v36 = vadd.f32 %v7730_v0, %v7592_v53 }
 0x432   : > { %v4122_v40 = vadd.f32 %v4121_v33, %v4033_v9  ;;  %v4280_v21 = vmax.f32 %v4248_v29, 0.0  ;;  %v4042_v33 = vpop.f32.mrf.mxu0 }
 0x434   : > { %v4304_v48 = vpack.c.bf16 %v4280_v21, %v4279_v38  ;;  %v4177_v15 = vadd.f32 %v4122_v40, %v3341_v50  ;;  %v4136_v40 = vpop.f32.mrf.mxu1  ;;  %v4539_v21 = vunpack.c.h.bf16 %v431_v58 }
 0x436   : > { %4420 = vmatmul.bf16.gmra.mxu2 %v4304_v48  ;;  %v4213_v45 = vmul.f32 %v7712_v56, %v4177_v15 }
 0x437   : > { %v3945_v25 = vpop.f32.mrf.mxu3 }
 0x438   : > { %v4035_v26 = vadd.f32 %v4034_v2, %v3945_v25  ;;  %v4249_v16 = vadd.f32 %v7721_v57, %v4213_v45 }
 0x43a   : > { %v4124_v49 = vadd.f32 %v4123_v28, %v4035_v26  ;;  %v4281_v46 = vmax.f32 %v4249_v16, 0.0  ;;  %v4044_v28 = vpop.f32.mrf.mxu0  ;;  %v3351_v26 = vadd.f32 %v7757_v4, %v7606_v13  ;;  %v3353_v13 = vadd.f32 %v7770_v10, %v7615_v47 }
 0x43c   : > { %v4178_v27 = vadd.f32 %v4124_v49, %v3343_v63 }
 0x43e   : > { %v4214_v17 = vmul.f32 %v7712_v56, %v4178_v27 }
 0x43f   : > { %v3948_v20 = vpop.f32.mrf.mxu3 }
 0x440   : > { %v4038_v22 = vadd.f32 %v4037_v39, %v3948_v20  ;;  %v4250_v54 = vadd.f32 %v7721_v57, %v4214_v17  ;;  %v7876_v39 = vld [vmem:[%s8079_s8] ss:$0 sm:$0xff] }
 0x442   : > { %v4127_v2 = vadd.f32 %v4126_v24, %v4038_v22  ;;  %v4282_v6 = vmax.f32 %v4250_v54, 0.0  ;;  %v4047_v1 = vpop.f32.mrf.mxu0 }
 0x444   : > { %v4305_v51 = vpack.c.bf16 %v4282_v6, %v4281_v46  ;;  %v4179_v32 = vadd.f32 %v4127_v2, %v3346_v36  ;;  %v4138_v46 = vpop.f32.mrf.mxu1 }
 0x446   : > { %4425 = vmatmul.bf16.gmra.mxu2 %v4305_v51  ;;  %v4215_v24 = vmul.f32 %v7712_v56, %v4179_v32  ;;  %v433_v51 = vld [vmem:[%s6673_s4 + $0x8] sm:$0xff]  }
 0x447   : > { %v3950_v5 = vpop.f32.mrf.mxu3 }
 0x448   : > { %v4040_v41 = vadd.f32 %v4039_v37, %v3950_v5  ;;  %v4251_v19 = vadd.f32 %v7721_v57, %v4215_v24  ;;  %v4538_v37 = vunpack.c.l.bf16 %v431_v58  ;;  %v4541_v24 = vunpack.c.h.bf16 %v433_v51 }
 0x449   : > { %v4386_v14 = vpop.f32.mrf.mxu2 }
 0x44a   : > { %v4129_v53 = vadd.f32 %v4128_v52, %v4040_v41  ;;  %v4470_v35 = vmul.f32 %v7876_v39, %v4386_v14  ;;  %v4283_v48 = vmax.f32 %v4251_v19, 0.0  ;;  %v4049_v20 = vpop.f32.mrf.mxu0  ;;  %v4540_v14 = vunpack.c.l.bf16 %v433_v51 }
 0x44b   : > { %v3356_v19 = vadd.f32 %v7783_v62, %v7622_v44 }
 0x44c   : > { %v4180_v0 = vadd.f32 %v4129_v53, %v3348_v31  ;;  %v4506_v29 = vadd.f32 %v7885_v12, %v4470_v35 }
 0x44e   : > { %v4216_v11 = vmul.f32 %v7712_v56, %v4180_v0  ;;  %v4570_v25 = vadd.f32 %v4538_v37, %v4506_v29  ;;  %v4141_v37 = vpop.f32.mrf.mxu1 }
 0x44f   : > { %v3953_v9 = vpop.f32.mrf.mxu3 }
 0x450   : > { %v4043_v3 = vadd.f32 %v4042_v33, %v3953_v9  ;;  %v4252_v42 = vadd.f32 %v7721_v57, %v4216_v11  ;;  %v4602_v17 = vmax.f32 %v4570_v25, 0.0 }
 0x451   : > { %v4388_v38 = vpop.f32.mrf.mxu2 }
 0x452   : > { %v4132_v52 = vadd.f32 %v4131_v60, %v4043_v3  ;;  %v4471_v50 = vmul.f32 %v7876_v39, %v4388_v38  ;;  %v4284_v15 = vmax.f32 %v4252_v42, 0.0  ;;  %v4052_v58 = vpop.f32.mrf.mxu0 }
 0x454   : > { %v4507_v45 = vadd.f32 %v7885_v12, %v4471_v50  ;;  %v4306_v63 = vpack.c.bf16 %v4284_v15, %v4283_v48  ;;  %v4181_v49 = vadd.f32 %v4132_v52, %v3351_v26  ;;  %v8204_v15 = vld [vmem:[#allocation17_spill] sm:$0xff] }
 0x455   : > { %v3358_v44 = vadd.f32 %v7798_v55, %v8204_v15 }
 0x456   : > { %v4571_v33 = vadd.f32 %v4539_v21, %v4507_v45  ;;  %4430 = vmatmul.bf16.gmra.mxu2 %v4306_v63  ;;  %v4217_v54 = vmul.f32 %v7712_v56, %v4181_v49  ;;  %v435_v63 = vld [vmem:[%s6673_s4 + $0x10] sm:$0xff]  }
 0x457   : > { %v3955_v27 = vpop.f32.mrf.mxu3 }
 0x458   : > { %v4603_v16 = vmax.f32 %v4571_v33, 0.0  ;;  %v4045_v60 = vadd.f32 %v4044_v28, %v3955_v27  ;;  %v4253_v32 = vadd.f32 %v7721_v57, %v4217_v54  ;;  %v4143_v27 = vpop.f32.mrf.mxu1  ;;  %v4543_v54 = vunpack.c.h.bf16 %v435_v63 }
 0x459   : > { %v4391_v22 = vpop.f32.mrf.mxu2 }
 0x45a   : > { %v6081_v2 = vpack.c.bf16 %v4603_v16, %v4602_v17  ;;  %v4134_v4 = vadd.f32 %v4133_v43, %v4045_v60  ;;  %v4472_v36 = vmul.f32 %v7876_v39, %v4391_v22  ;;  %v4285_v0 = vmax.f32 %v4253_v32, 0.0  ;;  %v4054_v45 = vpop.f32.mrf.mxu0 }
 0x45b   : > { %v4542_v60 = vunpack.c.l.bf16 %v435_v63 }
 0x45c   : > { %6082 = vst [vmem:[%s7901_s26] sm:$0xff] %v6081_v2   ;;  %v4182_v6 = vadd.f32 %v4134_v4, %v3353_v13  ;;  %v4508_v41 = vadd.f32 %v7885_v12, %v4472_v36  ;;  %v8205_v36 = vld [vmem:[#allocation18_spill] sm:$0xff] }
 0x45d   : > { %v3361_v51 = vadd.f32 %v7812_v59, %v8205_v36 }
 0x45e   : > { %v4218_v28 = vmul.f32 %v7712_v56, %v4182_v6  ;;  %v4572_v11 = vadd.f32 %v4540_v14, %v4508_v41 }
 0x45f   : > { %v3958_v5 = vpop.f32.mrf.mxu3 }
 0x460   : > { %v4048_v47 = vadd.f32 %v4047_v1, %v3958_v5  ;;  %v4254_v10 = vadd.f32 %v7721_v57, %v4218_v28 }
 0x461   : > { %v4393_v43 = vpop.f32.mrf.mxu2 }
 0x462   : > { %v4137_v31 = vadd.f32 %v4136_v40, %v4048_v47  ;;  %v4473_v53 = vmul.f32 %v7876_v39, %v4393_v43  ;;  %v4286_v35 = vmax.f32 %v4254_v10, 0.0  ;;  %v4604_v40 = vmax.f32 %v4572_v11, 0.0  ;;  %v4057_v14 = vpop.f32.mrf.mxu0 }
 0x464   : > { %v4509_v9 = vadd.f32 %v7885_v12, %v4473_v53  ;;  %v4307_v29 = vpack.c.bf16 %v4286_v35, %v4285_v0  ;;  %v4183_v1 = vadd.f32 %v4137_v31, %v3356_v19  ;;  %v4146_v31 = vpop.f32.mrf.mxu1 }
 0x466   : > { %v4573_v3 = vadd.f32 %v4541_v24, %v4509_v9  ;;  %4435 = vmatmul.bf16.gmra.mxu2 %v4307_v29  ;;  %v4219_v50 = vmul.f32 %v7712_v56, %v4183_v1  ;;  %v437_v29 = vld [vmem:[%s6673_s4 + $0x18] sm:$0xff]  }
 0x467   : > { %v3960_v42 = vpop.f32.mrf.mxu3 }
 0x468   : > { %v4605_v38 = vmax.f32 %v4573_v3, 0.0  ;;  %v4050_v21 = vadd.f32 %v4049_v20, %v3960_v42  ;;  %v4255_v33 = vadd.f32 %v7721_v57, %v4219_v50 }
 0x469   : > { %v4396_v52 = vpop.f32.mrf.mxu2 }
 0x46a   : > { %v6086_v48 = vpack.c.bf16 %v4605_v38, %v4604_v40  ;;  %v4139_v62 = vadd.f32 %v4138_v46, %v4050_v21  ;;  %v4474_v26 = vmul.f32 %v7876_v39, %v4396_v52  ;;  %v4287_v4 = vmax.f32 %v4255_v33, 0.0  ;;  %v4059_v52 = vpop.f32.mrf.mxu0 }
 0x46b   : > { %v4544_v40 = vunpack.c.l.bf16 %v437_v29 }
 0x46c   : > { %6158 = vst [vmem:[%s7901_s26 + $0x8] sm:$0xff] %v6086_v48   ;;  %v4184_v25 = vadd.f32 %v4139_v62, %v3358_v44  ;;  %v4510_v16 = vadd.f32 %v7885_v12, %v4474_v26 }
 0x46e   : > { %v4220_v49 = vmul.f32 %v7712_v56, %v4184_v25  ;;  %v4574_v6 = vadd.f32 %v4542_v60, %v4510_v16  ;;  %v4148_v25 = vpop.f32.mrf.mxu1 }
 0x46f   : > { %v3963_v17 = vpop.f32.mrf.mxu3 }
 0x470   : > { %v4053_v20 = vadd.f32 %v4052_v58, %v3963_v17  ;;  %v4256_v22 = vadd.f32 %v7721_v57, %v4220_v49  ;;  %v4606_v10 = vmax.f32 %v4574_v6, 0.0  ;;  %v8206_v58 = vld [vmem:[#allocation19_spill] sm:$0xff] }
 0x471   : > { %v4398_v55 = vpop.f32.mrf.mxu2  ;;  %v3363_v59 = vadd.f32 %v7821_v7, %v8206_v58  ;;  %v4545_v7 = vunpack.c.h.bf16 %v437_v29 }
 0x472   : > { %v4142_v2 = vadd.f32 %v4141_v37, %v4053_v20  ;;  %v4475_v13 = vmul.f32 %v7876_v39, %v4398_v55  ;;  %v4288_v46 = vmax.f32 %v4256_v22, 0.0 }
 0x474   : > { %v4511_v28 = vadd.f32 %v7885_v12, %v4475_v13  ;;  %v4308_v32 = vpack.c.bf16 %v4288_v46, %v4287_v4  ;;  %v4185_v5 = vadd.f32 %v4142_v2, %v3361_v51  ;;  %v8208_v13 = vld [vmem:[#allocation21_spill] sm:$0xff]  ;;  %v4062_v46 = vpop.f32.mrf.mxu0 }
 0x475   : > { %v3368_v4 = vadd.f32 %v7838_v8, %v8208_v13 }
 0x476   : > { %v4575_v41 = vadd.f32 %v4543_v54, %v4511_v28  ;;  %4440 = vmatmul.bf16.gmra.mxu2 %v4308_v32  ;;  %v4221_v0 = vmul.f32 %v7712_v56, %v4185_v5  ;;  %v4151_v51 = vpop.f32.mrf.mxu1  ;;  %v439_v28 = vld [vmem:[%s6673_s4 + $0x20] sm:$0xff]  }
 0x477   : > { %v3965_v47 = vpop.f32.mrf.mxu3 }
 0x478   : > { %v4607_v43 = vmax.f32 %v4575_v41, 0.0  ;;  %v4055_v24 = vadd.f32 %v4054_v45, %v3965_v47  ;;  %v4257_v1 = vadd.f32 %v7721_v57, %v4221_v0  ;;  %v8207_v45 = vld [vmem:[#allocation20_spill] sm:$0xff]  ;;  %v4546_v47 = vunpack.c.l.bf16 %v439_v28 }
 0x479   : > { %v4401_v53 = vpop.f32.mrf.mxu2  ;;  %v3366_v63 = vadd.f32 %v7830_v23, %v8207_v45 }
 0x47a   : > { %v6091_v35 = vpack.c.bf16 %v4607_v43, %v4606_v10  ;;  %v4144_v11 = vadd.f32 %v4143_v27, %v4055_v24  ;;  %v4476_v9 = vmul.f32 %v7876_v39, %v4401_v53  ;;  %v4289_v44 = vmax.f32 %v4257_v1, 0.0 }
 0x47b   : > { %v4547_v24 = vunpack.c.h.bf16 %v439_v28 }
 0x47c   : > { %6159 = vst [vmem:[%s7901_s26 + $0x10] sm:$0xff] %v6091_v35   ;;  %v4186_v19 = vadd.f32 %v4144_v11, %v3363_v59  ;;  %v4512_v42 = vadd.f32 %v7885_v12, %v4476_v9  ;;  %v8209_v59 = vld [vmem:[#allocation22_spill] sm:$0xff]  ;;  %v4064_v29 = vpop.f32.mrf.mxu0 }
 0x47d   : > { %v3371_v11 = vadd.f32 %v7847_v18, %v8209_v59 }
 0x47e   : > { %v4222_v37 = vmul.f32 %v7712_v56, %v4186_v19  ;;  %v4576_v26 = vadd.f32 %v4544_v40, %v4512_v42 }
 0x47f   : > { %v3968_v3 = vpop.f32.mrf.mxu3 }
 0x480   : > { %v4058_v38 = vadd.f32 %v4057_v14, %v3968_v3  ;;  %v4258_v21 = vadd.f32 %v7721_v57, %v4222_v37  ;;  %v4608_v60 = vmax.f32 %v4576_v26, 0.0  ;;  %v4153_v3 = vpop.f32.mrf.mxu1  ;;  %v441_v26 = vld [vmem:[%s6673_s4 + $0x28] sm:$0xff]  }
 0x481   : > { %v4403_v50 = vpop.f32.mrf.mxu2 }
 0x482   : > { %v4147_v48 = vadd.f32 %v4146_v31, %v4058_v38  ;;  %v4477_v15 = vmul.f32 %v7876_v39, %v4403_v50  ;;  %v4290_v62 = vmax.f32 %v4258_v21, 0.0 }
 0x484   : > { %v4513_v49 = vadd.f32 %v7885_v12, %v4477_v15  ;;  %v4309_v33 = vpack.c.bf16 %v4290_v62, %v4289_v44  ;;  %v4187_v27 = vadd.f32 %v4147_v48, %v3366_v63  ;;  %v8210_v48 = vld [vmem:[#allocation23_spill] sm:$0xff] }
 0x485   : > { %v3373_v18 = vadd.f32 %v7854_v61, %v8210_v48  ;;  %v445_v48 = vld [vmem:[%s6673_s4 + $0x38] sm:$0xff]  }
 0x486   : > { %v4577_v17 = vadd.f32 %v4545_v7, %v4513_v49  ;;  %4445 = vmatmul.bf16.gmra.mxu2 %v4309_v33  ;;  %v4223_v54 = vmul.f32 %v7712_v56, %v4187_v27 }
 0x487   : > { %v3970_v16 = vpop.f32.mrf.mxu3 }
 0x488   : > { %v4609_v20 = vmax.f32 %v4577_v17, 0.0  ;;  %v4060_v22 = vadd.f32 %v4059_v52, %v3970_v16  ;;  %v4259_v5 = vadd.f32 %v7721_v57, %v4223_v54  ;;  %v4156_v49 = vpop.f32.mrf.mxu1  ;;  %v4548_v17 = vunpack.c.l.bf16 %v441_v26 }
 0x489   : > { %v4406_v55 = vpop.f32.mrf.mxu2 }
 0x48a   : > { %v6096_v2 = vpack.c.bf16 %v4609_v20, %v4608_v60  ;;  %v4149_v23 = vadd.f32 %v4148_v25, %v4060_v22  ;;  %v4478_v36 = vmul.f32 %v7876_v39, %v4406_v55  ;;  %v4291_v0 = vmax.f32 %v4259_v5, 0.0  ;;  %v4067_v25 = vpop.f32.mrf.mxu0 }
 0x48b   : > { %v4549_v20 = vunpack.c.h.bf16 %v441_v26 }
 0x48c   : > { %6160 = vst [vmem:[%s7901_s26 + $0x18] sm:$0xff] %v6096_v2   ;;  %v4188_v6 = vadd.f32 %v4149_v23, %v3368_v4  ;;  %v4514_v14 = vadd.f32 %v7885_v12, %v4478_v36  ;;  %v8211_v4 = vld [vmem:[#allocation26_spill] sm:$0xff] }
 0x48d   : > { %v3376_v23 = vadd.f32 %v7861_v34, %v8211_v4 }
 0x48e   : > { %v4224_v32 = vmul.f32 %v7712_v56, %v4188_v6  ;;  %v4578_v58 = vadd.f32 %v4546_v47, %v4514_v14 }
 0x48f   : > { %v3973_v41 = vpop.f32.mrf.mxu3 }
 0x490   : > { %v4063_v10 = vadd.f32 %v4062_v46, %v3973_v41  ;;  %v4260_v43 = vadd.f32 %v7721_v57, %v4224_v32  ;;  %v4610_v40 = vmax.f32 %v4578_v58, 0.0  ;;  %v4158_v47 = vpop.f32.mrf.mxu1 }
 0x491   : > { %v4408_v8 = vpop.f32.mrf.mxu2 }
 0x492   : > { %v4152_v31 = vadd.f32 %v4151_v51, %v4063_v10  ;;  %v4479_v53 = vmul.f32 %v7876_v39, %v4408_v8  ;;  %v4292_v35 = vmax.f32 %v4260_v43, 0.0  ;;  %v4069_v28 = vpop.f32.mrf.mxu0 }
 0x494   : > { %v4515_v19 = vadd.f32 %v7885_v12, %v4479_v53  ;;  %v4310_v9 = vpack.c.bf16 %v4292_v35, %v4291_v0  ;;  %v4189_v37 = vadd.f32 %v4152_v31, %v3371_v11  ;;  %v443_v35 = vld [vmem:[%s6673_s4 + $0x30] sm:$0xff]  }
 0x496   : > { %v4579_v1 = vadd.f32 %v4547_v24, %v4515_v19  ;;  %4450 = vmatmul.bf16.gmra.mxu2 %v4310_v9  ;;  %v4225_v50 = vmul.f32 %v7712_v56, %v4189_v37  ;;  %v8212_v24 = vld [vmem:[#allocation25_spill] sm:$0xff]  ;;  %v4550_v19 = vunpack.c.l.bf16 %v443_v35  ;;  %v4551_v37 = vunpack.c.h.bf16 %v443_v35  ;;  %v451_v35 = vld [vmem:[%s6673_s4 + $0x50] sm:$0xff]  }
 0x497   : > { %v3975_v42 = vpop.f32.mrf.mxu3  ;;  %v3378_v34 = vadd.f32 %v7869_v30, %v8212_v24 }
 0x498   : > { %v4611_v38 = vmax.f32 %v4579_v1, 0.0  ;;  %v4065_v21 = vadd.f32 %v4064_v29, %v3975_v42  ;;  %v4261_v63 = vadd.f32 %v7721_v57, %v4225_v50 }
 0x499   : > { %v4411_v52 = vpop.f32.mrf.mxu2 }
 0x49a   : > { %v6101_v7 = vpack.c.bf16 %v4611_v38, %v4610_v40  ;;  %v4154_v15 = vadd.f32 %v4153_v3, %v4065_v21  ;;  %v4480_v62 = vmul.f32 %v7876_v39, %v4411_v52  ;;  %v4293_v54 = vmax.f32 %v4261_v63, 0.0 }
 0x49c   : > { %6161 = vst [vmem:[%s7901_s26 + $0x20] sm:$0xff] %v6101_v7   ;;  %v4190_v44 = vadd.f32 %v4154_v15, %v3373_v18  ;;  %v4516_v27 = vadd.f32 %v7885_v12, %v4480_v62  ;;  %v4552_v15 = vunpack.c.l.bf16 %v445_v48 }
 0x49e   : > { %v4226_v45 = vmul.f32 %v7712_v56, %v4190_v44  ;;  %v4580_v13 = vadd.f32 %v4548_v17, %v4516_v27 }
 0x49f   : > { %v3978_v33 = vpop.f32.mrf.mxu3 }
 0x4a0   : > { %v4068_v16 = vadd.f32 %v4067_v25, %v3978_v33  ;;  %v4262_v60 = vadd.f32 %v7721_v57, %v4226_v45  ;;  %v4612_v5 = vmax.f32 %v4580_v13, 0.0  ;;  %v4553_v25 = vunpack.c.h.bf16 %v445_v48 }
 0x4a1   : > { %v4413_v61 = vpop.f32.mrf.mxu2 }
 0x4a2   : > { %v4157_v22 = vadd.f32 %v4156_v49, %v4068_v16  ;;  %v4481_v55 = vmul.f32 %v7876_v39, %v4413_v61  ;;  %v4294_v2 = vmax.f32 %v4262_v60, 0.0  ;;  %v447_v60 = vld [vmem:[%s6673_s4 + $0x40] sm:$0xff]  }
 0x4a4   : > { %v4517_v46 = vadd.f32 %v7885_v12, %v4481_v55  ;;  %v4311_v6 = vpack.c.bf16 %v4294_v2, %v4293_v54  ;;  %v4191_v36 = vadd.f32 %v4157_v22, %v3376_v23  ;;  %v4555_v54 = vunpack.c.h.bf16 %v447_v60 }
 0x4a6   : > { %v4581_v51 = vadd.f32 %v4549_v20, %v4517_v46  ;;  %4455 = vmatmul.bf16.gmra.mxu2 %v4311_v6  ;;  %v4227_v43 = vmul.f32 %v7712_v56, %v4191_v36  ;;  %v4554_v20 = vunpack.c.l.bf16 %v447_v60 }
 0x4a7   : > { %v3980_v32 = vpop.f32.mrf.mxu3 }
 0x4a8   : > { %v4613_v41 = vmax.f32 %v4581_v51, 0.0  ;;  %v4070_v14 = vadd.f32 %v4069_v28, %v3980_v32  ;;  %v4263_v59 = vadd.f32 %v7721_v57, %v4227_v43  ;;  %v449_v28 = vld [vmem:[%s6673_s4 + $0x48] sm:$0xff]  }
 0x4a9   : > { %v4416_v10 = vpop.f32.mrf.mxu2 }
 0x4aa   : > { %v6106_v8 = vpack.c.bf16 %v4613_v41, %v4612_v5  ;;  %v4159_v31 = vadd.f32 %v4158_v47, %v4070_v14  ;;  %v4482_v0 = vmul.f32 %v7876_v39, %v4416_v10  ;;  %v4295_v1 = vmax.f32 %v4263_v59, 0.0 }
 0x4ab   : > { %v4556_v5 = vunpack.c.l.bf16 %v449_v28  ;;  %v4557_v47 = vunpack.c.h.bf16 %v449_v28  ;;  %v4558_v59 = vunpack.c.l.bf16 %v451_v35 }
 0x4ac   : > { %6162 = vst [vmem:[%s7901_s26 + $0x28] sm:$0xff] %v6106_v8   ;;  %v4192_v53 = vadd.f32 %v4159_v31, %v3378_v34  ;;  %v4518_v11 = vadd.f32 %v7885_v12, %v4482_v0 }
 0x4ae   : > { %v4228_v58 = vmul.f32 %v7712_v56, %v4192_v53  ;;  %v4582_v42 = vadd.f32 %v4550_v19, %v4518_v11 }
 0x4b0   : > { %v4264_v9 = vadd.f32 %v7721_v57, %v4228_v58  ;;  %v4614_v21 = vmax.f32 %v4582_v42, 0.0 }
 0x4b1   : > { %v4418_v29 = vpop.f32.mrf.mxu2 }
 0x4b2   : > { %v4483_v30 = vmul.f32 %v7876_v39, %v4418_v29  ;;  %v4296_v3 = vmax.f32 %v4264_v9, 0.0  ;;  %v4559_v9 = vunpack.c.h.bf16 %v451_v35 }
 0x4b4   : > { %v4519_v40 = vadd.f32 %v7885_v12, %v4483_v30  ;;  %v4312_v38 = vpack.c.bf16 %v4296_v3, %v4295_v1 }
 0x4b6   : > { %v4583_v56 = vadd.f32 %v4551_v37, %v4519_v40  ;;  %4460 = vmatmul.bf16.gmra.mxu2 %v4312_v38 }
 0x4b8   : > { %v4615_v52 = vmax.f32 %v4583_v56, 0.0  ;;  %v453_v56 = vld [vmem:[%s6673_s4 + $0x58] sm:$0xff]  }
 0x4b9   : > { %v4421_v50 = vpop.f32.mrf.mxu2 }
 0x4ba   : > { %v6111_v7 = vpack.c.bf16 %v4615_v52, %v4614_v21  ;;  %v4484_v57 = vmul.f32 %v7876_v39, %v4421_v50  ;;  %v4560_v52 = vunpack.c.l.bf16 %v453_v56 }
 0x4bc   : > { %6163 = vst [vmem:[%s7901_s26 + $0x30] sm:$0xff] %v6111_v7   ;;  %v4520_v18 = vadd.f32 %v7885_v12, %v4484_v57  ;;  %v4561_v57 = vunpack.c.h.bf16 %v453_v56 }
 0x4be   : > { %v4584_v26 = vadd.f32 %v4552_v15, %v4520_v18 }
 0x4c0   : > { %v4616_v49 = vmax.f32 %v4584_v26, 0.0 }
 0x4c1   : > { %v4423_v44 = vpop.f32.mrf.mxu2 }
 0x4c2   : > { %v4485_v62 = vmul.f32 %v7876_v39, %v4423_v44 }
 0x4c4   : > { %v4521_v45 = vadd.f32 %v7885_v12, %v4485_v62 }
 0x4c6   : > { %v4585_v63 = vadd.f32 %v4553_v25, %v4521_v45 }
 0x4c8   : > { %v4617_v33 = vmax.f32 %v4585_v63, 0.0  ;;  %v455_v63 = vld [vmem:[%s6673_s4 + $0x60] sm:$0xff]  }
 0x4c9   : > { %v4426_v27 = vpop.f32.mrf.mxu2 }
 0x4ca   : > { %v6116_v17 = vpack.c.bf16 %v4617_v33, %v4616_v49  ;;  %v4486_v16 = vmul.f32 %v7876_v39, %v4426_v27  ;;  %v4562_v33 = vunpack.c.l.bf16 %v455_v63 }
 0x4cc   : > { %6164 = vst [vmem:[%s7901_s26 + $0x38] sm:$0xff] %v6116_v17   ;;  %v4522_v61 = vadd.f32 %v7885_v12, %v4486_v16  ;;  %v4563_v16 = vunpack.c.h.bf16 %v455_v63 }
 0x4ce   : > { %v4586_v2 = vadd.f32 %v4554_v20, %v4522_v61 }
 0x4d0   : > { %v4618_v23 = vmax.f32 %v4586_v2, 0.0 }
 0x4d1   : > { %v4428_v22 = vpop.f32.mrf.mxu2 }
 0x4d2   : > { %v4487_v55 = vmul.f32 %v7876_v39, %v4428_v22 }
 0x4d4   : > { %v4523_v13 = vadd.f32 %v7885_v12, %v4487_v55 }
 0x4d6   : > { %v4587_v4 = vadd.f32 %v4555_v54, %v4523_v13 }
 0x4d8   : > { %v4619_v46 = vmax.f32 %v4587_v4, 0.0  ;;  %v457_v4 = vld [vmem:[%s6673_s4 + $0x68] sm:$0xff]  }
 0x4d9   : > { %v4431_v6 = vpop.f32.mrf.mxu2 }
 0x4da   : > { %v6121_v36 = vpack.c.bf16 %v4619_v46, %v4618_v23  ;;  %v4488_v51 = vmul.f32 %v7876_v39, %v4431_v6  ;;  %v4564_v46 = vunpack.c.l.bf16 %v457_v4 }
 0x4dc   : > { %6165 = vst [vmem:[%s7901_s26 + $0x40] sm:$0xff] %v6121_v36   ;;  %v4524_v32 = vadd.f32 %v7885_v12, %v4488_v51  ;;  %v4565_v51 = vunpack.c.h.bf16 %v457_v4 }
 0x4de   : > { %v4588_v10 = vadd.f32 %v4556_v5, %v4524_v32 }
 0x4e0   : > { %v4620_v24 = vmax.f32 %v4588_v10, 0.0 }
 0x4e1   : > { %v4433_v41 = vpop.f32.mrf.mxu2 }
 0x4e2   : > { %v4489_v14 = vmul.f32 %v7876_v39, %v4433_v41 }
 0x4e4   : > { %v4525_v43 = vadd.f32 %v7885_v12, %v4489_v14 }
 0x4e6   : > { %v4589_v8 = vadd.f32 %v4557_v47, %v4525_v43 }
 0x4e8   : > { %v4621_v34 = vmax.f32 %v4589_v8, 0.0  ;;  %v459_v8 = vld [vmem:[%s6673_s4 + $0x70] sm:$0xff]  }
 0x4e9   : > { %v4436_v31 = vpop.f32.mrf.mxu2 }
 0x4ea   : > { %v6126_v53 = vpack.c.bf16 %v4621_v34, %v4620_v24  ;;  %v4490_v0 = vmul.f32 %v7876_v39, %v4436_v31  ;;  %v4566_v34 = vunpack.c.l.bf16 %v459_v8 }
 0x4ec   : > { %6166 = vst [vmem:[%s7901_s26 + $0x48] sm:$0xff] %v6126_v53   ;;  %v4526_v58 = vadd.f32 %v7885_v12, %v4490_v0  ;;  %v4567_v0 = vunpack.c.h.bf16 %v459_v8 }
 0x4ee   : > { %v4590_v29 = vadd.f32 %v4558_v59, %v4526_v58 }
 0x4f0   : > { %v4622_v1 = vmax.f32 %v4590_v29, 0.0 }
 0x4f1   : > { %v4438_v11 = vpop.f32.mrf.mxu2 }
 0x4f2   : > { %v4491_v19 = vmul.f32 %v7876_v39, %v4438_v11 }
 0x4f4   : > { %v4527_v30 = vadd.f32 %v7885_v12, %v4491_v19 }
 0x4f6   : > { %v4591_v37 = vadd.f32 %v4559_v9, %v4527_v30 }
 0x4f8   : > { %v4623_v3 = vmax.f32 %v4591_v37, 0.0  ;;  %v461_v37 = vld [vmem:[%s6673_s4 + $0x78] sm:$0xff]   ;;  %s4711_s4 = sshll.u32 %s7901_s26, 4  ;;  %s4712_s4 = int_to_ptr.vmem [resolvable:$true] %s4711_s4 }
 0x4f9   : > { %v4441_v42 = vpop.f32.mrf.mxu2 }
 0x4fa   : > { %v6131_v40 = vpack.c.bf16 %v4623_v3, %v4622_v1  ;;  %v4492_v38 = vmul.f32 %v7876_v39, %v4441_v42  ;;  %v4568_v3 = vunpack.c.l.bf16 %v461_v37 }
 0x4fc   : > { %6167 = vst [vmem:[%s7901_s26 + $0x50] sm:$0xff] %v6131_v40   ;;  %v4528_v21 = vadd.f32 %v7885_v12, %v4492_v38  ;;  %v4569_v38 = vunpack.c.h.bf16 %v461_v37 }
 0x4fe   : > { %v4592_v48 = vadd.f32 %v4560_v52, %v4528_v21 }
 0x500   : > { %v4624_v44 = vmax.f32 %v4592_v48, 0.0 }
 0x501   : > { %v4443_v50 = vpop.f32.mrf.mxu2 }
 0x502   : > { %v4493_v7 = vmul.f32 %v7876_v39, %v4443_v50 }
 0x504   : > { %v4529_v18 = vadd.f32 %v7885_v12, %v4493_v7 }
 0x506   : > { %v4593_v15 = vadd.f32 %v4561_v57, %v4529_v18 }
 0x508   : > { %v4625_v62 = vmax.f32 %v4593_v15, 0.0 }
 0x509   : > { %v4446_v25 = vpop.f32.mrf.mxu2 }
 0x50a   : > { %v6136_v26 = vpack.c.bf16 %v4625_v62, %v4624_v44  ;;  %v4494_v45 = vmul.f32 %v7876_v39, %v4446_v25 }
 0x50c   : > { %6168 = vst [vmem:[%s7901_s26 + $0x58] sm:$0xff] %v6136_v26   ;;  %v4530_v49 = vadd.f32 %v7885_v12, %v4494_v45 }
 0x50e   : > { %v4594_v60 = vadd.f32 %v4562_v33, %v4530_v49 }
 0x510   : > { %v4626_v22 = vmax.f32 %v4594_v60, 0.0 }
 0x511   : > { %v4448_v27 = vpop.f32.mrf.mxu2 }
 0x512   : > { %v4495_v17 = vmul.f32 %v7876_v39, %v4448_v27 }
 0x514   : > { %v4531_v61 = vadd.f32 %v7885_v12, %v4495_v17 }
 0x516   : > { %v4595_v20 = vadd.f32 %v4563_v16, %v4531_v61 }
 0x518   : > { %v4627_v55 = vmax.f32 %v4595_v20, 0.0 }
 0x519   : > { %v4451_v54 = vpop.f32.mrf.mxu2 }
 0x51a   : > { %v6141_v2 = vpack.c.bf16 %v4627_v55, %v4626_v22  ;;  %v4496_v13 = vmul.f32 %v7876_v39, %v4451_v54 }
 0x51c   : > { %6169 = vst [vmem:[%s7901_s26 + $0x60] sm:$0xff] %v6141_v2   ;;  %v4532_v23 = vadd.f32 %v7885_v12, %v4496_v13 }
 0x51e   : > { %v4596_v28 = vadd.f32 %v4564_v46, %v4532_v23 }
 0x520   : > { %v4628_v41 = vmax.f32 %v4596_v28, 0.0 }
 0x521   : > { %v4453_v6 = vpop.f32.mrf.mxu2 }
 0x522   : > { %v4497_v36 = vmul.f32 %v7876_v39, %v4453_v6 }
 0x524   : > { %v4533_v32 = vadd.f32 %v7885_v12, %v4497_v36 }
 0x526   : > { %v4597_v5 = vadd.f32 %v4565_v51, %v4533_v32 }
 0x528   : > { %v4629_v14 = vmax.f32 %v4597_v5, 0.0 }
 0x529   : > { %v4456_v47 = vpop.f32.mrf.mxu2 }
 0x52a   : > { %v6146_v10 = vpack.c.bf16 %v4629_v14, %v4628_v41  ;;  %v4498_v43 = vmul.f32 %v7876_v39, %v4456_v47 }
 0x52c   : > { %6170 = vst [vmem:[%s7901_s26 + $0x68] sm:$0xff] %v6146_v10   ;;  %v4534_v24 = vadd.f32 %v7885_v12, %v4498_v43 }
 0x52e   : > { %v4598_v35 = vadd.f32 %v4566_v34, %v4534_v24 }
 0x530   : > { %v4630_v11 = vmax.f32 %v4598_v35, 0.0 }
 0x531   : > { %v4458_v31 = vpop.f32.mrf.mxu2 }
 0x532   : > { %v4499_v53 = vmul.f32 %v7876_v39, %v4458_v31 }
 0x534   : > { %v4535_v58 = vadd.f32 %v7885_v12, %v4499_v53 }
 0x536   : > { %v4599_v59 = vadd.f32 %v4567_v0, %v4535_v58 }
 0x538   : > { %v4631_v19 = vmax.f32 %v4599_v59, 0.0 }
 0x539   : > { %v4461_v9 = vpop.f32.mrf.mxu2 }
 0x53a   : > { %v6151_v29 = vpack.c.bf16 %v4631_v19, %v4630_v11  ;;  %v4500_v30 = vmul.f32 %v7876_v39, %v4461_v9 }
 0x53c   : > { %6171 = vst [vmem:[%s7901_s26 + $0x70] sm:$0xff] %v6151_v29   ;;  %v4536_v1 = vadd.f32 %v7885_v12, %v4500_v30 }
 0x53e   : > { %v4600_v56 = vadd.f32 %v4568_v3, %v4536_v1 }
 0x540   : > { %v4632_v50 = vmax.f32 %v4600_v56, 0.0 }
 0x541   : > { %v4463_v42 = vpop.f32.mrf.mxu2 }
 0x542   : > { %v4501_v40 = vmul.f32 %v7876_v39, %v4463_v42 }
 0x544   : > { %v4537_v21 = vadd.f32 %v7885_v12, %v4501_v40 }
 0x546   : > { %v4601_v52 = vadd.f32 %v4569_v38, %v4537_v21 }
 0x548   : > { %v4633_v7 = vmax.f32 %v4601_v52, 0.0 }
 0x54a   : > { %v6156_v57 = vpack.c.bf16 %v4633_v7, %v4632_v50 }
 0x54c   : > { %6172 = vst [vmem:[%s7901_s26 + $0x78] sm:$0xff] %v6156_v57  }
 0x54d   : > { %6434 = shalt.err (!%p6431_p10)
}
 0x54e   : > { %s6489_s1 = smov 64   ;;  %s6490_s26 = smov 4  }
 0x54f   : > { %6211 = dma.vmem_to_hbm [thread:$0]  (%p6637_p3), %s4712_s4, 2048, %s4714_s28, %s4699_s17, %s6489_s1, %s6489_s1, %s6490_s26  }
 0x550 PF: > { %s4728_s7 = sand.u32 1, %s6469_s13   ;;  %p8213_p12 = scmp.ge.s32.totalorder %s6481_s16, 2 }
 0x551   : > { %s4729_s22 = scalar_lea.sflag [#allocation5], %s4728_s7 }
 0x552   : > { %p6228_p13 = pnand %p8213_p12, %p6581_p6 }
 0x554   : > { %p6229_p0 = pneg %p6228_p13 }
 0x556   : > { %6464 = dma.done.wait (%p6229_p0), %s4729_s22, 2048  }
 0x557   : > { %6466 = vsyncadd (%p6229_p0), %s4729_s22, 4294965248  ;;  %s8214_s27 = sld [smem:[#allocation16_spill]]  ;;  %p25_p5 = scmp.ge.s32.totalorder %s6619_s29, 4  }
 0x558   : > { %s8215_s13 = smov %s6473_s14  ;;  %s8216_s14 = smov %s6477_s15 }
 0x559   : > { %s8218_s16 = smov %s6619_s29  ;;  %27 = sbr.rel (!%p25_p5) target bundleno = 11 (0xb), region = 122 }
 0x55d   : > { %s8217_s15 = smov %s8214_s27 }
 0x55e   :  { %4735 = vsyncpa [#allocation4], 1 }
 0x55f   :  { %4737 = vsyncpa [#allocation4 + $0x1], 1 }
 0x560   :  { %4738 = vsyncpa [#allocation7], 1 }
 0x561   :  { %4739 = vsyncpa [#allocation10], 1 }
 0x562   :  { %4740 = vsyncpa [#allocation5], 1 }
 0x563   :  { %4742 = vsyncpa [#allocation5 + $0x1], 1 }

</bundles_post_ra>
